<compile_context>
chip_gen: v5e
topology: v5e:2x2
jax: 0.10.0
libtpu: 0.0.40
codegen_flags: <defaults>
</compile_context>

<pallas_src>
import collections
import math
from functools import partial

import jax
import jax.numpy as jnp
from jax.experimental import pallas as pl
from jax.experimental.pallas import tpu as pltpu

InvertResidualConfig = collections.namedtuple(
    "InvertResidualConfig",
    ["input_channels", "kernel", "expanded_channels", "out_channels",
     "use_se", "use_hs", "stride", "dilation"])

BN_EPS = 1e-5


def _query_vmem_capacity():
    try:
        info = pltpu.get_tpu_info()
        return int(getattr(info, "vmem_capacity_bytes", 64 * 1024 * 1024))
    except Exception:
        return 64 * 1024 * 1024


_VMEM_CAP = _query_vmem_capacity()
# Generation-aware scoped-VMEM limit: half of physical, capped at 64 MiB
# (v5e/v6e: 128 MiB physical -> 64 MiB limit; v7x: 64 MiB physical -> 32 MiB).
VMEM_LIMIT_BYTES = int(min(64 * 1024 * 1024, max(16 * 1024 * 1024, _VMEM_CAP // 2)))
# Larger pointwise row tiles only where VMEM is plentiful (v5e/v6e 128 MiB parts).
MAX_ROW_TILE = 2048 if _VMEM_CAP >= (100 << 20) else 1024


def _make_divisible(v, divisor, min_value=None):
    if min_value is None:
        min_value = divisor
    new_v = max(min_value, int(v + divisor / 2) // divisor * divisor)
    if new_v < 0.9 * v:
        new_v += divisor
    return new_v


# ----------------------------- Pallas kernels ------------------------------

def _apply_act(y, act):
    if act == "relu6":                      # nn.ReLU6 (per the module spec)
        return jnp.minimum(jnp.maximum(y, 0.0), 6.0)
    if act == "hswish":                     # nn.Hardswish: x * relu6(x+3)/6
        return y * jnp.minimum(jnp.maximum(y + 3.0, 0.0), 6.0) * (1.0 / 6.0)
    return y


def _pw_kernel(x_ref, w_ref, b_ref, o_ref, *, act):
    """1x1 conv (+folded BN) + activation on a (TILE_M, Cin) row tile.
    Activation tile cast to bf16 at the dot; f32 accumulate."""
    y = jnp.dot(x_ref[...].astype(jnp.bfloat16), w_ref[...],
                preferred_element_type=jnp.float32) + b_ref[...]
    o_ref[...] = _apply_act(y, act)


def _block_kernel(*refs, act, tap_offsets, m_pad, inv_hw,
                  has_expand, has_se, has_res):
    """Fused InvertedResidual for ONE sample:
       expand 1x1 -> depthwise kxk -> SE -> project 1x1 (+ residual).
    All tensors are 2D (rows, channels); the expanded activation lives only in
    the VMEM scratch `e_ref` and never leaves VMEM."""
    it = iter(refs)
    x_ref = next(it)                               # (rows, Cin) padded flat slab
    mask_ref = next(it) if has_expand else None    # (rows, 1) interior mask
    omask_ref = next(it) if has_se else None       # (m_pad, 1) valid-column mask
    if has_expand:
        ew_ref, eb_ref = next(it), next(it)
    dww_ref, dwb_ref = next(it), next(it)
    if has_se:
        sw1_ref, sb1_ref, sw2_ref, sb2_ref = next(it), next(it), next(it), next(it)
    pw_ref, pb_ref = next(it), next(it)
    res_ref = next(it) if has_res else None
    o_ref = next(it)                               # (m_pad, Cout) output
    e_ref = next(it)                               # VMEM scratch (rows, Cexp)

    # 1) expand 1x1 (+folded BN) + act; mask zeroes the conv-padding rows so the
    #    depthwise sees zeros there (as the reference's zero-padded input would).
    if has_expand:
        e = jnp.dot(x_ref[...].astype(jnp.bfloat16), ew_ref[...],
                    preferred_element_type=jnp.float32) + eb_ref[...]
        e_ref[...] = _apply_act(e, act) * mask_ref[...]
    else:
        e_ref[...] = x_ref[...]                    # padding already zero

    # 2) depthwise kxk (+folded BN) + act: each tap is a static row-offset slice
    #    of the flat slab; pairwise tree-sum shortens the VALU dependency chain.
    w = dww_ref[...]                               # (k*k, Cexp)
    parts = [e_ref[ofs:ofs + m_pad, :] * w[t:t + 1, :]
             for t, ofs in enumerate(tap_offsets)]
    while len(parts) > 1:
        nxt = [parts[i] + parts[i + 1] for i in range(0, len(parts) - 1, 2)]
        if len(parts) % 2:
            nxt.append(parts[-1])
        parts = nxt
    dw = _apply_act(parts[0] + dwb_ref[...], act)  # (m_pad, Cexp)

    # 3) SqueezeExcitation fused in the epilogue (global pool -> fc -> ReLU ->
    #    fc -> Sigmoid, per spec: scale_activation=nn.Sigmoid).
    if has_se:
        pooled = jnp.sum(dw * omask_ref[...], axis=0, keepdims=True) * inv_hw
        s = jnp.dot(pooled, sw1_ref[...], preferred_element_type=jnp.float32) + sb1_ref[...]
        s = jnp.maximum(s, 0.0)
        s = jnp.dot(s, sw2_ref[...], preferred_element_type=jnp.float32) + sb2_ref[...]
        dw = dw * (1.0 / (1.0 + jnp.exp(-s)))

    # 4) projection 1x1 (+folded BN, no activation), fused residual add.
    out = jnp.dot(dw.astype(jnp.bfloat16), pw_ref[...],
                  preferred_element_type=jnp.float32) + pb_ref[...]
    if has_res:
        out = out + res_ref[...]
    o_ref[...] = out


# --------------------------- pallas_call wrappers ---------------------------

def pointwise_conv_bn_act(x2, w, b, act):
    """x2: (M, Cin) rows (N folded into rows); w: bf16 (Cin, Cout); b: f32 (1, Cout)."""
    M, Cin = x2.shape
    Cout = w.shape[1]
    tm = M if M <= MAX_ROW_TILE else MAX_ROW_TILE
    grid = (pl.cdiv(M, tm),)
    return pl.pallas_call(
        partial(_pw_kernel, act=act),
        out_shape=jax.ShapeDtypeStruct((M, Cout), jnp.float32),
        grid=grid,
        in_specs=[pl.BlockSpec((tm, Cin), lambda t: (t, 0)),
                  pl.BlockSpec((Cin, Cout), lambda t: (0, 0)),   # VMEM-resident
                  pl.BlockSpec((1, Cout), lambda t: (0, 0))],
        out_specs=pl.BlockSpec((tm, Cout), lambda t: (t, 0)),
        compiler_params=pltpu.CompilerParams(
            dimension_semantics=("parallel",),
            vmem_limit_bytes=VMEM_LIMIT_BYTES),
        cost_estimate=pl.CostEstimate(
            flops=int(2 * M * Cin * Cout), transcendentals=0,
            bytes_accessed=int(4 * M * (Cin + Cout) + 2 * Cin * Cout)),
    )(x2, w, b)


def _dw_geometry(H, W, k, stride, dilation):
    """Static geometry for a 'same' kxk depthwise conv on a padded,
    stride-phase-split, row-flattened slab.  Tap t for flat output position q
    (output kept at padded/split width Wc) lives at slab row q + taps[t]."""
    s = stride
    pad = (k - 1) // 2 * dilation
    Hp, Wp = H + 2 * pad, W + 2 * pad
    Ho = (Hp - dilation * (k - 1) - 1) // s + 1
    Wo = (Wp - dilation * (k - 1) - 1) // s + 1
    Hc, Wc = -(-Hp // s), -(-Wp // s)
    taps = []
    for i in range(k):
        for j in range(k):
            oi, oj = i * dilation, j * dilation
            phase = (oi % s) * s + (oj % s)
            taps.append((phase * Hc + oi // s) * Wc + (oj // s))
    m_pad = Ho * Wc
    rows = max(max(taps) + m_pad, s * s * Hc * Wc)
    rows = ((rows + 7) // 8) * 8                   # sublane-friendly
    return pad, Hc, Wc, Ho, Wo, tuple(taps), m_pad, rows


def _prepare_dw_slab(x, k, stride, dilation):
    """x: (N, H, W, C) -> flat padded (and stride-phase-split) slab (N, rows, C)."""
    N, H, W, C = x.shape
    pad, Hc, Wc, Ho, Wo, taps, m_pad, rows = _dw_geometry(H, W, k, stride, dilation)
    s = stride
    xp = jnp.pad(x, ((0, 0), (pad, pad), (pad, pad), (0, 0)))
    if s > 1:
        Hp, Wp = H + 2 * pad, W + 2 * pad
        if Hc * s != Hp or Wc * s != Wp:
            xp = jnp.pad(xp, ((0, 0), (0, Hc * s - Hp), (0, Wc * s - Wp), (0, 0)))
        xp = xp.reshape(N, Hc, s, Wc, s, C).transpose(0, 2, 4, 1, 3, 5)
    flat = xp.reshape(N, -1, C)
    flat = jnp.pad(flat, ((0, 0), (0, rows - flat.shape[1]), (0, 0)))
    return flat, taps, m_pad, rows, Ho, Wo, Wc


def inverted_residual(x, cfg, p):
    """One fused InvertedResidual block.  x: (N, H, W, Cin) NHWC f32."""
    N, H, W, Cin = x.shape
    act = "hswish" if cfg.use_hs else "relu6"
    use_res = cfg.stride == 1 and cfg.input_channels == cfg.out_channels
    stride = 1 if cfg.dilation > 1 else cfg.stride
    has_expand = cfg.expanded_channels != cfg.input_channels
    Cexp, Cout, k, dil = cfg.expanded_channels, cfg.out_channels, cfg.kernel, cfg.dilation

    slab, taps, m_pad, rows, Ho, Wo, Wc = _prepare_dw_slab(x, k, stride, dil)

    args = [slab]
    in_specs = [pl.BlockSpec((None, rows, Cin), lambda n: (n, 0, 0))]

    if has_expand:
        # interior mask (1 on real pixels, 0 on conv/extra padding), same layout
        mask = _prepare_dw_slab(jnp.ones((1, H, W, 1), jnp.float32), k, stride, dil)[0][0]
        args.append(mask)
        in_specs.append(pl.BlockSpec((rows, 1), lambda n: (0, 0)))
    if cfg.use_se:
        # valid-column mask over the padded-width output rows (for the SE pool)
        omask = (jnp.tile(jnp.arange(Wc) < Wo, (Ho,))
                 .astype(jnp.float32).reshape(m_pad, 1))
        args.append(omask)
        in_specs.append(pl.BlockSpec((m_pad, 1), lambda n: (0, 0)))
    if has_expand:
        args += [p["exp_w"], p["exp_b"]]
        in_specs += [pl.BlockSpec((Cin, Cexp), lambda n: (0, 0)),
                     pl.BlockSpec((1, Cexp), lambda n: (0, 0))]
    args += [p["dw_w"], p["dw_b"]]
    in_specs += [pl.BlockSpec((k * k, Cexp), lambda n: (0, 0)),
                 pl.BlockSpec((1, Cexp), lambda n: (0, 0))]
    csq = p["se_w1"].shape[1] if cfg.use_se else 0
    if cfg.use_se:
        args += [p["se_w1"], p["se_b1"], p["se_w2"], p["se_b2"]]
        in_specs += [pl.BlockSpec((Cexp, csq), lambda n: (0, 0)),
                     pl.BlockSpec((1, csq), lambda n: (0, 0)),
                     pl.BlockSpec((csq, Cexp), lambda n: (0, 0)),
                     pl.BlockSpec((1, Cexp), lambda n: (0, 0))]
    args += [p["proj_w"], p["proj_b"]]
    in_specs += [pl.BlockSpec((Cexp, Cout), lambda n: (0, 0)),
                 pl.BlockSpec((1, Cout), lambda n: (0, 0))]
    if use_res:
        res = jnp.pad(x, ((0, 0), (0, 0), (0, Wc - W), (0, 0))).reshape(N, m_pad, Cin)
        args.append(res)
        in_specs.append(pl.BlockSpec((None, m_pad, Cout), lambda n: (n, 0, 0)))

    flops = N * (2 * rows * Cin * Cexp * (1 if has_expand else 0)
                 + 2 * k * k * m_pad * Cexp
                 + 2 * m_pad * Cexp * Cout
                 + 4 * Cexp * csq)
    bytes_accessed = (4 * N * (rows * Cin + m_pad * Cout
                               + (m_pad * Cin if use_res else 0))
                      + 2 * (Cin * Cexp + Cexp * Cout) + 8 * Cexp * max(csq, 1))

    out = pl.pallas_call(
        partial(_block_kernel, act=act, tap_offsets=taps, m_pad=m_pad,
                inv_hw=1.0 / (Ho * Wo), has_expand=has_expand,
                has_se=cfg.use_se, has_res=use_res),
        out_shape=jax.ShapeDtypeStruct((N, m_pad, Cout), jnp.float32),
        grid=(N,),
        in_specs=in_specs,
        out_specs=pl.BlockSpec((None, m_pad, Cout), lambda n: (n, 0, 0)),
        scratch_shapes=[pltpu.VMEM((rows, Cexp), jnp.float32)],
        compiler_params=pltpu.CompilerParams(
            dimension_semantics=("parallel",),
            vmem_limit_bytes=VMEM_LIMIT_BYTES),
        cost_estimate=pl.CostEstimate(
            flops=int(flops),
            transcendentals=int(N * Cexp if cfg.use_se else 0),
            bytes_accessed=int(bytes_accessed)),
    )(*args)

    # drop the padded-width garbage columns outside the kernel
    return out.reshape(N, Ho, Wc, Cout)[:, :, :Wo, :]


# ------------------------------- JAX glue -----------------------------------

def _stem_im2col(x, k, stride, dilation, pad):
    """im2col for the 3-channel stem conv (tiny input depth -> cheap expansion)."""
    N, H, W, C = x.shape
    xp = jnp.pad(x, ((0, 0), (pad, pad), (pad, pad), (0, 0)))
    Hp, Wp = H + 2 * pad, W + 2 * pad
    Ho = (Hp - dilation * (k - 1) - 1) // stride + 1
    Wo = (Wp - dilation * (k - 1) - 1) // stride + 1
    cols = []
    for i in range(k):
        for j in range(k):
            r0, c0 = i * dilation, j * dilation
            cols.append(xp[:, r0:r0 + stride * (Ho - 1) + 1:stride,
                           c0:c0 + stride * (Wo - 1) + 1:stride, :])
    xcol = jnp.stack(cols, axis=3)                    # (N, Ho, Wo, k*k, C)
    return xcol.reshape(N * Ho * Wo, k * k * C), (N, Ho, Wo)


def make_params(key, base_channels, cfgs):
    """Deterministic init mirroring the module: kaiming_normal(fan_out) convs,
    zero biases, BatchNorm (gamma=1, beta=0, mean=0, var=1) folded in.
    Matmul (MXU) weights stored bf16; depthwise / SE weights stay f32."""
    bn_scale = 1.0 / math.sqrt(1.0 + BN_EPS)
    keys = iter(jax.random.split(key, 128))
    params = []
    k = 3
    w = jax.random.normal(next(keys), (k, k, 3, base_channels), jnp.float32)
    w = w * math.sqrt(2.0 / (base_channels * k * k))
    params.append({
        "w": (w * bn_scale).reshape(k * k * 3, base_channels).astype(jnp.bfloat16),
        "b": jnp.zeros((1, base_channels), jnp.float32),
    })
    for cfg in cfgs:
        p = {}
        if cfg.expanded_channels != cfg.input_channels:
            we = jax.random.normal(next(keys), (cfg.input_channels, cfg.expanded_channels),
                                   jnp.float32) * math.sqrt(2.0 / cfg.expanded_channels)
            p["exp_w"] = (we * bn_scale).astype(jnp.bfloat16)
            p["exp_b"] = jnp.zeros((1, cfg.expanded_channels), jnp.float32)
        kk = cfg.kernel
        wd = jax.random.normal(next(keys), (kk * kk, cfg.expanded_channels),
                               jnp.float32) * math.sqrt(2.0 / (kk * kk))
        p["dw_w"] = wd * bn_scale
        p["dw_b"] = jnp.zeros((1, cfg.expanded_channels), jnp.float32)
        if cfg.use_se:
            sq = _make_divisible(cfg.expanded_channels // 4, 8)
            p["se_w1"] = jax.random.normal(next(keys), (cfg.expanded_channels, sq),
                                           jnp.float32) * math.sqrt(2.0 / sq)
            p["se_b1"] = jnp.zeros((1, sq), jnp.float32)
            p["se_w2"] = jax.random.normal(next(keys), (sq, cfg.expanded_channels),
                                           jnp.float32) * math.sqrt(2.0 / cfg.expanded_channels)
            p["se_b2"] = jnp.zeros((1, cfg.expanded_channels), jnp.float32)
        wp = jax.random.normal(next(keys), (cfg.expanded_channels, cfg.out_channels),
                               jnp.float32) * math.sqrt(2.0 / cfg.out_channels)
        p["proj_w"] = (wp * bn_scale).astype(jnp.bfloat16)
        p["proj_b"] = jnp.zeros((1, cfg.out_channels), jnp.float32)
        params.append(p)
    return params


def mobilenet_v3_forward(x_nchw, params, cfgs, out_features, out_names):
    x = jnp.transpose(x_nchw, (0, 2, 3, 1))               # NCHW -> NHWC
    # features[0]: stem Conv(3->base, k=3, s=2, p=1) + BN + ReLU6 as im2col matmul
    xcol, (N, Ho, Wo) = _stem_im2col(x, 3, 2, 1, 1)
    base = params[0]["w"].shape[1]
    y = pointwise_conv_bn_act(xcol, params[0]["w"], params[0]["b"], "relu6")
    x = y.reshape(N, Ho, Wo, base)
    feats = [x]
    for cfg, p in zip(cfgs, params[1:]):
        x = inverted_residual(x, cfg, p)
        feats.append(x)
    return {name: jnp.transpose(feats[i], (0, 3, 1, 2))    # back to NCHW
            for name, i in zip(out_names, out_features)}


if __name__ == "__main__":
    key = jax.random.PRNGKey(0)
    kx, kp = jax.random.split(key)

    x = jax.random.normal(kx, (2, 3, 16, 16), jnp.float32)   # NCHW, like PyTorch

    base_channels = 8
    cfg_tuples = [
        # (in, kernel, expanded, out, use_se, use_hs, stride, dilation)
        (8, 3, 8, 8, False, False, 1, 1),
        (8, 3, 16, 16, True, True, 2, 1),
        (16, 3, 32, 16, True, True, 1, 1),
    ]
    cfgs = [InvertResidualConfig(*c) for c in cfg_tuples]
    out_features = [0, 2, 3]
    out_names = ["f0", "f2", "f3"]

    params = make_params(kp, base_channels, cfgs)
    fwd = jax.jit(lambda xx, pp: mobilenet_v3_forward(xx, pp, cfgs, out_features, out_names))
    outs = jax.block_until_ready(fwd(x, params))

    assert outs["f0"].shape == (2, 8, 8, 8)
    assert outs["f2"].shape == (2, 16, 4, 4)
    assert outs["f3"].shape == (2, 16, 4, 4)
    assert all(bool(jnp.all(jnp.isfinite(v))) for v in outs.values())
    print("KERNEL_OK")
</pallas_src>

<mosaic_0001>
module attributes {stable_mosaic.version = 11 : i64} {
  func.func @_pw_kernel(%arg0: i32, %arg1: memref<128x27xf32, #tpu.memory_space<vmem>>, %arg2: memref<27x8xbf16, #tpu.memory_space<vmem>>, %arg3: memref<1x8xf32, #tpu.memory_space<vmem>>, %arg4: memref<128x8xf32, #tpu.memory_space<vmem>>) attributes {dimension_semantics = [#tpu.dimension_semantics<parallel>], iteration_bounds = array<i64: 1>, scalar_prefetch = 0 : i64, scratch_operands = 0 : i64, tpu.core_type = #tpu.core_type<tc>, window_params = [{transform_indices = @transform_0, window_bounds = array<i64: 128, 27>}, {pipeline_mode = #tpu.pipeline_mode<synchronous>, transform_indices = @transform_1, window_bounds = array<i64: 27, 8>}, {pipeline_mode = #tpu.pipeline_mode<synchronous>, transform_indices = @transform_2, window_bounds = array<i64: 1, 8>}, {transform_indices = @transform_3, window_bounds = array<i64: 128, 8>}]} {
    %c0 = arith.constant 0 : index
    %c0_0 = arith.constant 0 : index
    %0 = vector.load %arg1[%c0, %c0_0] : memref<128x27xf32, #tpu.memory_space<vmem>>, vector<128x27xf32>
    %1 = arith.truncf %0 : vector<128x27xf32> to vector<128x27xbf16>
    %c0_1 = arith.constant 0 : index
    %c0_2 = arith.constant 0 : index
    %2 = vector.load %arg2[%c0_1, %c0_2] : memref<27x8xbf16, #tpu.memory_space<vmem>>, vector<27x8xbf16>
    %cst = arith.constant dense<0.000000e+00> : vector<128x8xf32>
    %3 = tpu.matmul %1, %2, %cst {dimension_numbers = #tpu.dot_dimension_numbers<[1], [0], [0], [1], [0, 0, 1, 1], [], []>} : vector<128x27xbf16>, vector<27x8xbf16>, vector<128x8xf32> -> vector<128x8xf32>
    %c0_3 = arith.constant 0 : index
    %c0_4 = arith.constant 0 : index
    %4 = vector.load %arg3[%c0_3, %c0_4] : memref<1x8xf32, #tpu.memory_space<vmem>>, vector<1x8xf32>
    %5 = vector.broadcast %4 : vector<1x8xf32> to vector<128x8xf32>
    %6 = arith.addf %3, %5 : vector<128x8xf32>
    %cst_5 = arith.constant 0.000000e+00 : f32
    %7 = vector.broadcast %cst_5 : f32 to vector<128x8xf32>
    %8 = arith.maximumf %6, %7 : vector<128x8xf32>
    %cst_6 = arith.constant 6.000000e+00 : f32
    %9 = vector.broadcast %cst_6 : f32 to vector<128x8xf32>
    %10 = arith.minimumf %8, %9 : vector<128x8xf32>
    %c0_7 = arith.constant 0 : index
    %c0_8 = arith.constant 0 : index
    %11 = vector.load %arg4[%c0_7, %c0_8] : memref<128x8xf32, #tpu.memory_space<vmem>>, vector<128x8xf32>
    tpu.vector_store %arg4[%c0_7, %c0_8], %10 {strides = array<i32>} : memref<128x8xf32, #tpu.memory_space<vmem>>, vector<128x8xf32>,
    return
  }
  func.func @transform_0(%arg0: i32) -> (i32, i32) {
    %c0_i32 = arith.constant 0 : i32
    %c0_i32_0 = arith.constant 0 : i32
    return %arg0, %c0_i32 : i32, i32
  }
  func.func @transform_1(%arg0: i32) -> (i32, i32) {
    %c0_i32 = arith.constant 0 : i32
    %c0_i32_0 = arith.constant 0 : i32
    %c0_i32_1 = arith.constant 0 : i32
    return %c0_i32, %c0_i32_0 : i32, i32
  }
  func.func @transform_2(%arg0: i32) -> (i32, i32) {
    %c0_i32 = arith.constant 0 : i32
    %c0_i32_0 = arith.constant 0 : i32
    %c0_i32_1 = arith.constant 0 : i32
    return %c0_i32, %c0_i32_0 : i32, i32
  }
  func.func @transform_3(%arg0: i32) -> (i32, i32) {
    %c0_i32 = arith.constant 0 : i32
    %c0_i32_0 = arith.constant 0 : i32
    return %arg0, %c0_i32 : i32, i32
  }
}

module attributes {stable_mosaic.version = 11 : i64} {
  func.func @_block_kernel(%arg0: i32, %arg1: memref<1x104x8xf32, #tpu.memory_space<vmem>>, %arg2: memref<9x8xf32, #tpu.memory_space<vmem>>, %arg3: memref<1x8xf32, #tpu.memory_space<vmem>>, %arg4: memref<8x8xbf16, #tpu.memory_space<vmem>>, %arg5: memref<1x8xf32, #tpu.memory_space<vmem>>, %arg6: memref<1x80x8xf32, #tpu.memory_space<vmem>>, %arg7: memref<1x80x8xf32, #tpu.memory_space<vmem>>, %arg8: memref<104x8xf32, #tpu.memory_space<vmem>>) attributes {dimension_semantics = [#tpu.dimension_semantics<parallel>], iteration_bounds = array<i64: 2>, scalar_prefetch = 0 : i64, scratch_operands = 1 : i64, tpu.core_type = #tpu.core_type<tc>, window_params = [{transform_indices = @transform_0, window_bounds = array<i64: 1, 104, 8>}, {pipeline_mode = #tpu.pipeline_mode<synchronous>, transform_indices = @transform_1, window_bounds = array<i64: 9, 8>}, {pipeline_mode = #tpu.pipeline_mode<synchronous>, transform_indices = @transform_2, window_bounds = array<i64: 1, 8>}, {pipeline_mode = #tpu.pipeline_mode<synchronous>, transform_indices = @transform_3, window_bounds = array<i64: 8, 8>}, {pipeline_mode = #tpu.pipeline_mode<synchronous>, transform_indices = @transform_4, window_bounds = array<i64: 1, 8>}, {transform_indices = @transform_5, window_bounds = array<i64: 1, 80, 8>}, {transform_indices = @transform_6, window_bounds = array<i64: 1, 80, 8>}]} {
    %c0 = arith.constant 0 : index
    %c0_0 = arith.constant 0 : index
    %c0_1 = arith.constant 0 : index
    %0 = vector.load %arg1[%c0, %c0_0, %c0_1] : memref<1x104x8xf32, #tpu.memory_space<vmem>>, vector<1x104x8xf32>
    %1 = vector.shape_cast %0 : vector<1x104x8xf32> to vector<104x8xf32>
    %c0_2 = arith.constant 0 : index
    %c0_3 = arith.constant 0 : index
    %2 = vector.load %arg8[%c0_2, %c0_3] : memref<104x8xf32, #tpu.memory_space<vmem>>, vector<104x8xf32>
    tpu.vector_store %arg8[%c0_2, %c0_3], %1 {strides = array<i32>} : memref<104x8xf32, #tpu.memory_space<vmem>>, vector<104x8xf32>,
    %c0_4 = arith.constant 0 : index
    %c0_5 = arith.constant 0 : index
    %3 = vector.load %arg2[%c0_4, %c0_5] : memref<9x8xf32, #tpu.memory_space<vmem>>, vector<9x8xf32>
    %c0_6 = arith.constant 0 : index
    %c0_7 = arith.constant 0 : index
    %4 = vector.load %arg8[%c0_6, %c0_7] : memref<104x8xf32, #tpu.memory_space<vmem>>, vector<80x8xf32>
    %5 = vector.extract_strided_slice %3 {offsets = [0, 0], sizes = [1, 8], strides = [1, 1]} : vector<9x8xf32> to vector<1x8xf32>
    %6 = vector.broadcast %5 : vector<1x8xf32> to vector<80x8xf32>
    %7 = arith.mulf %4, %6 : vector<80x8xf32>
    %c1 = arith.constant 1 : index
    %c0_8 = arith.constant 0 : index
    %8 = vector.load %arg8[%c1, %c0_8] : memref<104x8xf32, #tpu.memory_space<vmem>>, vector<80x8xf32>
    %9 = vector.extract_strided_slice %3 {offsets = [1, 0], sizes = [1, 8], strides = [1, 1]} : vector<9x8xf32> to vector<1x8xf32>
    %10 = vector.broadcast %9 : vector<1x8xf32> to vector<80x8xf32>
    %11 = arith.mulf %8, %10 : vector<80x8xf32>
    %c2 = arith.constant 2 : index
    %c0_9 = arith.constant 0 : index
    %12 = vector.load %arg8[%c2, %c0_9] : memref<104x8xf32, #tpu.memory_space<vmem>>, vector<80x8xf32>
    %13 = vector.extract_strided_slice %3 {offsets = [2, 0], sizes = [1, 8], strides = [1, 1]} : vector<9x8xf32> to vector<1x8xf32>
    %14 = vector.broadcast %13 : vector<1x8xf32> to vector<80x8xf32>
    %15 = arith.mulf %12, %14 : vector<80x8xf32>
    %c10 = arith.constant 10 : index
    %c0_10 = arith.constant 0 : index
    %16 = vector.load %arg8[%c10, %c0_10] : memref<104x8xf32, #tpu.memory_space<vmem>>, vector<80x8xf32>
    %17 = vector.extract_strided_slice %3 {offsets = [3, 0], sizes = [1, 8], strides = [1, 1]} : vector<9x8xf32> to vector<1x8xf32>
    %18 = vector.broadcast %17 : vector<1x8xf32> to vector<80x8xf32>
    %19 = arith.mulf %16, %18 : vector<80x8xf32>
    %c11 = arith.constant 11 : index
    %c0_11 = arith.constant 0 : index
    %20 = vector.load %arg8[%c11, %c0_11] : memref<104x8xf32, #tpu.memory_space<vmem>>, vector<80x8xf32>
    %21 = vector.extract_strided_slice %3 {offsets = [4, 0], sizes = [1, 8], strides = [1, 1]} : vector<9x8xf32> to vector<1x8xf32>
    %22 = vector.broadcast %21 : vector<1x8xf32> to vector<80x8xf32>
    %23 = arith.mulf %20, %22 : vector<80x8xf32>
    %c12 = arith.constant 12 : index
    %c0_12 = arith.constant 0 : index
    %24 = vector.load %arg8[%c12, %c0_12] : memref<104x8xf32, #tpu.memory_space<vmem>>, vector<80x8xf32>
    %25 = vector.extract_strided_slice %3 {offsets = [5, 0], sizes = [1, 8], strides = [1, 1]} : vector<9x8xf32> to vector<1x8xf32>
    %26 = vector.broadcast %25 : vector<1x8xf32> to vector<80x8xf32>
    %27 = arith.mulf %24, %26 : vector<80x8xf32>
    %c20 = arith.constant 20 : index
    %c0_13 = arith.constant 0 : index
    %28 = vector.load %arg8[%c20, %c0_13] : memref<104x8xf32, #tpu.memory_space<vmem>>, vector<80x8xf32>
    %29 = vector.extract_strided_slice %3 {offsets = [6, 0], sizes = [1, 8], strides = [1, 1]} : vector<9x8xf32> to vector<1x8xf32>
    %30 = vector.broadcast %29 : vector<1x8xf32> to vector<80x8xf32>
    %31 = arith.mulf %28, %30 : vector<80x8xf32>
    %c21 = arith.constant 21 : index
    %c0_14 = arith.constant 0 : index
    %32 = vector.load %arg8[%c21, %c0_14] : memref<104x8xf32, #tpu.memory_space<vmem>>, vector<80x8xf32>
    %33 = vector.extract_strided_slice %3 {offsets = [7, 0], sizes = [1, 8], strides = [1, 1]} : vector<9x8xf32> to vector<1x8xf32>
    %34 = vector.broadcast %33 : vector<1x8xf32> to vector<80x8xf32>
    %35 = arith.mulf %32, %34 : vector<80x8xf32>
    %c22 = arith.constant 22 : index
    %c0_15 = arith.constant 0 : index
    %36 = vector.load %arg8[%c22, %c0_15] : memref<104x8xf32, #tpu.memory_space<vmem>>, vector<80x8xf32>
    %37 = vector.extract_strided_slice %3 {offsets = [8, 0], sizes = [1, 8], strides = [1, 1]} : vector<9x8xf32> to vector<1x8xf32>
    %38 = vector.broadcast %37 : vector<1x8xf32> to vector<80x8xf32>
    %39 = arith.mulf %36, %38 : vector<80x8xf32>
    %40 = arith.addf %7, %11 : vector<80x8xf32>
    %41 = arith.addf %15, %19 : vector<80x8xf32>
    %42 = arith.addf %23, %27 : vector<80x8xf32>
    %43 = arith.addf %31, %35 : vector<80x8xf32>
    %44 = arith.addf %40, %41 : vector<80x8xf32>
    %45 = arith.addf %42, %43 : vector<80x8xf32>
    %46 = arith.addf %44, %45 : vector<80x8xf32>
    %47 = arith.addf %46, %39 : vector<80x8xf32>
    %c0_16 = arith.constant 0 : index
    %c0_17 = arith.constant 0 : index
    %48 = vector.load %arg3[%c0_16, %c0_17] : memref<1x8xf32, #tpu.memory_space<vmem>>, vector<1x8xf32>
    %49 = vector.broadcast %48 : vector<1x8xf32> to vector<80x8xf32>
    %50 = arith.addf %47, %49 : vector<80x8xf32>
    %cst = arith.constant 0.000000e+00 : f32
    %51 = vector.broadcast %cst : f32 to vector<80x8xf32>
    %52 = arith.maximumf %50, %51 : vector<80x8xf32>
    %cst_18 = arith.constant 6.000000e+00 : f32
    %53 = vector.broadcast %cst_18 : f32 to vector<80x8xf32>
    %54 = arith.minimumf %52, %53 : vector<80x8xf32>
    %55 = arith.truncf %54 : vector<80x8xf32> to vector<80x8xbf16>
    %c0_19 = arith.constant 0 : index
    %c0_20 = arith.constant 0 : index
    %56 = vector.load %arg4[%c0_19, %c0_20] : memref<8x8xbf16, #tpu.memory_space<vmem>>, vector<8x8xbf16>
    %cst_21 = arith.constant dense<0.000000e+00> : vector<80x8xf32>
    %57 = tpu.matmul %55, %56, %cst_21 {dimension_numbers = #tpu.dot_dimension_numbers<[1], [0], [0], [1], [0, 0, 1, 1], [], []>} : vector<80x8xbf16>, vector<8x8xbf16>, vector<80x8xf32> -> vector<80x8xf32>
    %c0_22 = arith.constant 0 : index
    %c0_23 = arith.constant 0 : index
    %58 = vector.load %arg5[%c0_22, %c0_23] : memref<1x8xf32, #tpu.memory_space<vmem>>, vector<1x8xf32>
    %59 = vector.broadcast %58 : vector<1x8xf32> to vector<80x8xf32>
    %60 = arith.addf %57, %59 : vector<80x8xf32>
    %c0_24 = arith.constant 0 : index
    %c0_25 = arith.constant 0 : index
    %c0_26 = arith.constant 0 : index
    %61 = vector.load %arg6[%c0_24, %c0_25, %c0_26] : memref<1x80x8xf32, #tpu.memory_space<vmem>>, vector<1x80x8xf32>
    %62 = vector.shape_cast %61 : vector<1x80x8xf32> to vector<80x8xf32>
    %63 = arith.addf %60, %62 : vector<80x8xf32>
    %c0_27 = arith.constant 0 : index
    %c0_28 = arith.constant 0 : index
    %c0_29 = arith.constant 0 : index
    %64 = vector.load %arg7[%c0_27, %c0_28, %c0_29] : memref<1x80x8xf32, #tpu.memory_space<vmem>>, vector<1x80x8xf32>
    %65 = vector.shape_cast %64 : vector<1x80x8xf32> to vector<80x8xf32>
    %66 = vector.shape_cast %63 : vector<80x8xf32> to vector<1x80x8xf32>
    tpu.vector_store %arg7[%c0_27, %c0_28, %c0_29], %66 {strides = array<i32>} : memref<1x80x8xf32, #tpu.memory_space<vmem>>, vector<1x80x8xf32>,
    return
  }
  func.func @transform_0(%arg0: i32) -> (i32, i32, i32) {
    %c0_i32 = arith.constant 0 : i32
    %c0_i32_0 = arith.constant 0 : i32
    %c0_i32_1 = arith.constant 0 : i32
    return %arg0, %c0_i32, %c0_i32_0 : i32, i32, i32
  }
  func.func @transform_1(%arg0: i32) -> (i32, i32) {
    %c0_i32 = arith.constant 0 : i32
    %c0_i32_0 = arith.constant 0 : i32
    %c0_i32_1 = arith.constant 0 : i32
    return %c0_i32, %c0_i32_0 : i32, i32
  }
  func.func @transform_2(%arg0: i32) -> (i32, i32) {
    %c0_i32 = arith.constant 0 : i32
    %c0_i32_0 = arith.constant 0 : i32
    %c0_i32_1 = arith.constant 0 : i32
    return %c0_i32, %c0_i32_0 : i32, i32
  }
  func.func @transform_3(%arg0: i32) -> (i32, i32) {
    %c0_i32 = arith.constant 0 : i32
    %c0_i32_0 = arith.constant 0 : i32
    %c0_i32_1 = arith.constant 0 : i32
    return %c0_i32, %c0_i32_0 : i32, i32
  }
  func.func @transform_4(%arg0: i32) -> (i32, i32) {
    %c0_i32 = arith.constant 0 : i32
    %c0_i32_0 = arith.constant 0 : i32
    %c0_i32_1 = arith.constant 0 : i32
    return %c0_i32, %c0_i32_0 : i32, i32
  }
  func.func @transform_5(%arg0: i32) -> (i32, i32, i32) {
    %c0_i32 = arith.constant 0 : i32
    %c0_i32_0 = arith.constant 0 : i32
    %c0_i32_1 = arith.constant 0 : i32
    return %arg0, %c0_i32, %c0_i32_0 : i32, i32, i32
  }
  func.func @transform_6(%arg0: i32) -> (i32, i32, i32) {
    %c0_i32 = arith.constant 0 : i32
    %c0_i32_0 = arith.constant 0 : i32
    %c0_i32_1 = arith.constant 0 : i32
    return %arg0, %c0_i32, %c0_i32_0 : i32, i32, i32
  }
}

module attributes {stable_mosaic.version = 11 : i64} {
  func.func @_block_kernel(%arg0: i32, %arg1: memref<1x104x8xf32, #tpu.memory_space<vmem>>, %arg2: memref<104x1xf32, #tpu.memory_space<vmem>>, %arg3: memref<20x1xf32, #tpu.memory_space<vmem>>, %arg4: memref<8x16xbf16, #tpu.memory_space<vmem>>, %arg5: memref<1x16xf32, #tpu.memory_space<vmem>>, %arg6: memref<9x16xf32, #tpu.memory_space<vmem>>, %arg7: memref<1x16xf32, #tpu.memory_space<vmem>>, %arg8: memref<16x8xf32, #tpu.memory_space<vmem>>, %arg9: memref<1x8xf32, #tpu.memory_space<vmem>>, %arg10: memref<8x16xf32, #tpu.memory_space<vmem>>, %arg11: memref<1x16xf32, #tpu.memory_space<vmem>>, %arg12: memref<16x16xbf16, #tpu.memory_space<vmem>>, %arg13: memref<1x16xf32, #tpu.memory_space<vmem>>, %arg14: memref<1x20x16xf32, #tpu.memory_space<vmem>>, %arg15: memref<104x16xf32, #tpu.memory_space<vmem>>) attributes {dimension_semantics = [#tpu.dimension_semantics<parallel>], iteration_bounds = array<i64: 2>, scalar_prefetch = 0 : i64, scratch_operands = 1 : i64, tpu.core_type = #tpu.core_type<tc>, window_params = [{transform_indices = @transform_0, window_bounds = array<i64: 1, 104, 8>}, {pipeline_mode = #tpu.pipeline_mode<synchronous>, transform_indices = @transform_1, window_bounds = array<i64: 104, 1>}, {pipeline_mode = #tpu.pipeline_mode<synchronous>, transform_indices = @transform_2, window_bounds = array<i64: 20, 1>}, {pipeline_mode = #tpu.pipeline_mode<synchronous>, transform_indices = @transform_3, window_bounds = array<i64: 8, 16>}, {pipeline_mode = #tpu.pipeline_mode<synchronous>, transform_indices = @transform_4, window_bounds = array<i64: 1, 16>}, {pipeline_mode = #tpu.pipeline_mode<synchronous>, transform_indices = @transform_5, window_bounds = array<i64: 9, 16>}, {pipeline_mode = #tpu.pipeline_mode<synchronous>, transform_indices = @transform_6, window_bounds = array<i64: 1, 16>}, {pipeline_mode = #tpu.pipeline_mode<synchronous>, transform_indices = @transform_7, window_bounds = array<i64: 16, 8>}, {pipeline_mode = #tpu.pipeline_mode<synchronous>, transform_indices = @transform_8, window_bounds = array<i64: 1, 8>}, {pipeline_mode = #tpu.pipeline_mode<synchronous>, transform_indices = @transform_9, window_bounds = array<i64: 8, 16>}, {pipeline_mode = #tpu.pipeline_mode<synchronous>, transform_indices = @transform_10, window_bounds = array<i64: 1, 16>}, {pipeline_mode = #tpu.pipeline_mode<synchronous>, transform_indices = @transform_11, window_bounds = array<i64: 16, 16>}, {pipeline_mode = #tpu.pipeline_mode<synchronous>, transform_indices = @transform_12, window_bounds = array<i64: 1, 16>}, {transform_indices = @transform_13, window_bounds = array<i64: 1, 20, 16>}]} {
    %c0 = arith.constant 0 : index
    %c0_0 = arith.constant 0 : index
    %c0_1 = arith.constant 0 : index
    %0 = vector.load %arg1[%c0, %c0_0, %c0_1] : memref<1x104x8xf32, #tpu.memory_space<vmem>>, vector<1x104x8xf32>
    %1 = vector.shape_cast %0 : vector<1x104x8xf32> to vector<104x8xf32>
    %2 = arith.truncf %1 : vector<104x8xf32> to vector<104x8xbf16>
    %c0_2 = arith.constant 0 : index
    %c0_3 = arith.constant 0 : index
    %3 = vector.load %arg4[%c0_2, %c0_3] : memref<8x16xbf16, #tpu.memory_space<vmem>>, vector<8x16xbf16>
    %cst = arith.constant dense<0.000000e+00> : vector<104x16xf32>
    %4 = tpu.matmul %2, %3, %cst {dimension_numbers = #tpu.dot_dimension_numbers<[1], [0], [0], [1], [0, 0, 1, 1], [], []>} : vector<104x8xbf16>, vector<8x16xbf16>, vector<104x16xf32> -> vector<104x16xf32>
    %c0_4 = arith.constant 0 : index
    %c0_5 = arith.constant 0 : index
    %5 = vector.load %arg5[%c0_4, %c0_5] : memref<1x16xf32, #tpu.memory_space<vmem>>, vector<1x16xf32>
    %6 = vector.broadcast %5 : vector<1x16xf32> to vector<104x16xf32>
    %7 = arith.addf %4, %6 : vector<104x16xf32>
    %cst_6 = arith.constant 3.000000e+00 : f32
    %8 = vector.broadcast %cst_6 : f32 to vector<104x16xf32>
    %9 = arith.addf %7, %8 : vector<104x16xf32>
    %cst_7 = arith.constant 0.000000e+00 : f32
    %10 = vector.broadcast %cst_7 : f32 to vector<104x16xf32>
    %11 = arith.maximumf %9, %10 : vector<104x16xf32>
    %cst_8 = arith.constant 6.000000e+00 : f32
    %12 = vector.broadcast %cst_8 : f32 to vector<104x16xf32>
    %13 = arith.minimumf %11, %12 : vector<104x16xf32>
    %14 = arith.mulf %7, %13 : vector<104x16xf32>
    %cst_9 = arith.constant 0.166666672 : f32
    %15 = vector.broadcast %cst_9 : f32 to vector<104x16xf32>
    %16 = arith.mulf %14, %15 : vector<104x16xf32>
    %c0_10 = arith.constant 0 : index
    %c0_11 = arith.constant 0 : index
    %17 = vector.load %arg2[%c0_10, %c0_11] : memref<104x1xf32, #tpu.memory_space<vmem>>, vector<104x1xf32>
    %18 = vector.broadcast %17 : vector<104x1xf32> to vector<104x16xf32>
    %19 = arith.mulf %16, %18 : vector<104x16xf32>
    %c0_12 = arith.constant 0 : index
    %c0_13 = arith.constant 0 : index
    %20 = vector.load %arg15[%c0_12, %c0_13] : memref<104x16xf32, #tpu.memory_space<vmem>>, vector<104x16xf32>
    tpu.vector_store %arg15[%c0_12, %c0_13], %19 {strides = array<i32>} : memref<104x16xf32, #tpu.memory_space<vmem>>, vector<104x16xf32>,
    %c0_14 = arith.constant 0 : index
    %c0_15 = arith.constant 0 : index
    %21 = vector.load %arg6[%c0_14, %c0_15] : memref<9x16xf32, #tpu.memory_space<vmem>>, vector<9x16xf32>
    %c0_16 = arith.constant 0 : index
    %c0_17 = arith.constant 0 : index
    %22 = vector.load %arg15[%c0_16, %c0_17] : memref<104x16xf32, #tpu.memory_space<vmem>>, vector<20x16xf32>
    %23 = vector.extract_strided_slice %21 {offsets = [0, 0], sizes = [1, 16], strides = [1, 1]} : vector<9x16xf32> to vector<1x16xf32>
    %24 = vector.broadcast %23 : vector<1x16xf32> to vector<20x16xf32>
    %25 = arith.mulf %22, %24 : vector<20x16xf32>
    %c25 = arith.constant 25 : index
    %c0_18 = arith.constant 0 : index
    %26 = vector.load %arg15[%c25, %c0_18] : memref<104x16xf32, #tpu.memory_space<vmem>>, vector<20x16xf32>
    %27 = vector.extract_strided_slice %21 {offsets = [1, 0], sizes = [1, 16], strides = [1, 1]} : vector<9x16xf32> to vector<1x16xf32>
    %28 = vector.broadcast %27 : vector<1x16xf32> to vector<20x16xf32>
    %29 = arith.mulf %26, %28 : vector<20x16xf32>
    %c1 = arith.constant 1 : index
    %c0_19 = arith.constant 0 : index
    %30 = vector.load %arg15[%c1, %c0_19] : memref<104x16xf32, #tpu.memory_space<vmem>>, vector<20x16xf32>
    %31 = vector.extract_strided_slice %21 {offsets = [2, 0], sizes = [1, 16], strides = [1, 1]} : vector<9x16xf32> to vector<1x16xf32>
    %32 = vector.broadcast %31 : vector<1x16xf32> to vector<20x16xf32>
    %33 = arith.mulf %30, %32 : vector<20x16xf32>
    %c50 = arith.constant 50 : index
    %c0_20 = arith.constant 0 : index
    %34 = vector.load %arg15[%c50, %c0_20] : memref<104x16xf32, #tpu.memory_space<vmem>>, vector<20x16xf32>
    %35 = vector.extract_strided_slice %21 {offsets = [3, 0], sizes = [1, 16], strides = [1, 1]} : vector<9x16xf32> to vector<1x16xf32>
    %36 = vector.broadcast %35 : vector<1x16xf32> to vector<20x16xf32>
    %37 = arith.mulf %34, %36 : vector<20x16xf32>
    %c75 = arith.constant 75 : index
    %c0_21 = arith.constant 0 : index
    %38 = vector.load %arg15[%c75, %c0_21] : memref<104x16xf32, #tpu.memory_space<vmem>>, vector<20x16xf32>
    %39 = vector.extract_strided_slice %21 {offsets = [4, 0], sizes = [1, 16], strides = [1, 1]} : vector<9x16xf32> to vector<1x16xf32>
    %40 = vector.broadcast %39 : vector<1x16xf32> to vector<20x16xf32>
    %41 = arith.mulf %38, %40 : vector<20x16xf32>
    %c51 = arith.constant 51 : index
    %c0_22 = arith.constant 0 : index
    %42 = vector.load %arg15[%c51, %c0_22] : memref<104x16xf32, #tpu.memory_space<vmem>>, vector<20x16xf32>
    %43 = vector.extract_strided_slice %21 {offsets = [5, 0], sizes = [1, 16], strides = [1, 1]} : vector<9x16xf32> to vector<1x16xf32>
    %44 = vector.broadcast %43 : vector<1x16xf32> to vector<20x16xf32>
    %45 = arith.mulf %42, %44 : vector<20x16xf32>
    %c5 = arith.constant 5 : index
    %c0_23 = arith.constant 0 : index
    %46 = vector.load %arg15[%c5, %c0_23] : memref<104x16xf32, #tpu.memory_space<vmem>>, vector<20x16xf32>
    %47 = vector.extract_strided_slice %21 {offsets = [6, 0], sizes = [1, 16], strides = [1, 1]} : vector<9x16xf32> to vector<1x16xf32>
    %48 = vector.broadcast %47 : vector<1x16xf32> to vector<20x16xf32>
    %49 = arith.mulf %46, %48 : vector<20x16xf32>
    %c30 = arith.constant 30 : index
    %c0_24 = arith.constant 0 : index
    %50 = vector.load %arg15[%c30, %c0_24] : memref<104x16xf32, #tpu.memory_space<vmem>>, vector<20x16xf32>
    %51 = vector.extract_strided_slice %21 {offsets = [7, 0], sizes = [1, 16], strides = [1, 1]} : vector<9x16xf32> to vector<1x16xf32>
    %52 = vector.broadcast %51 : vector<1x16xf32> to vector<20x16xf32>
    %53 = arith.mulf %50, %52 : vector<20x16xf32>
    %c6 = arith.constant 6 : index
    %c0_25 = arith.constant 0 : index
    %54 = vector.load %arg15[%c6, %c0_25] : memref<104x16xf32, #tpu.memory_space<vmem>>, vector<20x16xf32>
    %55 = vector.extract_strided_slice %21 {offsets = [8, 0], sizes = [1, 16], strides = [1, 1]} : vector<9x16xf32> to vector<1x16xf32>
    %56 = vector.broadcast %55 : vector<1x16xf32> to vector<20x16xf32>
    %57 = arith.mulf %54, %56 : vector<20x16xf32>
    %58 = arith.addf %25, %29 : vector<20x16xf32>
    %59 = arith.addf %33, %37 : vector<20x16xf32>
    %60 = arith.addf %41, %45 : vector<20x16xf32>
    %61 = arith.addf %49, %53 : vector<20x16xf32>
    %62 = arith.addf %58, %59 : vector<20x16xf32>
    %63 = arith.addf %60, %61 : vector<20x16xf32>
    %64 = arith.addf %62, %63 : vector<20x16xf32>
    %65 = arith.addf %64, %57 : vector<20x16xf32>
    %c0_26 = arith.constant 0 : index
    %c0_27 = arith.constant 0 : index
    %66 = vector.load %arg7[%c0_26, %c0_27] : memref<1x16xf32, #tpu.memory_space<vmem>>, vector<1x16xf32>
    %67 = vector.broadcast %66 : vector<1x16xf32> to vector<20x16xf32>
    %68 = arith.addf %65, %67 : vector<20x16xf32>
    %cst_28 = arith.constant 3.000000e+00 : f32
    %69 = vector.broadcast %cst_28 : f32 to vector<20x16xf32>
    %70 = arith.addf %68, %69 : vector<20x16xf32>
    %cst_29 = arith.constant 0.000000e+00 : f32
    %71 = vector.broadcast %cst_29 : f32 to vector<20x16xf32>
    %72 = arith.maximumf %70, %71 : vector<20x16xf32>
    %cst_30 = arith.constant 6.000000e+00 : f32
    %73 = vector.broadcast %cst_30 : f32 to vector<20x16xf32>
    %74 = arith.minimumf %72, %73 : vector<20x16xf32>
    %75 = arith.mulf %68, %74 : vector<20x16xf32>
    %cst_31 = arith.constant 0.166666672 : f32
    %76 = vector.broadcast %cst_31 : f32 to vector<20x16xf32>
    %77 = arith.mulf %75, %76 : vector<20x16xf32>
    %c0_32 = arith.constant 0 : index
    %c0_33 = arith.constant 0 : index
    %78 = vector.load %arg3[%c0_32, %c0_33] : memref<20x1xf32, #tpu.memory_space<vmem>>, vector<20x1xf32>
    %79 = vector.broadcast %78 : vector<20x1xf32> to vector<20x16xf32>
    %80 = arith.mulf %77, %79 : vector<20x16xf32>
    %cst_34 = arith.constant dense<0.000000e+00> : vector<16xf32>
    %81 = vector.multi_reduction <add>, %80, %cst_34 [0] : vector<20x16xf32> to vector<16xf32>
    %82 = vector.shape_cast %81 : vector<16xf32> to vector<1x16xf32>
    %cst_35 = arith.constant 6.250000e-02 : f32
    %83 = vector.broadcast %cst_35 : f32 to vector<1x16xf32>
    %84 = arith.mulf %82, %83 : vector<1x16xf32>
    %c0_36 = arith.constant 0 : index
    %c0_37 = arith.constant 0 : index
    %85 = vector.load %arg8[%c0_36, %c0_37] : memref<16x8xf32, #tpu.memory_space<vmem>>, vector<16x8xf32>
    %cst_38 = arith.constant dense<0.000000e+00> : vector<1x8xf32>
    %86 = tpu.matmul %84, %85, %cst_38 {dimension_numbers = #tpu.dot_dimension_numbers<[1], [0], [0], [1], [0, 0, 1, 1], [], []>} : vector<1x16xf32>, vector<16x8xf32>, vector<1x8xf32> -> vector<1x8xf32>
    %c0_39 = arith.constant 0 : index
    %c0_40 = arith.constant 0 : index
    %87 = vector.load %arg9[%c0_39, %c0_40] : memref<1x8xf32, #tpu.memory_space<vmem>>, vector<1x8xf32>
    %88 = arith.addf %86, %87 : vector<1x8xf32>
    %cst_41 = arith.constant 0.000000e+00 : f32
    %89 = vector.broadcast %cst_41 : f32 to vector<1x8xf32>
    %90 = arith.maximumf %88, %89 : vector<1x8xf32>
    %c0_42 = arith.constant 0 : index
    %c0_43 = arith.constant 0 : index
    %91 = vector.load %arg10[%c0_42, %c0_43] : memref<8x16xf32, #tpu.memory_space<vmem>>, vector<8x16xf32>
    %cst_44 = arith.constant dense<0.000000e+00> : vector<1x16xf32>
    %92 = tpu.matmul %90, %91, %cst_44 {dimension_numbers = #tpu.dot_dimension_numbers<[1], [0], [0], [1], [0, 0, 1, 1], [], []>} : vector<1x8xf32>, vector<8x16xf32>, vector<1x16xf32> -> vector<1x16xf32>
    %c0_45 = arith.constant 0 : index
    %c0_46 = arith.constant 0 : index
    %93 = vector.load %arg11[%c0_45, %c0_46] : memref<1x16xf32, #tpu.memory_space<vmem>>, vector<1x16xf32>
    %94 = arith.addf %92, %93 : vector<1x16xf32>
    %cst_47 = arith.constant 0.000000e+00 : f32
    %95 = vector.broadcast %cst_47 : f32 to vector<1x16xf32>
    %96 = arith.subf %95, %94 : vector<1x16xf32>
    %97 = math.exp %96 : vector<1x16xf32>
    %cst_48 = arith.constant 1.000000e+00 : f32
    %98 = vector.broadcast %cst_48 : f32 to vector<1x16xf32>
    %99 = arith.addf %98, %97 : vector<1x16xf32>
    %cst_49 = arith.constant 1.000000e+00 : f32
    %100 = vector.broadcast %cst_49 : f32 to vector<1x16xf32>
    %101 = arith.divf %100, %99 : vector<1x16xf32>
    %102 = vector.broadcast %101 : vector<1x16xf32> to vector<20x16xf32>
    %103 = arith.mulf %77, %102 : vector<20x16xf32>
    %104 = arith.truncf %103 : vector<20x16xf32> to vector<20x16xbf16>
    %c0_50 = arith.constant 0 : index
    %c0_51 = arith.constant 0 : index
    %105 = vector.load %arg12[%c0_50, %c0_51] : memref<16x16xbf16, #tpu.memory_space<vmem>>, vector<16x16xbf16>
    %cst_52 = arith.constant dense<0.000000e+00> : vector<20x16xf32>
    %106 = tpu.matmul %104, %105, %cst_52 {dimension_numbers = #tpu.dot_dimension_numbers<[1], [0], [0], [1], [0, 0, 1, 1], [], []>} : vector<20x16xbf16>, vector<16x16xbf16>, vector<20x16xf32> -> vector<20x16xf32>
    %c0_53 = arith.constant 0 : index
    %c0_54 = arith.constant 0 : index
    %107 = vector.load %arg13[%c0_53, %c0_54] : memref<1x16xf32, #tpu.memory_space<vmem>>, vector<1x16xf32>
    %108 = vector.broadcast %107 : vector<1x16xf32> to vector<20x16xf32>
    %109 = arith.addf %106, %108 : vector<20x16xf32>
    %c0_55 = arith.constant 0 : index
    %c0_56 = arith.constant 0 : index
    %c0_57 = arith.constant 0 : index
    %110 = vector.load %arg14[%c0_55, %c0_56, %c0_57] : memref<1x20x16xf32, #tpu.memory_space<vmem>>, vector<1x20x16xf32>
    %111 = vector.shape_cast %110 : vector<1x20x16xf32> to vector<20x16xf32>
    %112 = vector.shape_cast %109 : vector<20x16xf32> to vector<1x20x16xf32>
    tpu.vector_store %arg14[%c0_55, %c0_56, %c0_57], %112 {strides = array<i32>} : memref<1x20x16xf32, #tpu.memory_space<vmem>>, vector<1x20x16xf32>,
    return
  }
  func.func @transform_0(%arg0: i32) -> (i32, i32, i32) {
    %c0_i32 = arith.constant 0 : i32
    %c0_i32_0 = arith.constant 0 : i32
    %c0_i32_1 = arith.constant 0 : i32
    return %arg0, %c0_i32, %c0_i32_0 : i32, i32, i32
  }
  func.func @transform_1(%arg0: i32) -> (i32, i32) {
    %c0_i32 = arith.constant 0 : i32
    %c0_i32_0 = arith.constant 0 : i32
    %c0_i32_1 = arith.constant 0 : i32
    return %c0_i32, %c0_i32_0 : i32, i32
  }
  func.func @transform_2(%arg0: i32) -> (i32, i32) {
    %c0_i32 = arith.constant 0 : i32
    %c0_i32_0 = arith.constant 0 : i32
    %c0_i32_1 = arith.constant 0 : i32
    return %c0_i32, %c0_i32_0 : i32, i32
  }
  func.func @transform_3(%arg0: i32) -> (i32, i32) {
    %c0_i32 = arith.constant 0 : i32
    %c0_i32_0 = arith.constant 0 : i32
    %c0_i32_1 = arith.constant 0 : i32
    return %c0_i32, %c0_i32_0 : i32, i32
  }
  func.func @transform_4(%arg0: i32) -> (i32, i32) {
    %c0_i32 = arith.constant 0 : i32
    %c0_i32_0 = arith.constant 0 : i32
    %c0_i32_1 = arith.constant 0 : i32
    return %c0_i32, %c0_i32_0 : i32, i32
  }
  func.func @transform_5(%arg0: i32) -> (i32, i32) {
    %c0_i32 = arith.constant 0 : i32
    %c0_i32_0 = arith.constant 0 : i32
    %c0_i32_1 = arith.constant 0 : i32
    return %c0_i32, %c0_i32_0 : i32, i32
  }
  func.func @transform_6(%arg0: i32) -> (i32, i32) {
    %c0_i32 = arith.constant 0 : i32
    %c0_i32_0 = arith.constant 0 : i32
    %c0_i32_1 = arith.constant 0 : i32
    return %c0_i32, %c0_i32_0 : i32, i32
  }
  func.func @transform_7(%arg0: i32) -> (i32, i32) {
    %c0_i32 = arith.constant 0 : i32
    %c0_i32_0 = arith.constant 0 : i32
    %c0_i32_1 = arith.constant 0 : i32
    return %c0_i32, %c0_i32_0 : i32, i32
  }
  func.func @transform_8(%arg0: i32) -> (i32, i32) {
    %c0_i32 = arith.constant 0 : i32
    %c0_i32_0 = arith.constant 0 : i32
    %c0_i32_1 = arith.constant 0 : i32
    return %c0_i32, %c0_i32_0 : i32, i32
  }
  func.func @transform_9(%arg0: i32) -> (i32, i32) {
    %c0_i32 = arith.constant 0 : i32
    %c0_i32_0 = arith.constant 0 : i32
    %c0_i32_1 = arith.constant 0 : i32
    return %c0_i32, %c0_i32_0 : i32, i32
  }
  func.func @transform_10(%arg0: i32) -> (i32, i32) {
    %c0_i32 = arith.constant 0 : i32
    %c0_i32_0 = arith.constant 0 : i32
    %c0_i32_1 = arith.constant 0 : i32
    return %c0_i32, %c0_i32_0 : i32, i32
  }
  func.func @transform_11(%arg0: i32) -> (i32, i32) {
    %c0_i32 = arith.constant 0 : i32
    %c0_i32_0 = arith.constant 0 : i32
    %c0_i32_1 = arith.constant 0 : i32
    return %c0_i32, %c0_i32_0 : i32, i32
  }
  func.func @transform_12(%arg0: i32) -> (i32, i32) {
    %c0_i32 = arith.constant 0 : i32
    %c0_i32_0 = arith.constant 0 : i32
    %c0_i32_1 = arith.constant 0 : i32
    return %c0_i32, %c0_i32_0 : i32, i32
  }
  func.func @transform_13(%arg0: i32) -> (i32, i32, i32) {
    %c0_i32 = arith.constant 0 : i32
    %c0_i32_0 = arith.constant 0 : i32
    %c0_i32_1 = arith.constant 0 : i32
    return %arg0, %c0_i32, %c0_i32_0 : i32, i32, i32
  }
}

module attributes {stable_mosaic.version = 11 : i64} {
  func.func @_block_kernel(%arg0: i32, %arg1: memref<1x40x16xf32, #tpu.memory_space<vmem>>, %arg2: memref<40x1xf32, #tpu.memory_space<vmem>>, %arg3: memref<24x1xf32, #tpu.memory_space<vmem>>, %arg4: memref<16x32xbf16, #tpu.memory_space<vmem>>, %arg5: memref<1x32xf32, #tpu.memory_space<vmem>>, %arg6: memref<9x32xf32, #tpu.memory_space<vmem>>, %arg7: memref<1x32xf32, #tpu.memory_space<vmem>>, %arg8: memref<32x8xf32, #tpu.memory_space<vmem>>, %arg9: memref<1x8xf32, #tpu.memory_space<vmem>>, %arg10: memref<8x32xf32, #tpu.memory_space<vmem>>, %arg11: memref<1x32xf32, #tpu.memory_space<vmem>>, %arg12: memref<32x16xbf16, #tpu.memory_space<vmem>>, %arg13: memref<1x16xf32, #tpu.memory_space<vmem>>, %arg14: memref<1x24x16xf32, #tpu.memory_space<vmem>>, %arg15: memref<1x24x16xf32, #tpu.memory_space<vmem>>, %arg16: memref<40x32xf32, #tpu.memory_space<vmem>>) attributes {dimension_semantics = [#tpu.dimension_semantics<parallel>], iteration_bounds = array<i64: 2>, scalar_prefetch = 0 : i64, scratch_operands = 1 : i64, tpu.core_type = #tpu.core_type<tc>, window_params = [{transform_indices = @transform_0, window_bounds = array<i64: 1, 40, 16>}, {pipeline_mode = #tpu.pipeline_mode<synchronous>, transform_indices = @transform_1, window_bounds = array<i64: 40, 1>}, {pipeline_mode = #tpu.pipeline_mode<synchronous>, transform_indices = @transform_2, window_bounds = array<i64: 24, 1>}, {pipeline_mode = #tpu.pipeline_mode<synchronous>, transform_indices = @transform_3, window_bounds = array<i64: 16, 32>}, {pipeline_mode = #tpu.pipeline_mode<synchronous>, transform_indices = @transform_4, window_bounds = array<i64: 1, 32>}, {pipeline_mode = #tpu.pipeline_mode<synchronous>, transform_indices = @transform_5, window_bounds = array<i64: 9, 32>}, {pipeline_mode = #tpu.pipeline_mode<synchronous>, transform_indices = @transform_6, window_bounds = array<i64: 1, 32>}, {pipeline_mode = #tpu.pipeline_mode<synchronous>, transform_indices = @transform_7, window_bounds = array<i64: 32, 8>}, {pipeline_mode = #tpu.pipeline_mode<synchronous>, transform_indices = @transform_8, window_bounds = array<i64: 1, 8>}, {pipeline_mode = #tpu.pipeline_mode<synchronous>, transform_indices = @transform_9, window_bounds = array<i64: 8, 32>}, {pipeline_mode = #tpu.pipeline_mode<synchronous>, transform_indices = @transform_10, window_bounds = array<i64: 1, 32>}, {pipeline_mode = #tpu.pipeline_mode<synchronous>, transform_indices = @transform_11, window_bounds = array<i64: 32, 16>}, {pipeline_mode = #tpu.pipeline_mode<synchronous>, transform_indices = @transform_12, window_bounds = array<i64: 1, 16>}, {transform_indices = @transform_13, window_bounds = array<i64: 1, 24, 16>}, {transform_indices = @transform_14, window_bounds = array<i64: 1, 24, 16>}]} {
    %c0 = arith.constant 0 : index
    %c0_0 = arith.constant 0 : index
    %c0_1 = arith.constant 0 : index
    %0 = vector.load %arg1[%c0, %c0_0, %c0_1] : memref<1x40x16xf32, #tpu.memory_space<vmem>>, vector<1x40x16xf32>
    %1 = vector.shape_cast %0 : vector<1x40x16xf32> to vector<40x16xf32>
    %2 = arith.truncf %1 : vector<40x16xf32> to vector<40x16xbf16>
    %c0_2 = arith.constant 0 : index
    %c0_3 = arith.constant 0 : index
    %3 = vector.load %arg4[%c0_2, %c0_3] : memref<16x32xbf16, #tpu.memory_space<vmem>>, vector<16x32xbf16>
    %cst = arith.constant dense<0.000000e+00> : vector<40x32xf32>
    %4 = tpu.matmul %2, %3, %cst {dimension_numbers = #tpu.dot_dimension_numbers<[1], [0], [0], [1], [0, 0, 1, 1], [], []>} : vector<40x16xbf16>, vector<16x32xbf16>, vector<40x32xf32> -> vector<40x32xf32>
    %c0_4 = arith.constant 0 : index
    %c0_5 = arith.constant 0 : index
    %5 = vector.load %arg5[%c0_4, %c0_5] : memref<1x32xf32, #tpu.memory_space<vmem>>, vector<1x32xf32>
    %6 = vector.broadcast %5 : vector<1x32xf32> to vector<40x32xf32>
    %7 = arith.addf %4, %6 : vector<40x32xf32>
    %cst_6 = arith.constant 3.000000e+00 : f32
    %8 = vector.broadcast %cst_6 : f32 to vector<40x32xf32>
    %9 = arith.addf %7, %8 : vector<40x32xf32>
    %cst_7 = arith.constant 0.000000e+00 : f32
    %10 = vector.broadcast %cst_7 : f32 to vector<40x32xf32>
    %11 = arith.maximumf %9, %10 : vector<40x32xf32>
    %cst_8 = arith.constant 6.000000e+00 : f32
    %12 = vector.broadcast %cst_8 : f32 to vector<40x32xf32>
    %13 = arith.minimumf %11, %12 : vector<40x32xf32>
    %14 = arith.mulf %7, %13 : vector<40x32xf32>
    %cst_9 = arith.constant 0.166666672 : f32
    %15 = vector.broadcast %cst_9 : f32 to vector<40x32xf32>
    %16 = arith.mulf %14, %15 : vector<40x32xf32>
    %c0_10 = arith.constant 0 : index
    %c0_11 = arith.constant 0 : index
    %17 = vector.load %arg2[%c0_10, %c0_11] : memref<40x1xf32, #tpu.memory_space<vmem>>, vector<40x1xf32>
    %18 = vector.broadcast %17 : vector<40x1xf32> to vector<40x32xf32>
    %19 = arith.mulf %16, %18 : vector<40x32xf32>
    %c0_12 = arith.constant 0 : index
    %c0_13 = arith.constant 0 : index
    %20 = vector.load %arg16[%c0_12, %c0_13] : memref<40x32xf32, #tpu.memory_space<vmem>>, vector<40x32xf32>
    tpu.vector_store %arg16[%c0_12, %c0_13], %19 {strides = array<i32>} : memref<40x32xf32, #tpu.memory_space<vmem>>, vector<40x32xf32>,
    %c0_14 = arith.constant 0 : index
    %c0_15 = arith.constant 0 : index
    %21 = vector.load %arg6[%c0_14, %c0_15] : memref<9x32xf32, #tpu.memory_space<vmem>>, vector<9x32xf32>
    %c0_16 = arith.constant 0 : index
    %c0_17 = arith.constant 0 : index
    %22 = vector.load %arg16[%c0_16, %c0_17] : memref<40x32xf32, #tpu.memory_space<vmem>>, vector<24x32xf32>
    %23 = vector.extract_strided_slice %21 {offsets = [0, 0], sizes = [1, 32], strides = [1, 1]} : vector<9x32xf32> to vector<1x32xf32>
    %24 = vector.broadcast %23 : vector<1x32xf32> to vector<24x32xf32>
    %25 = arith.mulf %22, %24 : vector<24x32xf32>
    %c1 = arith.constant 1 : index
    %c0_18 = arith.constant 0 : index
    %26 = vector.load %arg16[%c1, %c0_18] : memref<40x32xf32, #tpu.memory_space<vmem>>, vector<24x32xf32>
    %27 = vector.extract_strided_slice %21 {offsets = [1, 0], sizes = [1, 32], strides = [1, 1]} : vector<9x32xf32> to vector<1x32xf32>
    %28 = vector.broadcast %27 : vector<1x32xf32> to vector<24x32xf32>
    %29 = arith.mulf %26, %28 : vector<24x32xf32>
    %c2 = arith.constant 2 : index
    %c0_19 = arith.constant 0 : index
    %30 = vector.load %arg16[%c2, %c0_19] : memref<40x32xf32, #tpu.memory_space<vmem>>, vector<24x32xf32>
    %31 = vector.extract_strided_slice %21 {offsets = [2, 0], sizes = [1, 32], strides = [1, 1]} : vector<9x32xf32> to vector<1x32xf32>
    %32 = vector.broadcast %31 : vector<1x32xf32> to vector<24x32xf32>
    %33 = arith.mulf %30, %32 : vector<24x32xf32>
    %c6 = arith.constant 6 : index
    %c0_20 = arith.constant 0 : index
    %34 = vector.load %arg16[%c6, %c0_20] : memref<40x32xf32, #tpu.memory_space<vmem>>, vector<24x32xf32>
    %35 = vector.extract_strided_slice %21 {offsets = [3, 0], sizes = [1, 32], strides = [1, 1]} : vector<9x32xf32> to vector<1x32xf32>
    %36 = vector.broadcast %35 : vector<1x32xf32> to vector<24x32xf32>
    %37 = arith.mulf %34, %36 : vector<24x32xf32>
    %c7 = arith.constant 7 : index
    %c0_21 = arith.constant 0 : index
    %38 = vector.load %arg16[%c7, %c0_21] : memref<40x32xf32, #tpu.memory_space<vmem>>, vector<24x32xf32>
    %39 = vector.extract_strided_slice %21 {offsets = [4, 0], sizes = [1, 32], strides = [1, 1]} : vector<9x32xf32> to vector<1x32xf32>
    %40 = vector.broadcast %39 : vector<1x32xf32> to vector<24x32xf32>
    %41 = arith.mulf %38, %40 : vector<24x32xf32>
    %c8 = arith.constant 8 : index
    %c0_22 = arith.constant 0 : index
    %42 = vector.load %arg16[%c8, %c0_22] : memref<40x32xf32, #tpu.memory_space<vmem>>, vector<24x32xf32>
    %43 = vector.extract_strided_slice %21 {offsets = [5, 0], sizes = [1, 32], strides = [1, 1]} : vector<9x32xf32> to vector<1x32xf32>
    %44 = vector.broadcast %43 : vector<1x32xf32> to vector<24x32xf32>
    %45 = arith.mulf %42, %44 : vector<24x32xf32>
    %c12 = arith.constant 12 : index
    %c0_23 = arith.constant 0 : index
    %46 = vector.load %arg16[%c12, %c0_23] : memref<40x32xf32, #tpu.memory_space<vmem>>, vector<24x32xf32>
    %47 = vector.extract_strided_slice %21 {offsets = [6, 0], sizes = [1, 32], strides = [1, 1]} : vector<9x32xf32> to vector<1x32xf32>
    %48 = vector.broadcast %47 : vector<1x32xf32> to vector<24x32xf32>
    %49 = arith.mulf %46, %48 : vector<24x32xf32>
    %c13 = arith.constant 13 : index
    %c0_24 = arith.constant 0 : index
    %50 = vector.load %arg16[%c13, %c0_24] : memref<40x32xf32, #tpu.memory_space<vmem>>, vector<24x32xf32>
    %51 = vector.extract_strided_slice %21 {offsets = [7, 0], sizes = [1, 32], strides = [1, 1]} : vector<9x32xf32> to vector<1x32xf32>
    %52 = vector.broadcast %51 : vector<1x32xf32> to vector<24x32xf32>
    %53 = arith.mulf %50, %52 : vector<24x32xf32>
    %c14 = arith.constant 14 : index
    %c0_25 = arith.constant 0 : index
    %54 = vector.load %arg16[%c14, %c0_25] : memref<40x32xf32, #tpu.memory_space<vmem>>, vector<24x32xf32>
    %55 = vector.extract_strided_slice %21 {offsets = [8, 0], sizes = [1, 32], strides = [1, 1]} : vector<9x32xf32> to vector<1x32xf32>
    %56 = vector.broadcast %55 : vector<1x32xf32> to vector<24x32xf32>
    %57 = arith.mulf %54, %56 : vector<24x32xf32>
    %58 = arith.addf %25, %29 : vector<24x32xf32>
    %59 = arith.addf %33, %37 : vector<24x32xf32>
    %60 = arith.addf %41, %45 : vector<24x32xf32>
    %61 = arith.addf %49, %53 : vector<24x32xf32>
    %62 = arith.addf %58, %59 : vector<24x32xf32>
    %63 = arith.addf %60, %61 : vector<24x32xf32>
    %64 = arith.addf %62, %63 : vector<24x32xf32>
    %65 = arith.addf %64, %57 : vector<24x32xf32>
    %c0_26 = arith.constant 0 : index
    %c0_27 = arith.constant 0 : index
    %66 = vector.load %arg7[%c0_26, %c0_27] : memref<1x32xf32, #tpu.memory_space<vmem>>, vector<1x32xf32>
    %67 = vector.broadcast %66 : vector<1x32xf32> to vector<24x32xf32>
    %68 = arith.addf %65, %67 : vector<24x32xf32>
    %cst_28 = arith.constant 3.000000e+00 : f32
    %69 = vector.broadcast %cst_28 : f32 to vector<24x32xf32>
    %70 = arith.addf %68, %69 : vector<24x32xf32>
    %cst_29 = arith.constant 0.000000e+00 : f32
    %71 = vector.broadcast %cst_29 : f32 to vector<24x32xf32>
    %72 = arith.maximumf %70, %71 : vector<24x32xf32>
    %cst_30 = arith.constant 6.000000e+00 : f32
    %73 = vector.broadcast %cst_30 : f32 to vector<24x32xf32>
    %74 = arith.minimumf %72, %73 : vector<24x32xf32>
    %75 = arith.mulf %68, %74 : vector<24x32xf32>
    %cst_31 = arith.constant 0.166666672 : f32
    %76 = vector.broadcast %cst_31 : f32 to vector<24x32xf32>
    %77 = arith.mulf %75, %76 : vector<24x32xf32>
    %c0_32 = arith.constant 0 : index
    %c0_33 = arith.constant 0 : index
    %78 = vector.load %arg3[%c0_32, %c0_33] : memref<24x1xf32, #tpu.memory_space<vmem>>, vector<24x1xf32>
    %79 = vector.broadcast %78 : vector<24x1xf32> to vector<24x32xf32>
    %80 = arith.mulf %77, %79 : vector<24x32xf32>
    %cst_34 = arith.constant dense<0.000000e+00> : vector<32xf32>
    %81 = vector.multi_reduction <add>, %80, %cst_34 [0] : vector<24x32xf32> to vector<32xf32>
    %82 = vector.shape_cast %81 : vector<32xf32> to vector<1x32xf32>
    %cst_35 = arith.constant 6.250000e-02 : f32
    %83 = vector.broadcast %cst_35 : f32 to vector<1x32xf32>
    %84 = arith.mulf %82, %83 : vector<1x32xf32>
    %c0_36 = arith.constant 0 : index
    %c0_37 = arith.constant 0 : index
    %85 = vector.load %arg8[%c0_36, %c0_37] : memref<32x8xf32, #tpu.memory_space<vmem>>, vector<32x8xf32>
    %cst_38 = arith.constant dense<0.000000e+00> : vector<1x8xf32>
    %86 = tpu.matmul %84, %85, %cst_38 {dimension_numbers = #tpu.dot_dimension_numbers<[1], [0], [0], [1], [0, 0, 1, 1], [], []>} : vector<1x32xf32>, vector<32x8xf32>, vector<1x8xf32> -> vector<1x8xf32>
    %c0_39 = arith.constant 0 : index
    %c0_40 = arith.constant 0 : index
    %87 = vector.load %arg9[%c0_39, %c0_40] : memref<1x8xf32, #tpu.memory_space<vmem>>, vector<1x8xf32>
    %88 = arith.addf %86, %87 : vector<1x8xf32>
    %cst_41 = arith.constant 0.000000e+00 : f32
    %89 = vector.broadcast %cst_41 : f32 to vector<1x8xf32>
    %90 = arith.maximumf %88, %89 : vector<1x8xf32>
    %c0_42 = arith.constant 0 : index
    %c0_43 = arith.constant 0 : index
    %91 = vector.load %arg10[%c0_42, %c0_43] : memref<8x32xf32, #tpu.memory_space<vmem>>, vector<8x32xf32>
    %cst_44 = arith.constant dense<0.000000e+00> : vector<1x32xf32>
    %92 = tpu.matmul %90, %91, %cst_44 {dimension_numbers = #tpu.dot_dimension_numbers<[1], [0], [0], [1], [0, 0, 1, 1], [], []>} : vector<1x8xf32>, vector<8x32xf32>, vector<1x32xf32> -> vector<1x32xf32>
    %c0_45 = arith.constant 0 : index
    %c0_46 = arith.constant 0 : index
    %93 = vector.load %arg11[%c0_45, %c0_46] : memref<1x32xf32, #tpu.memory_space<vmem>>, vector<1x32xf32>
    %94 = arith.addf %92, %93 : vector<1x32xf32>
    %cst_47 = arith.constant 0.000000e+00 : f32
    %95 = vector.broadcast %cst_47 : f32 to vector<1x32xf32>
    %96 = arith.subf %95, %94 : vector<1x32xf32>
    %97 = math.exp %96 : vector<1x32xf32>
    %cst_48 = arith.constant 1.000000e+00 : f32
    %98 = vector.broadcast %cst_48 : f32 to vector<1x32xf32>
    %99 = arith.addf %98, %97 : vector<1x32xf32>
    %cst_49 = arith.constant 1.000000e+00 : f32
    %100 = vector.broadcast %cst_49 : f32 to vector<1x32xf32>
    %101 = arith.divf %100, %99 : vector<1x32xf32>
    %102 = vector.broadcast %101 : vector<1x32xf32> to vector<24x32xf32>
    %103 = arith.mulf %77, %102 : vector<24x32xf32>
    %104 = arith.truncf %103 : vector<24x32xf32> to vector<24x32xbf16>
    %c0_50 = arith.constant 0 : index
    %c0_51 = arith.constant 0 : index
    %105 = vector.load %arg12[%c0_50, %c0_51] : memref<32x16xbf16, #tpu.memory_space<vmem>>, vector<32x16xbf16>
    %cst_52 = arith.constant dense<0.000000e+00> : vector<24x16xf32>
    %106 = tpu.matmul %104, %105, %cst_52 {dimension_numbers = #tpu.dot_dimension_numbers<[1], [0], [0], [1], [0, 0, 1, 1], [], []>} : vector<24x32xbf16>, vector<32x16xbf16>, vector<24x16xf32> -> vector<24x16xf32>
    %c0_53 = arith.constant 0 : index
    %c0_54 = arith.constant 0 : index
    %107 = vector.load %arg13[%c0_53, %c0_54] : memref<1x16xf32, #tpu.memory_space<vmem>>, vector<1x16xf32>
    %108 = vector.broadcast %107 : vector<1x16xf32> to vector<24x16xf32>
    %109 = arith.addf %106, %108 : vector<24x16xf32>
    %c0_55 = arith.constant 0 : index
    %c0_56 = arith.constant 0 : index
    %c0_57 = arith.constant 0 : index
    %110 = vector.load %arg14[%c0_55, %c0_56, %c0_57] : memref<1x24x16xf32, #tpu.memory_space<vmem>>, vector<1x24x16xf32>
    %111 = vector.shape_cast %110 : vector<1x24x16xf32> to vector<24x16xf32>
    %112 = arith.addf %109, %111 : vector<24x16xf32>
    %c0_58 = arith.constant 0 : index
    %c0_59 = arith.constant 0 : index
    %c0_60 = arith.constant 0 : index
    %113 = vector.load %arg15[%c0_58, %c0_59, %c0_60] : memref<1x24x16xf32, #tpu.memory_space<vmem>>, vector<1x24x16xf32>
    %114 = vector.shape_cast %113 : vector<1x24x16xf32> to vector<24x16xf32>
    %115 = vector.shape_cast %112 : vector<24x16xf32> to vector<1x24x16xf32>
    tpu.vector_store %arg15[%c0_58, %c0_59, %c0_60], %115 {strides = array<i32>} : memref<1x24x16xf32, #tpu.memory_space<vmem>>, vector<1x24x16xf32>,
    return
  }
  func.func @transform_0(%arg0: i32) -> (i32, i32, i32) {
    %c0_i32 = arith.constant 0 : i32
    %c0_i32_0 = arith.constant 0 : i32
    %c0_i32_1 = arith.constant 0 : i32
    return %arg0, %c0_i32, %c0_i32_0 : i32, i32, i32
  }
  func.func @transform_1(%arg0: i32) -> (i32, i32) {
    %c0_i32 = arith.constant 0 : i32
    %c0_i32_0 = arith.constant 0 : i32
    %c0_i32_1 = arith.constant 0 : i32
    return %c0_i32, %c0_i32_0 : i32, i32
  }
  func.func @transform_2(%arg0: i32) -> (i32, i32) {
    %c0_i32 = arith.constant 0 : i32
    %c0_i32_0 = arith.constant 0 : i32
    %c0_i32_1 = arith.constant 0 : i32
    return %c0_i32, %c0_i32_0 : i32, i32
  }
  func.func @transform_3(%arg0: i32) -> (i32, i32) {
    %c0_i32 = arith.constant 0 : i32
    %c0_i32_0 = arith.constant 0 : i32
    %c0_i32_1 = arith.constant 0 : i32
    return %c0_i32, %c0_i32_0 : i32, i32
  }
  func.func @transform_4(%arg0: i32) -> (i32, i32) {
    %c0_i32 = arith.constant 0 : i32
    %c0_i32_0 = arith.constant 0 : i32
    %c0_i32_1 = arith.constant 0 : i32
    return %c0_i32, %c0_i32_0 : i32, i32
  }
  func.func @transform_5(%arg0: i32) -> (i32, i32) {
    %c0_i32 = arith.constant 0 : i32
    %c0_i32_0 = arith.constant 0 : i32
    %c0_i32_1 = arith.constant 0 : i32
    return %c0_i32, %c0_i32_0 : i32, i32
  }
  func.func @transform_6(%arg0: i32) -> (i32, i32) {
    %c0_i32 = arith.constant 0 : i32
    %c0_i32_0 = arith.constant 0 : i32
    %c0_i32_1 = arith.constant 0 : i32
    return %c0_i32, %c0_i32_0 : i32, i32
  }
  func.func @transform_7(%arg0: i32) -> (i32, i32) {
    %c0_i32 = arith.constant 0 : i32
    %c0_i32_0 = arith.constant 0 : i32
    %c0_i32_1 = arith.constant 0 : i32
    return %c0_i32, %c0_i32_0 : i32, i32
  }
  func.func @transform_8(%arg0: i32) -> (i32, i32) {
    %c0_i32 = arith.constant 0 : i32
    %c0_i32_0 = arith.constant 0 : i32
    %c0_i32_1 = arith.constant 0 : i32
    return %c0_i32, %c0_i32_0 : i32, i32
  }
  func.func @transform_9(%arg0: i32) -> (i32, i32) {
    %c0_i32 = arith.constant 0 : i32
    %c0_i32_0 = arith.constant 0 : i32
    %c0_i32_1 = arith.constant 0 : i32
    return %c0_i32, %c0_i32_0 : i32, i32
  }
  func.func @transform_10(%arg0: i32) -> (i32, i32) {
    %c0_i32 = arith.constant 0 : i32
    %c0_i32_0 = arith.constant 0 : i32
    %c0_i32_1 = arith.constant 0 : i32
    return %c0_i32, %c0_i32_0 : i32, i32
  }
  func.func @transform_11(%arg0: i32) -> (i32, i32) {
    %c0_i32 = arith.constant 0 : i32
    %c0_i32_0 = arith.constant 0 : i32
    %c0_i32_1 = arith.constant 0 : i32
    return %c0_i32, %c0_i32_0 : i32, i32
  }
  func.func @transform_12(%arg0: i32) -> (i32, i32) {
    %c0_i32 = arith.constant 0 : i32
    %c0_i32_0 = arith.constant 0 : i32
    %c0_i32_1 = arith.constant 0 : i32
    return %c0_i32, %c0_i32_0 : i32, i32
  }
  func.func @transform_13(%arg0: i32) -> (i32, i32, i32) {
    %c0_i32 = arith.constant 0 : i32
    %c0_i32_0 = arith.constant 0 : i32
    %c0_i32_1 = arith.constant 0 : i32
    return %arg0, %c0_i32, %c0_i32_0 : i32, i32, i32
  }
  func.func @transform_14(%arg0: i32) -> (i32, i32, i32) {
    %c0_i32 = arith.constant 0 : i32
    %c0_i32_0 = arith.constant 0 : i32
    %c0_i32_1 = arith.constant 0 : i32
    return %arg0, %c0_i32, %c0_i32_0 : i32, i32, i32
  }
}

</mosaic_0001>

<bundles_post_ra>
// kernel: _lambda_.4
= control target key start
LH: loop header
LB: loop body
LE: loop exit
PB: predicated region body
PF: predicated region fallthrough
CT: control target
= control target key end

     0   :  { %vm83_vm0 = vcmask 1044480   ;;  %vm84_vm1 = vcmask 1045504   ;;  %v218_v2 = vmov 65535   ;;  %vm58_vm2 = vcmask 220160   ;;  %s389_s1 = inlined_call_operand.vmem [shape: bf16[27,8], index: 1, kind: input, shape index: {}]   ;;  %s390_s0 = inlined_call_operand.vmem [shape: f32[128,27], index: 0, kind: input, shape index: {}]   ;;  %s391_s2 = inlined_call_operand.vmem [shape: f32[1,8], index: 2, kind: input, shape index: {}]   ;;  %s392_s3 = inlined_call_operand.vmem [shape: f32[128,8], index: 3, kind: output, shape index: {}]  }
   0x1   :  { %v198_v0 = vld [vmem:[%s389_s1 + $0x8] sm:$0xf]  ;;  %v209_v1 = vld [vmem:[%s389_s1 + $0x8] sm:$0x30]  ;;  %v85_v3 = vsel %vm83_vm0, 4294967295, %v218_v2  ;;  %v208_v7 = vld [vmem:[%s389_s1] sm:$0xff] }
   0x2   :  { %v199_v4 = vor.u32 %v209_v1, %v198_v0  ;;  %v86_v5 = vsel %vm84_vm1, %v85_v3, 0  ;;  %v15_v8 = vld [vmem:[%s390_s0] sm:$0xff]  ;;  %v16_v9 = vld [vmem:[%s390_s0 + $0x8] sm:$0xff]  ;;  %v17_v20 = vld [vmem:[%s390_s0 + $0x10] sm:$0xff]  ;;  %vm171_vm3 = vcmask 64512  }
   0x3   :  { %v19_v10 = vld [vmem:[%s390_s0 + $0x20] sm:$0xff]  ;;  %v20_v11 = vld [vmem:[%s390_s0 + $0x28] sm:$0xff]  ;;  %v31_v16 = vpack.c.bf16 %v16_v9, %v15_v8  ;;  %v18_v21 = vld [vmem:[%s390_s0 + $0x18] sm:$0xff] }
   0x4   :  { %v88_v6 = vand.u32 %v199_v4, %v86_v5  ;;  %v23_v12 = vld [vmem:[%s390_s0 + $0x40] sm:$0xff]  ;;  %v24_v13 = vld [vmem:[%s390_s0 + $0x48] sm:$0xff]  ;;  %v33_v17 = vpack.c.bf16 %v20_v11, %v19_v10  ;;  %v21_v22 = vld [vmem:[%s390_s0 + $0x30] sm:$0xff]  ;;  %v32_v28 = vpack.c.bf16 %v18_v21, %v17_v20 }
   0x5   :  { %v27_v14 = vld [vmem:[%s390_s0 + $0x60] sm:$0xff]  ;;  %v28_v15 = vld [vmem:[%s390_s0 + $0x68] sm:$0xff]  ;;  %v35_v18 = vpack.c.bf16 %v24_v13, %v23_v12  ;;  %v22_v23 = vld [vmem:[%s390_s0 + $0x38] sm:$0xff] }
   0x6   :  { %96 = vmatpush.bf16.msra.mxu0 %v88_v6  ;;  %210 = vmatpush.bf16.msra.mxu1 %v88_v6  ;;  %v37_v19 = vpack.c.bf16 %v28_v15, %v27_v14  ;;  %v25_v24 = vld [vmem:[%s390_s0 + $0x50] sm:$0xff]  ;;  %v26_v25 = vld [vmem:[%s390_s0 + $0x58] sm:$0xff]  ;;  %v34_v29 = vpack.c.bf16 %v22_v23, %v21_v22  ;;  %v307_v32 = vld [vmem:[%s391_s2] ss:$0 sm:$0xff] }
   0x7   :  { %211 = vmatpush.bf16.msra.mxu2 %v88_v6  ;;  %212 = vmatpush.bf16.msra.mxu3 %v88_v6  ;;  %v29_v26 = vld [vmem:[%s390_s0 + $0x70] sm:$0xff]  ;;  %v30_v27 = vld [vmem:[%s390_s0 + $0x78] sm:$0xff]  ;;  %v36_v30 = vpack.c.bf16 %v26_v25, %v25_v24 }
   0x8   :  { %v38_v31 = vpack.c.bf16 %v30_v27, %v29_v26 }
   0xa   :  { %97 = vmatpush.bf16.msra.mxu0 %v208_v7  ;;  %213 = vmatpush.bf16.msra.mxu1 %v208_v7 }
   0xb   :  { %214 = vmatpush.bf16.msra.mxu2 %v208_v7  ;;  %215 = vmatpush.bf16.msra.mxu3 %v208_v7 }
   0xd   :  { %200 = vmatmul.msk.bf16.vlgmr.msra.gmra.mxu0 %vm58_vm2, %v31_v16  ;;  %202 = vmatmul.msk.bf16.vlgmr.msra.gmra.mxu1 %vm58_vm2, %v33_v17 }
   0xe   :  { %204 = vmatmul.msk.bf16.vlgmr.msra.gmra.mxu2 %vm58_vm2, %v35_v18  ;;  %206 = vmatmul.msk.bf16.vlgmr.msra.gmra.mxu3 %vm58_vm2, %v37_v19 }
  0x1d   :  { %201 = vmatmul.msk.bf16.gmra.mxu0 %vm58_vm2, %v32_v28  ;;  %203 = vmatmul.msk.bf16.gmra.mxu1 %vm58_vm2, %v34_v29 }
  0x1e   :  { %205 = vmatmul.msk.bf16.gmra.mxu2 %vm58_vm2, %v36_v30  ;;  %207 = vmatmul.msk.bf16.gmra.mxu3 %vm58_vm2, %v38_v31 }
  0x8a   :  { %v99_v33 = vpop.f32.mrf.mxu0  ;;  %v109_v34 = vpop.f32.mrf.mxu1 }
  0x8b   :  { %v100_v35 = vadd.f32 %v307_v32, %v99_v33  ;;  %v110_v36 = vadd.f32 %v307_v32, %v109_v34 }
  0x8d   :  { %v139_v37 = vmax.f32 %v100_v35, 0.0  ;;  %v143_v38 = vmax.f32 %v110_v36, 0.0 }
  0x8f   :  { %v155_v39 = vmin.f32 %v139_v37, 6.0  ;;  %v159_v40 = vmin.f32 %v143_v38, 6.0 }
  0x91   :  { %172 = vst.msk [vmem:[%s392_s3] sm:$0xff] %vm171_vm3, %v155_v39  ;;  %v119_v41 = vpop.f32.mrf.mxu2  ;;  %v129_v42 = vpop.f32.mrf.mxu3 }
  0x92   :  { %176 = vst.msk [vmem:[%s392_s3 + $0x20] sm:$0xff] %vm171_vm3, %v159_v40  ;;  %v120_v43 = vadd.f32 %v307_v32, %v119_v41  ;;  %v130_v44 = vadd.f32 %v307_v32, %v129_v42  ;;  %v101_v45 = vpop.f32.mrf.mxu0  ;;  %v111_v46 = vpop.f32.mrf.mxu1 }
  0x93   :  { %v102_v47 = vadd.f32 %v307_v32, %v101_v45  ;;  %v112_v48 = vadd.f32 %v307_v32, %v111_v46 }
  0x94   :  { %v147_v49 = vmax.f32 %v120_v43, 0.0  ;;  %v151_v50 = vmax.f32 %v130_v44, 0.0 }
  0x95   :  { %v140_v51 = vmax.f32 %v102_v47, 0.0  ;;  %v144_v52 = vmax.f32 %v112_v48, 0.0 }
  0x96   :  { %v163_v53 = vmin.f32 %v147_v49, 6.0  ;;  %v167_v54 = vmin.f32 %v151_v50, 6.0 }
  0x97   :  { %v156_v55 = vmin.f32 %v140_v51, 6.0  ;;  %v160_v56 = vmin.f32 %v144_v52, 6.0 }
  0x98   :  { %180 = vst.msk [vmem:[%s392_s3 + $0x40] sm:$0xff] %vm171_vm3, %v163_v53 }
  0x99   :  { %184 = vst.msk [vmem:[%s392_s3 + $0x60] sm:$0xff] %vm171_vm3, %v167_v54  ;;  %v121_v57 = vpop.f32.mrf.mxu2  ;;  %v131_v58 = vpop.f32.mrf.mxu3 }
  0x9a   :  { %173 = vst.msk [vmem:[%s392_s3 + $0x8] sm:$0xff] %vm171_vm3, %v156_v55  ;;  %v122_v59 = vadd.f32 %v307_v32, %v121_v57  ;;  %v132_v60 = vadd.f32 %v307_v32, %v131_v58  ;;  %v104_v61 = vpop.f32.mrf.mxu0  ;;  %v114_v62 = vpop.f32.mrf.mxu1 }
  0x9b   :  { %177 = vst.msk [vmem:[%s392_s3 + $0x28] sm:$0xff] %vm171_vm3, %v160_v56  ;;  %v105_v63 = vadd.f32 %v307_v32, %v104_v61  ;;  %v115_v0 = vadd.f32 %v307_v32, %v114_v62 }
  0x9c   :  { %v148_v1 = vmax.f32 %v122_v59, 0.0  ;;  %v152_v2 = vmax.f32 %v132_v60, 0.0 }
  0x9d   :  { %v141_v3 = vmax.f32 %v105_v63, 0.0  ;;  %v145_v4 = vmax.f32 %v115_v0, 0.0 }
  0x9e   :  { %v164_v5 = vmin.f32 %v148_v1, 6.0  ;;  %v168_v6 = vmin.f32 %v152_v2, 6.0 }
  0x9f   :  { %v157_v7 = vmin.f32 %v141_v3, 6.0  ;;  %v161_v8 = vmin.f32 %v145_v4, 6.0 }
  0xa0   :  { %181 = vst.msk [vmem:[%s392_s3 + $0x48] sm:$0xff] %vm171_vm3, %v164_v5 }
  0xa1   :  { %185 = vst.msk [vmem:[%s392_s3 + $0x68] sm:$0xff] %vm171_vm3, %v168_v6  ;;  %v124_v9 = vpop.f32.mrf.mxu2  ;;  %v134_v10 = vpop.f32.mrf.mxu3 }
  0xa2   :  { %174 = vst.msk [vmem:[%s392_s3 + $0x10] sm:$0xff] %vm171_vm3, %v157_v7  ;;  %v125_v11 = vadd.f32 %v307_v32, %v124_v9  ;;  %v135_v12 = vadd.f32 %v307_v32, %v134_v10  ;;  %v106_v13 = vpop.f32.mrf.mxu0  ;;  %v116_v14 = vpop.f32.mrf.mxu1 }
  0xa3   :  { %178 = vst.msk [vmem:[%s392_s3 + $0x30] sm:$0xff] %vm171_vm3, %v161_v8  ;;  %v107_v15 = vadd.f32 %v307_v32, %v106_v13  ;;  %v117_v16 = vadd.f32 %v307_v32, %v116_v14 }
  0xa4   :  { %v149_v17 = vmax.f32 %v125_v11, 0.0  ;;  %v153_v18 = vmax.f32 %v135_v12, 0.0 }
  0xa5   :  { %v142_v19 = vmax.f32 %v107_v15, 0.0  ;;  %v146_v20 = vmax.f32 %v117_v16, 0.0 }
  0xa6   :  { %v165_v21 = vmin.f32 %v149_v17, 6.0  ;;  %v169_v22 = vmin.f32 %v153_v18, 6.0 }
  0xa7   :  { %v158_v23 = vmin.f32 %v142_v19, 6.0  ;;  %v162_v24 = vmin.f32 %v146_v20, 6.0 }
  0xa8   :  { %182 = vst.msk [vmem:[%s392_s3 + $0x50] sm:$0xff] %vm171_vm3, %v165_v21 }
  0xa9   :  { %186 = vst.msk [vmem:[%s392_s3 + $0x70] sm:$0xff] %vm171_vm3, %v169_v22  ;;  %v126_v25 = vpop.f32.mrf.mxu2  ;;  %v136_v26 = vpop.f32.mrf.mxu3 }
  0xaa   :  { %175 = vst.msk [vmem:[%s392_s3 + $0x18] sm:$0xff] %vm171_vm3, %v158_v23  ;;  %v127_v27 = vadd.f32 %v307_v32, %v126_v25  ;;  %v137_v28 = vadd.f32 %v307_v32, %v136_v26 }
  0xab   :  { %179 = vst.msk [vmem:[%s392_s3 + $0x38] sm:$0xff] %vm171_vm3, %v162_v24 }
  0xac   :  { %v150_v29 = vmax.f32 %v127_v27, 0.0  ;;  %v154_v30 = vmax.f32 %v137_v28, 0.0 }
  0xae   :  { %v166_v31 = vmin.f32 %v150_v29, 6.0  ;;  %v170_v33 = vmin.f32 %v154_v30, 6.0 }
  0xb0   :  { %183 = vst.msk [vmem:[%s392_s3 + $0x58] sm:$0xff] %vm171_vm3, %v166_v31 }
  0xb1   :  { %187 = vst.msk [vmem:[%s392_s3 + $0x78] sm:$0xff] %vm171_vm3, %v170_v33 }

// kernel: _lambda_.5
= control target key start
LH: loop header
LB: loop body
LE: loop exit
PB: predicated region body
PF: predicated region fallthrough
CT: control target
= control target key end

     0   :  { %s821_s21 = smov 0   ;;  %s1063_s0 = inlined_call_operand.vmem [shape: f32[2,104,8], index: 0, kind: input, shape index: {}]   ;;  %s1064_s1 = inlined_call_operand.vmem [shape: f32[9,8], index: 1, kind: input, shape index: {}]   ;;  %s1065_s2 = inlined_call_operand.vmem [shape: f32[1,8], index: 2, kind: input, shape index: {}]   ;;  %s1066_s3 = inlined_call_operand.vmem [shape: bf16[8,8], index: 3, kind: input, shape index: {}]   ;;  %s1067_s4 = inlined_call_operand.vmem [shape: f32[1,8], index: 4, kind: input, shape index: {}]   ;;  %s1068_s5 = inlined_call_operand.vmem [shape: f32[2,80,8], index: 5, kind: input, shape index: {}]   ;;  %s1069_s6 = inlined_call_operand.vmem [shape: f32[2,80,8], index: 6, kind: output, shape index: {}]  }
   0x1 LB: > { %s747_s22 = sadd.s32 4294967295, %s784_s21   ;;  %p751_p0 = scmp.ge.s32.totalorder %s784_s21, 1  ;;  %s784_s21 = sphi %s821_s21, %s16_s21  }
   0x2   : > { %p222_p1 = scmp.lt.s32.totalorder %s784_s21, 3 }
   0x4   : > { %p223_p2 = pnand %p751_p0, %p222_p1 }
   0x5   : > { %p257_p3 = scmp.lt.s32.totalorder (!%p223_p2), %s747_s22, 1 }
   0x6   : > { %226 = sbr.rel (%p223_p2) target bundleno = 233 (0xe9), region = 44 }
   0xb   : > { %v592_v0 = vld [vmem:[%s1066_s3] sm:$0xf]  ;;  %vm612_vm0 = vcmask 1043456   ;;  %s1071_s22 = smov (!%p257_p3, %s747_s22), 1  ;;  %vm286_vm1 = vcmask 64512  }
   0xc   : > { %v614_v1 = vsel %vm612_vm0, %v592_v0, 0  ;;  %s765_s25 = smul.u32 104, %s1071_s22  ;;  %v300_v7 = vld [vmem:[%s1064_s1] sm:$0xff]  ;;  %v863_v21 = vld [vmem:[%s1064_s1 + $0x8] ss:$0 sm:$0xff] }
   0xd   : > { %763 = vmatpush.bf16.msra.mxu2 %v614_v1  ;;  %764 = vmatpush.bf16.msra.mxu3 %v614_v1  ;;  %v846_v10 = vperm.slane %v300_v7, 0  ;;  %v848_v12 = vperm.slane %v300_v7, 1  ;;  %v850_v13 = vperm.slane %v300_v7, 2  ;;  %v853_v15 = vperm.slane %v300_v7, 3  ;;  %s766_s11 = smul.u32 80, %s1071_s22 }
   0xe   : > { %623 = vmatpush.bf16.msra.mxu0 %v614_v1  ;;  %762 = vmatpush.bf16.msra.mxu1 %v614_v1  ;;  %s261_s28 = scalar_lea.vmem %s1063_s0, %s765_s25  ;;  %v855_v16 = vperm.slane %v300_v7, 4  ;;  %v858_v20 = vperm.slane %v300_v7, 5  ;;  %v867_v28 = vperm.slane %v300_v7, 6  ;;  %v869_v29 = vperm.slane %v300_v7, 7 }
   0xf   : > { %v277_v2 = vld [vmem:[%s261_s28 + $0x20] sm:$0xff]  ;;  %v278_v3 = vld [vmem:[%s261_s28 + $0x28] sm:$0xff]  ;;  %v279_v4 = vld [vmem:[%s261_s28 + $0x30] sm:$0xff]  ;;  %s1020_s14 = scalar_lea.vmem %s1068_s5, %s766_s11  ;;  %s1029_s19 = scalar_lea.vmem %s1069_s6, %s766_s11 }
  0x10   : > { %v280_v5 = vld [vmem:[%s261_s28 + $0x38] sm:$0xff]  ;;  %291 = vst.msk [vmem:[#allocation2 + $0x20] sm:$0xff] %vm286_vm1, %v277_v2  ;;  %v281_v6 = vld [vmem:[%s261_s28 + $0x40] sm:$0xff]  ;;  %v282_v8 = vld [vmem:[%s261_s28 + $0x48] sm:$0xff] }
  0x11   : > { %292 = vst.msk [vmem:[#allocation2 + $0x28] sm:$0xff] %vm286_vm1, %v278_v3  ;;  %v283_v9 = vld [vmem:[%s261_s28 + $0x50] sm:$0xff]  ;;  %v284_v11 = vld [vmem:[%s261_s28 + $0x58] sm:$0xff]  ;;  %v285_v14 = vld [vmem:[%s261_s28 + $0x60] sm:$0xff] }
  0x12   : > { %293 = vst.msk [vmem:[#allocation2 + $0x30] sm:$0xff] %vm286_vm1, %v279_v4  ;;  %v273_v17 = vld [vmem:[%s261_s28] sm:$0xff]  ;;  %v274_v18 = vld [vmem:[%s261_s28 + $0x8] sm:$0xff]  ;;  %v275_v22 = vld [vmem:[%s261_s28 + $0x10] sm:$0xff] }
  0x13   : > { %294 = vst.msk [vmem:[#allocation2 + $0x38] sm:$0xff] %vm286_vm1, %v280_v5  ;;  %v276_v23 = vld [vmem:[%s261_s28 + $0x18] sm:$0xff] }
  0x14   : > { %295 = vst.msk [vmem:[#allocation2 + $0x40] sm:$0xff] %vm286_vm1, %v281_v6 }
  0x15   : > { %296 = vst.msk [vmem:[#allocation2 + $0x48] sm:$0xff] %vm286_vm1, %v282_v8 }
  0x16   : > { %297 = vst.msk [vmem:[#allocation2 + $0x50] sm:$0xff] %vm286_vm1, %v283_v9 }
  0x17   : > { %v306_v19 = vld [vmem:[#allocation2 + $0x20] sm:$0xff]  ;;  %298 = vst.msk [vmem:[#allocation2 + $0x58] sm:$0xff] %vm286_vm1, %v284_v11 }
  0x18   : > { %v307_v24 = vld [vmem:[#allocation2 + $0x28] sm:$0xff]  ;;  %v317_v25 = vmul.f32 %v846_v10, %v306_v19  ;;  %299 = vst.msk [vmem:[#allocation2 + $0x60] sm:$0xff] %vm286_vm1, %v285_v14 }
  0x19   : > { %v327_v26 = vld [vmem:[#allocation2 + $0x21] sm:$0xff]  ;;  %v318_v30 = vmul.f32 %v846_v10, %v307_v24  ;;  %v328_v31 = vld [vmem:[#allocation2 + $0x29] sm:$0xff]  ;;  %287 = vst.msk [vmem:[#allocation2] sm:$0xff] %vm286_vm1, %v273_v17 }
  0x1a   : > { %v348_v27 = vld [vmem:[#allocation2 + $0x22] sm:$0xff]  ;;  %v338_v32 = vmul.f32 %v848_v12, %v327_v26  ;;  %v349_v33 = vld [vmem:[#allocation2 + $0x2a] sm:$0xff]  ;;  %v339_v37 = vmul.f32 %v848_v12, %v328_v31  ;;  %v880_v38 = vld [vmem:[#allocation2 + $0x32] sm:$0xff]  ;;  %288 = vst.msk [vmem:[#allocation2 + $0x8] sm:$0xff] %vm286_vm1, %v274_v18 }
  0x1b   : > { %v359_v34 = vmul.f32 %v850_v13, %v348_v27  ;;  %v381_v35 = vld [vmem:[#allocation2 + $0x2b] sm:$0xff]  ;;  %v877_v36 = vmul.f32 %v853_v15, %v348_v27  ;;  %v360_v39 = vmul.f32 %v850_v13, %v349_v33  ;;  %v371_v40 = vmul.f32 %v853_v15, %v349_v33  ;;  %v382_v41 = vld [vmem:[#allocation2 + $0x33] sm:$0xff]  ;;  %v891_v47 = vld [vmem:[#allocation2 + $0x3c] sm:$0xff]  ;;  %289 = vst.msk [vmem:[#allocation2 + $0x10] sm:$0xff] %vm286_vm1, %v275_v22 }
  0x1c   : > { %v392_v42 = vmul.f32 %v855_v16, %v381_v35  ;;  %v885_v43 = vld [vmem:[#allocation2 + $0x2c] sm:$0xff]  ;;  %v372_v44 = vmul.f32 %v853_v15, %v880_v38  ;;  %v393_v45 = vmul.f32 %v855_v16, %v382_v41  ;;  %v403_v46 = vld [vmem:[#allocation2 + $0x34] sm:$0xff]  ;;  %v477_v50 = vadd.f32 %v338_v32, %v317_v25  ;;  %v436_v54 = vld [vmem:[#allocation2 + $0x3d] sm:$0xff]  ;;  %290 = vst.msk [vmem:[#allocation2 + $0x18] sm:$0xff] %vm286_vm1, %v276_v23 }
  0x1d   : > { %v413_v48 = vmul.f32 %v858_v20, %v885_v43  ;;  %v435_v49 = vld [vmem:[#allocation2 + $0x35] sm:$0xff]  ;;  %v414_v51 = vmul.f32 %v858_v20, %v403_v46  ;;  %v425_v52 = vmul.f32 %v867_v28, %v403_v46  ;;  %v426_v53 = vmul.f32 %v867_v28, %v891_v47  ;;  %v457_v57 = vld [vmem:[#allocation2 + $0x3e] sm:$0xff]  ;;  %v311_v63 = vld [vmem:[#allocation2 + $0x48] sm:$0xff] }
  0x1e   : > { %v446_v55 = vmul.f32 %v869_v29, %v435_v49  ;;  %v456_v56 = vld [vmem:[#allocation2 + $0x36] sm:$0xff]  ;;  %v447_v58 = vmul.f32 %v869_v29, %v436_v54  ;;  %v468_v60 = vmul.f32 %v863_v21, %v457_v57  ;;  %v478_v61 = vadd.f32 %v339_v37, %v318_v30  ;;  %v310_v62 = vld [vmem:[#allocation2 + $0x40] sm:$0xff]  ;;  %v332_v5 = vld [vmem:[#allocation2 + $0x49] sm:$0xff] }
  0x1f   : > { %v467_v59 = vmul.f32 %v863_v21, %v456_v56  ;;  %v331_v0 = vld [vmem:[#allocation2 + $0x41] sm:$0xff]  ;;  %v487_v1 = vadd.f32 %v371_v40, %v359_v34  ;;  %v488_v2 = vadd.f32 %v372_v44, %v360_v39  ;;  %v497_v3 = vadd.f32 %v413_v48, %v392_v42  ;;  %v353_v7 = vld [vmem:[#allocation2 + $0x4a] sm:$0xff]  ;;  %v365_v17 = vld [vmem:[#allocation2 + $0x52] sm:$0xff] }
  0x20   : > { %v498_v4 = vadd.f32 %v414_v51, %v393_v45  ;;  %v905_v6 = vld [vmem:[#allocation2 + $0x42] sm:$0xff]  ;;  %v507_v8 = vadd.f32 %v446_v55, %v425_v52  ;;  %v508_v9 = vadd.f32 %v447_v58, %v426_v53  ;;  %v321_v11 = vmul.f32 %v846_v10, %v310_v62  ;;  %v385_v18 = vld [vmem:[#allocation2 + $0x4b] sm:$0xff]  ;;  %v386_v19 = vld [vmem:[#allocation2 + $0x53] sm:$0xff] }
  0x21   : > { %v322_v14 = vmul.f32 %v846_v10, %v311_v63  ;;  %v517_v22 = vadd.f32 %v487_v1, %v477_v50  ;;  %v518_v23 = vadd.f32 %v488_v2, %v478_v61  ;;  %v342_v24 = vmul.f32 %v848_v12, %v331_v0  ;;  %v911_v26 = vld [vmem:[#allocation2 + $0x4c] sm:$0xff]  ;;  %v407_v27 = vld [vmem:[#allocation2 + $0x54] sm:$0xff]  ;;  %v419_v34 = vld [vmem:[#allocation2 + $0x5c] sm:$0xff] }
  0x22   : > { %v343_v25 = vmul.f32 %v848_v12, %v332_v5  ;;  %v527_v30 = vadd.f32 %v507_v8, %v497_v3  ;;  %v528_v31 = vadd.f32 %v508_v9, %v498_v4  ;;  %v363_v32 = vmul.f32 %v850_v13, %v905_v6  ;;  %v439_v35 = vld [vmem:[#allocation2 + $0x55] sm:$0xff]  ;;  %v440_v37 = vld [vmem:[#allocation2 + $0x5d] sm:$0xff]  ;;  %v303_v3 = vld [vmem:[#allocation2 + $0x8] sm:$0xff] }
  0x23   : > { %v364_v33 = vmul.f32 %v850_v13, %v353_v7  ;;  %v375_v39 = vmul.f32 %v853_v15, %v353_v7  ;;  %v376_v40 = vmul.f32 %v853_v15, %v365_v17  ;;  %v396_v41 = vmul.f32 %v855_v16, %v385_v18  ;;  %v460_v44 = vld [vmem:[#allocation2 + $0x56] sm:$0xff]  ;;  %v461_v45 = vld [vmem:[#allocation2 + $0x5e] sm:$0xff]  ;;  %v324_v17 = vld [vmem:[#allocation2 + $0x9] sm:$0xff] }
  0x24   : > { %v397_v42 = vmul.f32 %v855_v16, %v386_v19  ;;  %v537_v46 = vadd.f32 %v527_v30, %v517_v22  ;;  %v538_v48 = vadd.f32 %v528_v31, %v518_v23  ;;  %v923_v49 = vld [vmem:[%s1065_s2] ss:$0 sm:$0xff]  ;;  %v417_v50 = vmul.f32 %v858_v20, %v911_v26  ;;  %v323_v9 = vld [vmem:[#allocation2 + $0x1] sm:$0xff]  ;;  %v345_v23 = vld [vmem:[#allocation2 + $0xa] sm:$0xff] }
  0x25   : > { %v418_v51 = vmul.f32 %v858_v20, %v407_v27  ;;  %v429_v52 = vmul.f32 %v867_v28, %v407_v27  ;;  %v430_v53 = vmul.f32 %v867_v28, %v419_v34  ;;  %v450_v54 = vmul.f32 %v869_v29, %v439_v35  ;;  %v302_v2 = vld [vmem:[#allocation2] sm:$0xff]  ;;  %v938_v27 = vld [vmem:[#allocation2 + $0x12] sm:$0xff] }
  0x26   : > { %v451_v55 = vmul.f32 %v869_v29, %v440_v37  ;;  %v547_v56 = vadd.f32 %v537_v46, %v467_v59  ;;  %v548_v57 = vadd.f32 %v538_v48, %v468_v60  ;;  %v471_v58 = vmul.f32 %v863_v21, %v460_v44  ;;  %v344_v22 = vld [vmem:[#allocation2 + $0x2] sm:$0xff]  ;;  %v377_v34 = vld [vmem:[#allocation2 + $0xb] sm:$0xff]  ;;  %v378_v35 = vld [vmem:[#allocation2 + $0x13] sm:$0xff] }
  0x27   : > { %v472_v61 = vmul.f32 %v863_v21, %v461_v45  ;;  %v481_v62 = vadd.f32 %v342_v24, %v321_v11  ;;  %v482_v63 = vadd.f32 %v343_v25, %v322_v14  ;;  %v491_v0 = vadd.f32 %v375_v39, %v363_v32  ;;  %v398_v37 = vld [vmem:[#allocation2 + $0xc] sm:$0xff]  ;;  %v399_v44 = vld [vmem:[#allocation2 + $0x14] sm:$0xff]  ;;  %v944_v45 = vld [vmem:[#allocation2 + $0x1c] sm:$0xff] }
  0x28   : > { %v492_v1 = vadd.f32 %v376_v40, %v364_v33  ;;  %v561_v4 = vadd.f32 %v923_v49, %v547_v56  ;;  %v562_v5 = vadd.f32 %v923_v49, %v548_v57  ;;  %v501_v7 = vadd.f32 %v417_v50, %v396_v41 }
  0x29   : > { %v502_v8 = vadd.f32 %v418_v51, %v397_v42  ;;  %v511_v59 = vadd.f32 %v450_v54, %v429_v52  ;;  %v512_v60 = vadd.f32 %v451_v55, %v430_v53  ;;  %v521_v18 = vadd.f32 %v491_v0, %v481_v62  ;;  %v431_v52 = vld [vmem:[#allocation2 + $0x15] sm:$0xff]  ;;  %v432_v53 = vld [vmem:[#allocation2 + $0x1d] sm:$0xff] }
  0x2a   : > { %v522_v19 = vadd.f32 %v492_v1, %v482_v63  ;;  %v571_v11 = vmax.f32 %v561_v4, 0.0  ;;  %v572_v14 = vmax.f32 %v562_v5, 0.0  ;;  %v313_v24 = vmul.f32 %v846_v10, %v302_v2  ;;  %v452_v54 = vld [vmem:[#allocation2 + $0x16] sm:$0xff]  ;;  %v453_v63 = vld [vmem:[#allocation2 + $0x1e] sm:$0xff] }
  0x2b   : > { %v314_v25 = vmul.f32 %v846_v10, %v303_v3  ;;  %v531_v30 = vadd.f32 %v511_v59, %v501_v7  ;;  %v532_v31 = vadd.f32 %v512_v60, %v502_v8  ;;  %v334_v32 = vmul.f32 %v848_v12, %v323_v9  ;;  %v304_v59 = vld [vmem:[#allocation2 + $0x10] sm:$0xff] }
  0x2c   : > { %v335_v33 = vmul.f32 %v848_v12, %v324_v17  ;;  %v581_v39 = vmin.f32 %v571_v11, 6.0  ;;  %v582_v40 = vmin.f32 %v572_v14, 6.0  ;;  %v355_v41 = vmul.f32 %v850_v13, %v344_v22 }
  0x2d   : > { %v356_v42 = vmul.f32 %v850_v13, %v345_v23  ;;  %v541_v46 = vadd.f32 %v531_v30, %v521_v18  ;;  %v542_v48 = vadd.f32 %v532_v31, %v522_v19  ;;  %v367_v50 = vmul.f32 %v853_v15, %v345_v23  ;;  %v305_v23 = vld [vmem:[#allocation2 + $0x18] sm:$0xff] }
  0x2e   : > { %v368_v51 = vmul.f32 %v853_v15, %v938_v27  ;;  %v589_v55 = vpack.c.bf16 %v582_v40, %v581_v39  ;;  %v388_v56 = vmul.f32 %v855_v16, %v377_v34  ;;  %v389_v57 = vmul.f32 %v855_v16, %v378_v35  ;;  %v325_v34 = vld [vmem:[#allocation2 + $0x11] sm:$0xff]  ;;  %v326_v35 = vld [vmem:[#allocation2 + $0x19] sm:$0xff] }
  0x2f   : > { %v409_v62 = vmul.f32 %v858_v20, %v398_v37  ;;  %v551_v0 = vadd.f32 %v541_v46, %v471_v58  ;;  %v552_v1 = vadd.f32 %v542_v48, %v472_v61  ;;  %v410_v2 = vmul.f32 %v858_v20, %v399_v44  ;;  %v347_v46 = vld [vmem:[#allocation2 + $0x1a] sm:$0xff] }
  0x30   : > { %v421_v3 = vmul.f32 %v867_v28, %v399_v44  ;;  %757 = vmatmul.msk.bf16.vlgmr.msra.gmra.mxu2 %vm286_vm1, %v589_v55  ;;  %v422_v4 = vmul.f32 %v867_v28, %v944_v45  ;;  %v442_v5 = vmul.f32 %v869_v29, %v431_v52  ;;  %v443_v7 = vmul.f32 %v869_v29, %v432_v53  ;;  %v401_v53 = vld [vmem:[#allocation2 + $0x24] sm:$0xff] }
  0x31   : > { %v463_v8 = vmul.f32 %v863_v21, %v452_v54  ;;  %v565_v9 = vadd.f32 %v923_v49, %v551_v0  ;;  %v566_v58 = vadd.f32 %v923_v49, %v552_v1  ;;  %v464_v61 = vmul.f32 %v863_v21, %v453_v63  ;;  %v434_v63 = vld [vmem:[#allocation2 + $0x2d] sm:$0xff] }
  0x32   : > { %v473_v17 = vadd.f32 %v334_v32, %v313_v24  ;;  %v474_v60 = vadd.f32 %v335_v33, %v314_v25  ;;  %v483_v18 = vadd.f32 %v367_v50, %v355_v41  ;;  %v484_v19 = vadd.f32 %v368_v51, %v356_v42  ;;  %v379_v33 = vld [vmem:[#allocation2 + $0x1b] sm:$0xff]  ;;  %v380_v41 = vld [vmem:[#allocation2 + $0x23] sm:$0xff] }
  0x33   : > { %v493_v22 = vadd.f32 %v409_v62, %v388_v56  ;;  %v575_v11 = vmax.f32 %v565_v9, 0.0  ;;  %v576_v14 = vmax.f32 %v566_v58, 0.0  ;;  %v494_v30 = vadd.f32 %v410_v2, %v389_v57  ;;  %v433_v62 = vld [vmem:[#allocation2 + $0x25] sm:$0xff] }
  0x34   : > { %v503_v31 = vadd.f32 %v442_v5, %v421_v3  ;;  %v504_v37 = vadd.f32 %v443_v7, %v422_v4  ;;  %v513_v39 = vadd.f32 %v483_v18, %v473_v17  ;;  %v514_v40 = vadd.f32 %v484_v19, %v474_v60  ;;  %v454_v0 = vld [vmem:[#allocation2 + $0x26] sm:$0xff]  ;;  %v455_v5 = vld [vmem:[#allocation2 + $0x2e] sm:$0xff] }
  0x35   : > { %v315_v44 = vmul.f32 %v846_v10, %v304_v59  ;;  %v585_v48 = vmin.f32 %v575_v11, 6.0  ;;  %v586_v24 = vmin.f32 %v576_v14, 6.0  ;;  %v316_v25 = vmul.f32 %v846_v10, %v305_v23  ;;  %v308_v23 = vld [vmem:[#allocation2 + $0x30] sm:$0xff] }
  0x36   : > { %v523_v32 = vadd.f32 %v503_v31, %v493_v22  ;;  %v524_v42 = vadd.f32 %v504_v37, %v494_v30  ;;  %v336_v50 = vmul.f32 %v848_v12, %v325_v34  ;;  %v337_v51 = vmul.f32 %v848_v12, %v326_v35 }
  0x37   : > { %v357_v52 = vmul.f32 %v850_v13, %v938_v27  ;;  %v591_v54 = vpack.c.bf16 %v586_v24, %v585_v48  ;;  %v358_v56 = vmul.f32 %v850_v13, %v347_v46  ;;  %v369_v57 = vmul.f32 %v853_v15, %v347_v46 }
  0x38   : > { %v533_v55 = vadd.f32 %v523_v32, %v513_v39  ;;  %v534_v1 = vadd.f32 %v524_v42, %v514_v40  ;;  %v390_v2 = vmul.f32 %v855_v16, %v379_v33  ;;  %v391_v3 = vmul.f32 %v855_v16, %v380_v41  ;;  %v329_v39 = vld [vmem:[#allocation2 + $0x31] sm:$0xff]  ;;  %v330_v40 = vld [vmem:[#allocation2 + $0x39] sm:$0xff] }
  0x39   : > { %v411_v4 = vmul.f32 %v858_v20, %v944_v45  ;;  %759 = vmatmul.msk.bf16.vlgmr.msra.gmra.mxu3 %vm286_vm1, %v591_v54  ;;  %v412_v7 = vmul.f32 %v858_v20, %v401_v53  ;;  %v423_v9 = vmul.f32 %v867_v28, %v401_v53  ;;  %v424_v58 = vmul.f32 %v867_v28, %v885_v43  ;;  %v351_v32 = vld [vmem:[#allocation2 + $0x3a] sm:$0xff] }
  0x3a   : > { %v543_v27 = vadd.f32 %v533_v55, %v463_v8  ;;  %v544_v17 = vadd.f32 %v534_v1, %v464_v61  ;;  %v444_v59 = vmul.f32 %v869_v29, %v433_v62  ;;  %v445_v60 = vmul.f32 %v869_v29, %v434_v63  ;;  %v309_v61 = vld [vmem:[#allocation2 + $0x38] sm:$0xff]  ;;  %v405_v55 = vld [vmem:[#allocation2 + $0x44] sm:$0xff]  ;;  %v438_v1 = vld [vmem:[#allocation2 + $0x4d] sm:$0xff] }
  0x3b   : > { %v465_v18 = vmul.f32 %v863_v21, %v454_v0  ;;  %v466_v19 = vmul.f32 %v863_v21, %v455_v5  ;;  %v475_v22 = vadd.f32 %v336_v50, %v315_v44  ;;  %v476_v8 = vadd.f32 %v337_v51, %v316_v25  ;;  %v384_v50 = vld [vmem:[#allocation2 + $0x43] sm:$0xff] }
  0x3c   : > { %v557_v45 = vadd.f32 %v923_v49, %v543_v27  ;;  %v558_v11 = vadd.f32 %v923_v49, %v544_v17  ;;  %v485_v14 = vadd.f32 %v369_v57, %v357_v52  ;;  %v486_v30 = vadd.f32 %v877_v36, %v358_v56  ;;  %v383_v36 = vld [vmem:[#allocation2 + $0x3b] sm:$0xff]  ;;  %v437_v0 = vld [vmem:[#allocation2 + $0x45] sm:$0xff] }
  0x3d   : > { %v495_v43 = vadd.f32 %v411_v4, %v390_v2  ;;  %v496_v34 = vadd.f32 %v412_v7, %v391_v3  ;;  %v505_v35 = vadd.f32 %v444_v59, %v423_v9  ;;  %v506_v37 = vadd.f32 %v445_v60, %v424_v58 }
  0x3e   : > { %v567_v31 = vmax.f32 %v557_v45, 0.0  ;;  %v568_v46 = vmax.f32 %v558_v11, 0.0  ;;  %v515_v48 = vadd.f32 %v485_v14, %v475_v22  ;;  %v516_v24 = vadd.f32 %v486_v30, %v476_v8  ;;  %v459_v45 = vld [vmem:[#allocation2 + $0x4e] sm:$0xff] }
  0x3f   : > { %v319_v44 = vmul.f32 %v846_v10, %v308_v23  ;;  %v525_v33 = vadd.f32 %v505_v35, %v495_v43  ;;  %v526_v41 = vadd.f32 %v506_v37, %v496_v34  ;;  %v320_v42 = vmul.f32 %v846_v10, %v309_v61 }
  0x40   : > { %v577_v25 = vmin.f32 %v567_v31, 6.0  ;;  %v578_v51 = vmin.f32 %v568_v46, 6.0  ;;  %v340_v52 = vmul.f32 %v848_v12, %v329_v39  ;;  %v341_v53 = vmul.f32 %v848_v12, %v330_v40 }
  0x41   : > { %v361_v54 = vmul.f32 %v850_v13, %v880_v38  ;;  %v535_v56 = vadd.f32 %v525_v33, %v515_v48  ;;  %v536_v57 = vadd.f32 %v526_v41, %v516_v24  ;;  %v362_v62 = vmul.f32 %v850_v13, %v351_v32  ;;  %v654_v33 = vld [vmem:[%s1020_s14 + $0x20] sm:$0xff] }
  0x42   : > { %v373_v63 = vmul.f32 %v853_v15, %v351_v32  ;;  %v587_v10 = vpack.c.bf16 %v578_v51, %v577_v25  ;;  %v374_v2 = vmul.f32 %v853_v15, %v905_v6  ;;  %v394_v3 = vmul.f32 %v855_v16, %v383_v36 }
  0x43   : > { %v395_v12 = vmul.f32 %v855_v16, %v384_v50  ;;  %v545_v4 = vadd.f32 %v535_v56, %v465_v18  ;;  %v546_v5 = vadd.f32 %v536_v57, %v466_v19  ;;  %v415_v38 = vmul.f32 %v858_v20, %v891_v47  ;;  %v458_v18 = vld [vmem:[#allocation2 + $0x46] sm:$0xff] }
  0x44   : > { %v416_v27 = vmul.f32 %v858_v20, %v405_v55  ;;  %755 = vmatmul.msk.bf16.vlgmr.msra.gmra.mxu0 %vm286_vm1, %v587_v10  ;;  %v427_v13 = vmul.f32 %v867_v28, %v405_v55  ;;  %v428_v7 = vmul.f32 %v867_v28, %v911_v26  ;;  %v448_v15 = vmul.f32 %v869_v29, %v437_v0  ;;  %v655_v50 = vld [vmem:[%s1020_s14 + $0x28] sm:$0xff] }
  0x45   : > { %v449_v6 = vmul.f32 %v869_v29, %v438_v1  ;;  %v559_v16 = vadd.f32 %v923_v49, %v545_v4  ;;  %v560_v9 = vadd.f32 %v923_v49, %v546_v5  ;;  %v479_v58 = vadd.f32 %v340_v52, %v319_v44  ;;  %v659_v10 = vld [vmem:[%s1020_s14 + $0x48] sm:$0xff] }
  0x46   : > { %v480_v17 = vadd.f32 %v341_v53, %v320_v42  ;;  %v489_v47 = vadd.f32 %v373_v63, %v361_v54  ;;  %v490_v59 = vadd.f32 %v374_v2, %v362_v62  ;;  %v499_v19 = vadd.f32 %v415_v38, %v394_v3  ;;  %v658_v53 = vld [vmem:[%s1020_s14 + $0x40] sm:$0xff]  ;;  %v651_v4 = vld [vmem:[%s1020_s14 + $0x8] sm:$0xff]  ;;  %v652_v38 = vld [vmem:[%s1020_s14 + $0x10] sm:$0xff] }
  0x47   : > { %v569_v20 = vmax.f32 %v559_v16, 0.0  ;;  %v570_v60 = vmax.f32 %v560_v9, 0.0  ;;  %v500_v22 = vadd.f32 %v416_v27, %v395_v12  ;;  %v509_v8 = vadd.f32 %v448_v15, %v427_v13  ;;  %v650_v62 = vld [vmem:[%s1020_s14] sm:$0xff]  ;;  %v653_v16 = vld [vmem:[%s1020_s14 + $0x18] sm:$0xff] }
  0x48   : > { %v510_v28 = vadd.f32 %v449_v6, %v428_v7  ;;  %v519_v26 = vadd.f32 %v489_v47, %v479_v58  ;;  %v520_v23 = vadd.f32 %v490_v59, %v480_v17  ;;  %v469_v14 = vmul.f32 %v863_v21, %v458_v18  ;;  %v656_v47 = vld [vmem:[%s1020_s14 + $0x30] sm:$0xff]  ;;  %v657_v18 = vld [vmem:[%s1020_s14 + $0x38] sm:$0xff] }
  0x49   : > { %v579_v11 = vmin.f32 %v569_v20, 6.0  ;;  %v580_v29 = vmin.f32 %v570_v60, 6.0  ;;  %v470_v30 = vmul.f32 %v863_v21, %v459_v45  ;;  %v529_v43 = vadd.f32 %v509_v8, %v499_v19  ;;  %v777_v21 = vld [vmem:[%s1067_s4] ss:$0 sm:$0xff] }
  0x4a   : > { %v530_v61 = vadd.f32 %v510_v28, %v500_v22 }
  0x4b   : > { %v588_v31 = vpack.c.bf16 %v580_v29, %v579_v11  ;;  %v539_v34 = vadd.f32 %v529_v43, %v519_v26 }
  0x4c   : > { %v540_v35 = vadd.f32 %v530_v61, %v520_v23 }
  0x4d   : > { %756 = vmatmul.msk.bf16.vlgmr.msra.gmra.mxu1 %vm286_vm1, %v588_v31  ;;  %v549_v37 = vadd.f32 %v539_v34, %v469_v14 }
  0x4e   : > { %v550_v39 = vadd.f32 %v540_v35, %v470_v30 }
  0x4f   : > { %v563_v40 = vadd.f32 %v923_v49, %v549_v37 }
  0x50   : > { %v564_v46 = vadd.f32 %v923_v49, %v550_v39 }
  0x51   : > { %v573_v48 = vmax.f32 %v563_v40, 0.0 }
  0x52   : > { %v574_v24 = vmax.f32 %v564_v46, 0.0 }
  0x53   : > { %v583_v44 = vmin.f32 %v573_v48, 6.0 }
  0x54   : > { %v584_v32 = vmin.f32 %v574_v24, 6.0 }
  0x56   : > { %v590_v25 = vpack.c.bf16 %v584_v32, %v583_v44 }
  0x58   : > { %758 = vmatmul.msk.bf16.gmra.mxu2 %vm286_vm1, %v590_v25 }
  0xb3   : > { %v635_v49 = vpop.f32.mrf.mxu2 }
  0xb4   : > { %v636_v41 = vadd.f32 %v777_v21, %v635_v49 }
  0xb6   : > { %v664_v42 = vadd.f32 %v654_v33, %v636_v41 }
  0xb8   : > { %674 = vst.msk [vmem:[%s1029_s19 + $0x20] sm:$0xff] %vm286_vm1, %v664_v42 }
  0xbb   : > { %v637_v36 = vpop.f32.mrf.mxu2 }
  0xbc   : > { %v638_v51 = vadd.f32 %v777_v21, %v637_v36  ;;  %v645_v52 = vpop.f32.mrf.mxu3 }
  0xbd   : > { %v646_v54 = vadd.f32 %v777_v21, %v645_v52 }
  0xbe   : > { %v665_v55 = vadd.f32 %v655_v50, %v638_v51 }
  0xbf   : > { %v668_v56 = vadd.f32 %v658_v53, %v646_v54 }
  0xc0   : > { %675 = vst.msk [vmem:[%s1029_s19 + $0x28] sm:$0xff] %vm286_vm1, %v665_v55 }
  0xc1   : > { %v625_v57 = vpop.f32.mrf.mxu0  ;;  %678 = vst.msk [vmem:[%s1029_s19 + $0x40] sm:$0xff] %vm286_vm1, %v668_v56 }
  0xc2   : > { %v626_v63 = vadd.f32 %v777_v21, %v625_v57 }
  0xc4   : > { %v660_v0 = vadd.f32 %v650_v62, %v626_v63  ;;  %v647_v1 = vpop.f32.mrf.mxu3 }
  0xc5   : > { %v648_v2 = vadd.f32 %v777_v21, %v647_v1 }
  0xc6   : > { %670 = vst.msk [vmem:[%s1029_s19] sm:$0xff] %vm286_vm1, %v660_v0 }
  0xc7   : > { %v669_v3 = vadd.f32 %v659_v10, %v648_v2 }
  0xc9   : > { %v627_v12 = vpop.f32.mrf.mxu0  ;;  %679 = vst.msk [vmem:[%s1029_s19 + $0x48] sm:$0xff] %vm286_vm1, %v669_v3 }
  0xca   : > { %v630_v5 = vpop.f32.mrf.mxu1  ;;  %v628_v27 = vadd.f32 %v777_v21, %v627_v12 }
  0xcb   : > { %v631_v13 = vadd.f32 %v777_v21, %v630_v5 }
  0xcc   : > { %v661_v7 = vadd.f32 %v651_v4, %v628_v27 }
  0xcd   : > { %v662_v15 = vadd.f32 %v652_v38, %v631_v13 }
  0xce   : > { %671 = vst.msk [vmem:[%s1029_s19 + $0x8] sm:$0xff] %vm286_vm1, %v661_v7 }
  0xcf   : > { %672 = vst.msk [vmem:[%s1029_s19 + $0x10] sm:$0xff] %vm286_vm1, %v662_v15 }
  0xd2   : > { %v632_v6 = vpop.f32.mrf.mxu1 }
  0xd3   : > { %v633_v9 = vadd.f32 %v777_v21, %v632_v6 }
  0xd5   : > { %v663_v58 = vadd.f32 %v653_v16, %v633_v9 }
  0xd7   : > { %673 = vst.msk [vmem:[%s1029_s19 + $0x18] sm:$0xff] %vm286_vm1, %v663_v58 }
  0xdb   : > { %v640_v17 = vpop.f32.mrf.mxu2 }
  0xdc   : > { %v641_v59 = vadd.f32 %v777_v21, %v640_v17 }
  0xde   : > { %v666_v20 = vadd.f32 %v656_v47, %v641_v59 }
  0xe0   : > { %676 = vst.msk [vmem:[%s1029_s19 + $0x30] sm:$0xff] %vm286_vm1, %v666_v20 }
  0xe3   : > { %v642_v60 = vpop.f32.mrf.mxu2 }
  0xe4   : > { %v643_v45 = vadd.f32 %v777_v21, %v642_v60 }
  0xe6   : > { %v667_v19 = vadd.f32 %v657_v18, %v643_v45 }
  0xe8   : > { %677 = vst.msk [vmem:[%s1029_s19 + $0x38] sm:$0xff] %vm286_vm1, %v667_v19 }
  0xe9 PF: > { %s16_s21 = sadd.s32 1, %s784_s21  }
  0xea   : > { %p13_p4 = scmp.ge.s32.totalorder %s16_s21, 4  }
  0xec   :  { %15 = sbr.rel (!%p13_p4) target bundleno = 1 (0x1), region = 77 }

// kernel: _lambda_.6
= control target key start
LH: loop header
LB: loop body
LE: loop exit
PB: predicated region body
PF: predicated region fallthrough
CT: control target
= control target key end

     0   :  { %s1150_s25 = smov 0   ;;  %s1336_s0 = inlined_call_operand.vmem [shape: f32[2,104,8], index: 0, kind: input, shape index: {}]   ;;  %s1337_s1 = inlined_call_operand.vmem [shape: f32[104,1], index: 1, kind: input, shape index: {}]   ;;  %s1338_s2 = inlined_call_operand.vmem [shape: f32[20,1], index: 2, kind: input, shape index: {}]   ;;  %s1339_s3 = inlined_call_operand.vmem [shape: bf16[8,16], index: 3, kind: input, shape index: {}]   ;;  %s1340_s4 = inlined_call_operand.vmem [shape: f32[1,16], index: 4, kind: input, shape index: {}]   ;;  %s1341_s5 = inlined_call_operand.vmem [shape: f32[9,16], index: 5, kind: input, shape index: {}]   ;;  %s1342_s6 = inlined_call_operand.vmem [shape: f32[1,16], index: 6, kind: input, shape index: {}]   ;;  %s1343_s7 = inlined_call_operand.vmem [shape: f32[16,8], index: 7, kind: input, shape index: {}]   ;;  %s1344_s8 = inlined_call_operand.vmem [shape: f32[1,8], index: 8, kind: input, shape index: {}]   ;;  %s1345_s9 = inlined_call_operand.vmem [shape: f32[8,16], index: 9, kind: input, shape index: {}]   ;;  %s1346_s10 = inlined_call_operand.vmem [shape: f32[1,16], index: 10, kind: input, shape index: {}]   ;;  %s1347_s11 = inlined_call_operand.vmem [shape: bf16[16,16], index: 11, kind: input, shape index: {}]   ;;  %s1348_s12 = inlined_call_operand.vmem [shape: f32[1,16], index: 12, kind: input, shape index: {}]   ;;  %s1349_s13 = inlined_call_operand.vmem [shape: f32[2,20,16], index: 13, kind: output, shape index: {}]  }
   0x1 LB: > { %s1022_s26 = sadd.s32 4294967295, %s1077_s25   ;;  %p1026_p0 = scmp.ge.s32.totalorder %s1077_s25, 1  ;;  %s1077_s25 = sphi %s1150_s25, %s23_s25  }
   0x2   : > { %p387_p1 = scmp.lt.s32.totalorder %s1077_s25, 3 }
   0x4   : > { %p388_p2 = pnand %p1026_p0, %p387_p1 }
   0x5   : > { %p431_p3 = scmp.lt.s32.totalorder (!%p388_p2), %s1022_s26, 1 }
   0x6   : > { %391 = sbr.rel (%p388_p2) target bundleno = 706 (0x2c2), region = 72 }
   0xb   : > { %v462_v0 = vld [vmem:[%s1339_s3] sm:$0xf]  ;;  %vm489_vm0 = vcmask 1043456   ;;  %v1079_v3 = vmov 0   ;;  %v603_v4 = vld [vmem:[%s1337_s1 + $0x10] sm:$0xff]  ;;  %s1351_s26 = smov (!%p431_p3, %s1022_s26), 1 }
   0xc   : > { %v601_v1 = vld [vmem:[%s1337_s1] sm:$0xff]  ;;  %v491_v2 = vsel %vm489_vm0, %v462_v0, 0  ;;  %1060 = vset.pattern.permute.xlu0 %v1079_v3  ;;  %1061 = vset.pattern.permute.xlu1 %v1079_v3  ;;  %s1049_s18 = smul.u32 104, %s1351_s26  ;;  %vm467_vm1 = vcmask 64512   ;;  %v602_v15 = vld [vmem:[%s1337_s1 + $0x8] sm:$0xff]  ;;  %v604_v16 = vld [vmem:[%s1337_s1 + $0x18] sm:$0xff] }
   0xd   : > { %500 = vmatpush.bf16.msra.mxu0 %v491_v2  ;;  %1047 = vmatpush.bf16.msra.mxu1 %v491_v2  ;;  %v605_v5 = vld [vmem:[%s1337_s1 + $0x20] sm:$0xff]  ;;  %v606_v17 = vld [vmem:[%s1337_s1 + $0x28] sm:$0xff]  ;;  %v607_v18 = vld [vmem:[%s1337_s1 + $0x30] sm:$0xff]  ;;  %vm692_vm2 = vcmask 130048   ;;  %vm841_vm3 = vcmask 125952   ;;  %s1050_s24 = smul.u32 24, %s1351_s26 }
   0xe   : > { %1048 = vmatpush.bf16.msra.mxu2 %v491_v2  ;;  %616 = vperm.xlu0 %1060, %v601_v1   ;;  %s1176_s21 = scalar_lea.vmem %s1336_s0, %s1049_s18  ;;  %v608_v19 = vld [vmem:[%s1337_s1 + $0x38] sm:$0xff]  ;;  %v609_v20 = vld [vmem:[%s1337_s1 + $0x40] sm:$0xff]  ;;  %v610_v29 = vld [vmem:[%s1337_s1 + $0x48] sm:$0xff] }
   0xf   : > { %626 = vperm.xlu1 %1061, %v603_v4   ;;  %1062 = vset.pattern.permute.xlu2 %v1079_v3  ;;  %v442_v6 = vld [vmem:[%s1176_s21] sm:$0xff]  ;;  %v443_v7 = vld [vmem:[%s1176_s21 + $0x8] sm:$0xff]  ;;  %v448_v8 = vld [vmem:[%s1176_s21 + $0x30] sm:$0xff]  ;;  %s440_s14 = scalar_lea.vmem %s1349_s13, %s1050_s24 }
  0x10   : > { %636 = vperm.xlu2 %1062, %v605_v5   ;;  %v455_v9 = vpack.c.bf16 %v443_v7, %v442_v6  ;;  %v449_v10 = vld [vmem:[%s1176_s21 + $0x38] sm:$0xff]  ;;  %v452_v11 = vld [vmem:[%s1176_s21 + $0x50] sm:$0xff]  ;;  %v450_v23 = vld [vmem:[%s1176_s21 + $0x40] sm:$0xff] }
  0x11   : > { %v453_v12 = vld [vmem:[%s1176_s21 + $0x58] sm:$0xff]  ;;  %v458_v13 = vpack.c.bf16 %v449_v10, %v448_v8  ;;  %v444_v21 = vld [vmem:[%s1176_s21 + $0x10] sm:$0xff]  ;;  %v451_v24 = vld [vmem:[%s1176_s21 + $0x48] sm:$0xff] }
  0x12   : > { %v460_v14 = vpack.c.bf16 %v453_v12, %v452_v11  ;;  %1029 = vmatmul.msk.bf16.vlgmr.msra.gmra.mxu0 %vm467_vm1, %v455_v9  ;;  %v445_v22 = vld [vmem:[%s1176_s21 + $0x18] sm:$0xff]  ;;  %v454_v25 = vld [vmem:[%s1176_s21 + $0x60] sm:$0xff]  ;;  %v459_v27 = vpack.c.bf16 %v451_v24, %v450_v23  ;;  %v611_v30 = vld [vmem:[%s1337_s1 + $0x50] sm:$0xff] }
  0x13   : > { %1032 = vmatmul.msk.bf16.vlgmr.msra.gmra.mxu1 %vm467_vm1, %v458_v13  ;;  %v456_v26 = vpack.c.bf16 %v445_v22, %v444_v21  ;;  %v461_v28 = vpack.c.bf16 %v454_v25, %v454_v25  ;;  %v612_v31 = vld [vmem:[%s1337_s1 + $0x58] sm:$0xff]  ;;  %v817_v32 = vld [vmem:[%s1338_s2] sm:$0xff]  ;;  %v818_v33 = vld [vmem:[%s1338_s2 + $0x8] sm:$0xff] }
  0x14   : > { %1034 = vmatmul.msk.bf16.vlgmr.msra.gmra.mxu2 %vm467_vm1, %v460_v14  ;;  %v819_v34 = vld [vmem:[%s1338_s2 + $0x10] sm:$0xf]  ;;  %v446_v35 = vld [vmem:[%s1176_s21 + $0x20] sm:$0xff]  ;;  %v447_v36 = vld [vmem:[%s1176_s21 + $0x28] sm:$0xff] }
  0x15   : > { %v457_v37 = vpack.c.bf16 %v447_v36, %v446_v35  ;;  %v613_v38 = vld [vmem:[%s1337_s1 + $0x60] sm:$0xff] }
  0x16   : > { %621 = vperm.xlu0 %1060, %v602_v15   ;;  %v1244_v43 = vld [vmem:[%s1340_s4] ss:$0 sm:$0xff] }
  0x17   : > { %631 = vperm.xlu1 %1061, %v604_v16  }
  0x18   : > { %641 = vperm.xlu2 %1062, %v606_v17  }
  0x1e   : > { %646 = vperm.xlu0 %1060, %v607_v18  }
  0x1f   : > { %651 = vperm.xlu1 %1061, %v608_v19  }
  0x20   : > { %656 = vperm.xlu2 %1062, %v609_v20  }
  0x22   : > { %1030 = vmatmul.msk.bf16.gmra.mxu0 %vm467_vm1, %v456_v26 }
  0x23   : > { %1033 = vmatmul.msk.bf16.gmra.mxu1 %vm467_vm1, %v459_v27 }
  0x24   : > { %1035 = vmatmul.msk.bf16.gmra.mxu2 %vm467_vm1, %v461_v28 }
  0x26   : > { %661 = vperm.xlu0 %1060, %v610_v29  }
  0x27   : > { %666 = vperm.xlu1 %1061, %v611_v30  }
  0x28   : > { %671 = vperm.xlu2 %1062, %v612_v31  }
  0x2e   : > { %822 = vperm.xlu0 %1060, %v817_v32  }
  0x2f   : > { %827 = vperm.xlu1 %1061, %v818_v33  }
  0x30   : > { %832 = vperm.xlu2 %1062, %v819_v34  }
  0x32   : > { %1031 = vmatmul.msk.bf16.gmra.mxu0 %vm467_vm1, %v457_v37 }
  0x36   : > { %676 = vperm.xlu0 %1060, %v613_v38  }
  0x6a   : > { %v1239_v42 = vpop.permute.xlu2 %636 }
  0x72   : > { %v1250_v55 = vpop.permute.xlu2 %641 }
  0x7a   : > { %v657_v21 = vpop.permute.xlu2 %656 }
  0x80   : > { %v617_v39 = vpop.permute.xlu0 %616 }
  0x81   : > { %v1237_v40 = vpop.permute.xlu1 %626 }
  0x88   : > { %v622_v41 = vpop.permute.xlu0 %621 }
  0x89   : > { %v1246_v44 = vpop.permute.xlu1 %631 }
  0x8f   : > { %v502_v45 = vpop.f32.mrf.mxu0 }
  0x90   : > { %v503_v46 = vadd.f32 %v1244_v43, %v502_v45  ;;  %v517_v47 = vpop.f32.mrf.mxu1  ;;  %v647_v52 = vpop.permute.xlu0 %646 }
  0x91   : > { %v518_v48 = vadd.f32 %v1244_v43, %v517_v47  ;;  %v652_v63 = vpop.permute.xlu1 %651  ;;  %v852_v47 = vld [vmem:[%s1343_s7 + $0x8] sm:$0xff] }
  0x92   : > { %v536_v49 = vadd.f32 3.0, %v503_v46  ;;  %871 = vmatpush.msrb.mxu1 %v852_v47 }
  0x93   : > { %v542_v50 = vadd.f32 3.0, %v518_v48 }
  0x94   : > { %v549_v51 = vmax.f32 %v536_v49, 0.0 }
  0x95   : > { %v555_v53 = vmax.f32 %v542_v50, 0.0 }
  0x96   : > { %v562_v54 = vmin.f32 %v549_v51, 6.0 }
  0x97   : > { %v527_v56 = vpop.f32.mrf.mxu2  ;;  %v568_v57 = vmin.f32 %v555_v53, 6.0  ;;  %v504_v59 = vpop.f32.mrf.mxu0 }
  0x98   : > { %v528_v58 = vadd.f32 %v1244_v43, %v527_v56  ;;  %v575_v60 = vmul.f32 %v562_v54, %v503_v46  ;;  %v505_v61 = vadd.f32 %v1244_v43, %v504_v59  ;;  %v519_v62 = vpop.f32.mrf.mxu1  ;;  %v1256_v14 = vpop.permute.xlu0 %661 }
  0x99   : > { %v581_v0 = vmul.f32 %v568_v57, %v518_v48  ;;  %v520_v2 = vadd.f32 %v1244_v43, %v519_v62  ;;  %v667_v30 = vpop.permute.xlu1 %666  ;;  %v851_v48 = vld [vmem:[%s1343_s7] sm:$0xff] }
  0x9a   : > { %v546_v1 = vadd.f32 3.0, %v528_v58  ;;  %v588_v3 = vmul.f32 0.16666667, %v575_v60  ;;  %v537_v4 = vadd.f32 3.0, %v505_v61  ;;  %872 = vmatpush.msrb.mxu1 %v851_v48  ;;  %v672_v60 = vpop.permute.xlu2 %671 }
  0x9b   : > { %v594_v5 = vmul.f32 0.16666667, %v581_v0  ;;  %v543_v7 = vadd.f32 3.0, %v520_v2 }
  0x9c   : > { %v559_v6 = vmax.f32 %v546_v1, 0.0  ;;  %v679_v8 = vmul.f32 %v617_v39, %v588_v3  ;;  %v550_v9 = vmax.f32 %v537_v4, 0.0 }
  0x9d   : > { %v685_v10 = vmul.f32 %v647_v52, %v594_v5  ;;  %v556_v12 = vmax.f32 %v543_v7, 0.0 }
  0x9e   : > { %v572_v11 = vmin.f32 %v559_v6, 6.0  ;;  %693 = vst.msk [vmem:[#allocation2] sm:$0xff] %vm692_vm2, %v679_v8  ;;  %v563_v13 = vmin.f32 %v550_v9, 6.0 }
  0x9f   : > { %v529_v15 = vpop.f32.mrf.mxu2  ;;  %699 = vst.msk [vmem:[#allocation2 + $0x30] sm:$0xff] %vm692_vm2, %v685_v10  ;;  %v569_v17 = vmin.f32 %v556_v12, 6.0  ;;  %v507_v19 = vpop.f32.mrf.mxu0 }
  0xa0   : > { %v585_v16 = vmul.f32 %v572_v11, %v528_v58  ;;  %v530_v18 = vadd.f32 %v1244_v43, %v529_v15  ;;  %v576_v20 = vmul.f32 %v563_v13, %v505_v61  ;;  %v508_v22 = vadd.f32 %v1244_v43, %v507_v19  ;;  %v522_v23 = vpop.f32.mrf.mxu1  ;;  %v1271_v52 = vpop.permute.xlu0 %822 }
  0xa1   : > { %v582_v24 = vmul.f32 %v569_v17, %v520_v2  ;;  %v523_v26 = vadd.f32 %v1244_v43, %v522_v23 }
  0xa2   : > { %v547_v25 = vadd.f32 3.0, %v530_v18  ;;  %v598_v27 = vmul.f32 0.16666667, %v585_v16  ;;  %v589_v28 = vmul.f32 0.16666667, %v576_v20  ;;  %v538_v29 = vadd.f32 3.0, %v508_v22 }
  0xa3   : > { %v595_v31 = vmul.f32 0.16666667, %v582_v24  ;;  %v544_v33 = vadd.f32 3.0, %v523_v26 }
  0xa4   : > { %v560_v32 = vmax.f32 %v547_v25, 0.0  ;;  %v689_v34 = vmul.f32 %v667_v30, %v598_v27  ;;  %v680_v35 = vmul.f32 %v622_v41, %v589_v28  ;;  %v551_v36 = vmax.f32 %v538_v29, 0.0 }
  0xa5   : > { %v686_v37 = vmul.f32 %v652_v63, %v595_v31  ;;  %v557_v39 = vmax.f32 %v544_v33, 0.0 }
  0xa6   : > { %v573_v38 = vmin.f32 %v560_v32, 6.0  ;;  %703 = vst.msk [vmem:[#allocation2 + $0x50] sm:$0xff] %vm692_vm2, %v689_v34  ;;  %v564_v45 = vmin.f32 %v551_v36, 6.0 }
  0xa7   : > { %694 = vst.msk [vmem:[#allocation2 + $0x8] sm:$0xff] %vm692_vm2, %v680_v35  ;;  %v532_v46 = vpop.f32.mrf.mxu2  ;;  %v570_v49 = vmin.f32 %v557_v39, 6.0  ;;  %v509_v50 = vpop.f32.mrf.mxu0 }
  0xa8   : > { %700 = vst.msk [vmem:[#allocation2 + $0x38] sm:$0xff] %vm692_vm2, %v686_v37  ;;  %v586_v41 = vmul.f32 %v573_v38, %v530_v18  ;;  %v577_v51 = vmul.f32 %v564_v45, %v508_v22  ;;  %v510_v53 = vadd.f32 %v1244_v43, %v509_v50  ;;  %v524_v54 = vpop.f32.mrf.mxu1  ;;  %v677_v13 = vpop.permute.xlu0 %676 }
  0xa9   : > { %v583_v56 = vmul.f32 %v570_v49, %v523_v26  ;;  %v525_v58 = vadd.f32 %v1244_v43, %v524_v54 }
  0xaa   : > { %v599_v57 = vmul.f32 0.16666667, %v586_v41  ;;  %v590_v59 = vmul.f32 0.16666667, %v577_v51  ;;  %v539_v61 = vadd.f32 3.0, %v510_v53 }
  0xab   : > { %v596_v62 = vmul.f32 0.16666667, %v583_v56  ;;  %v545_v0 = vadd.f32 3.0, %v525_v58 }
  0xac   : > { %v690_v63 = vmul.f32 %v672_v60, %v599_v57  ;;  %v681_v1 = vmul.f32 %v1237_v40, %v590_v59  ;;  %v552_v2 = vmax.f32 %v539_v61, 0.0 }
  0xad   : > { %v687_v3 = vmul.f32 %v657_v21, %v596_v62  ;;  %v558_v4 = vmax.f32 %v545_v0, 0.0 }
  0xae   : > { %704 = vst.msk [vmem:[#allocation2 + $0x58] sm:$0xff] %vm692_vm2, %v690_v63  ;;  %v565_v5 = vmin.f32 %v552_v2, 6.0  ;;  %v722_v31 = vld [vmem:[#allocation2 + $0x1] sm:$0xff] }
  0xaf   : > { %695 = vst.msk [vmem:[#allocation2 + $0x10] sm:$0xff] %vm692_vm2, %v681_v1  ;;  %v534_v6 = vpop.f32.mrf.mxu2  ;;  %v571_v7 = vmin.f32 %v558_v4, 6.0  ;;  %v512_v8 = vpop.f32.mrf.mxu0  ;;  %v729_v32 = vld [vmem:[#allocation2 + $0x32] sm:$0xff]  ;;  %v750_v45 = vld [vmem:[#allocation2 + $0x5] sm:$0xff] }
  0xb0   : > { %701 = vst.msk [vmem:[#allocation2 + $0x40] sm:$0xff] %vm692_vm2, %v687_v3  ;;  %v578_v9 = vmul.f32 %v565_v5, %v510_v53  ;;  %v513_v10 = vadd.f32 %v1244_v43, %v512_v8  ;;  %v743_v39 = vld [vmem:[#allocation2 + $0x33] sm:$0xff]  ;;  %v709_v4 = vld [vmem:[#allocation2 + $0x8] sm:$0xff] }
  0xb1   : > { %v584_v11 = vmul.f32 %v571_v7, %v525_v58  ;;  %v764_v8 = vld [vmem:[#allocation2 + $0x6] sm:$0xff] }
  0xb2   : > { %v591_v12 = vmul.f32 0.16666667, %v578_v9  ;;  %v540_v40 = vadd.f32 3.0, %v513_v10 }
  0xb3   : > { %v597_v15 = vmul.f32 0.16666667, %v584_v11 }
  0xb4   : > { %v682_v16 = vmul.f32 %v1246_v44, %v591_v12  ;;  %v553_v17 = vmax.f32 %v540_v40, 0.0 }
  0xb5   : > { %v688_v18 = vmul.f32 %v1256_v14, %v597_v15  ;;  %v706_v14 = vld [vmem:[%s1341_s5] sm:$0xff]  ;;  %v737_v60 = vld [vmem:[#allocation2 + $0x53] sm:$0xff]  ;;  %v738_v7 = vld [vmem:[#allocation2 + $0x5b] sm:$0xf] }
  0xb6   : > { %696 = vst.msk [vmem:[#allocation2 + $0x18] sm:$0xff] %vm692_vm2, %v682_v16  ;;  %v566_v19 = vmin.f32 %v553_v17, 6.0  ;;  %v725_v28 = vperm.slane %v706_v14, 2  ;;  %v732_v29 = vperm.slane %v706_v14, 3  ;;  %v711_v30 = vperm.slane %v706_v14, 0  ;;  %v723_v54 = vld [vmem:[#allocation2 + $0x9] sm:$0xff] }
  0xb7   : > { %702 = vst.msk [vmem:[#allocation2 + $0x48] sm:$0xff] %vm692_vm2, %v688_v18  ;;  %v514_v20 = vpop.f32.mrf.mxu0  ;;  %v1290_v34 = vperm.slane %v706_v14, 6  ;;  %v718_v36 = vperm.slane %v706_v14, 1  ;;  %v739_v37 = vperm.slane %v706_v14, 4  ;;  %v760_v38 = vperm.slane %v706_v14, 7  ;;  %v730_v56 = vld [vmem:[#allocation2 + $0x3a] sm:$0xff] }
  0xb8   : > { %v579_v21 = vmul.f32 %v566_v19, %v513_v10  ;;  %v515_v22 = vadd.f32 %v1244_v43, %v514_v20  ;;  %v746_v43 = vperm.slane %v706_v14, 5  ;;  %v726_v47 = vmul.f32 %v725_v28, %v722_v31  ;;  %v724_v61 = vld [vmem:[#allocation2 + $0x11] sm:$0xf]  ;;  %v731_v62 = vld [vmem:[#allocation2 + $0x42] sm:$0xf] }
  0xb9   : > { %v733_v48 = vmul.f32 %v732_v29, %v729_v32  ;;  %v754_v58 = vmul.f32 %v1290_v34, %v750_v45  ;;  %v744_v63 = vld [vmem:[#allocation2 + $0x3b] sm:$0xff]  ;;  %v727_v5 = vmul.f32 %v725_v28, %v723_v54  ;;  %v734_v6 = vmul.f32 %v732_v29, %v730_v56  ;;  %v710_v9 = vld [vmem:[#allocation2 + $0x10] sm:$0xf]  ;;  %v745_v10 = vld [vmem:[#allocation2 + $0x43] sm:$0xf] }
  0xba   : > { %v592_v23 = vmul.f32 0.16666667, %v579_v21  ;;  %v541_v24 = vadd.f32 3.0, %v515_v22  ;;  %v747_v57 = vmul.f32 %v746_v43, %v743_v39  ;;  %v751_v11 = vld [vmem:[#allocation2 + $0xd] sm:$0xff]  ;;  %v728_v40 = vmul.f32 %v725_v28, %v724_v61 }
  0xbb   : > { %v774_v1 = vadd.f32 %v733_v48, %v726_v47  ;;  %v735_v15 = vmul.f32 %v732_v29, %v731_v62  ;;  %v741_v16 = vmul.f32 %v739_v37, %v737_v60  ;;  %v748_v17 = vmul.f32 %v746_v43, %v744_v63 }
  0xbc   : > { %v683_v25 = vmul.f32 %v1239_v42, %v592_v23  ;;  %v554_v26 = vmax.f32 %v541_v24, 0.0  ;;  %v708_v42 = vld [vmem:[#allocation2] sm:$0xff]  ;;  %v713_v18 = vmul.f32 %v711_v30, %v709_v4  ;;  %v742_v19 = vmul.f32 %v739_v37, %v738_v7 }
  0xbd   : > { %v712_v49 = vmul.f32 %v711_v30, %v708_v42  ;;  %v752_v20 = vld [vmem:[#allocation2 + $0x15] sm:$0xf]  ;;  %v1065_v23 = vld [vmem:[%s1342_s6] ss:$0 sm:$0xff]  ;;  %v714_v24 = vmul.f32 %v711_v30, %v710_v9  ;;  %v755_v14 = vmul.f32 %v1290_v34, %v751_v11  ;;  %v775_v28 = vadd.f32 %v734_v6, %v727_v5 }
  0xbe   : > { %697 = vst.msk [vmem:[#allocation2 + $0x20] sm:$0xff] %vm692_vm2, %v683_v25  ;;  %v567_v44 = vmin.f32 %v554_v26, 6.0  ;;  %v736_v33 = vld [vmem:[#allocation2 + $0x4b] sm:$0xff]  ;;  %v756_v42 = vmul.f32 %v1290_v34, %v752_v20  ;;  %v776_v39 = vadd.f32 %v735_v15, %v728_v40  ;;  %v778_v45 = vadd.f32 %v748_v17, %v741_v16  ;;  %v833_v15 = vpop.permute.xlu2 %832 }
  0xbf   : > { %v740_v41 = vmul.f32 %v739_v37, %v736_v33 }
  0xc0   : > { %v580_v27 = vmul.f32 %v567_v44, %v515_v22  ;;  %v749_v44 = vmul.f32 %v746_v43, %v745_v10 }
  0xc1   : > { %v777_v2 = vadd.f32 %v747_v57, %v740_v41  ;;  %v765_v41 = vld [vmem:[#allocation2 + $0xe] sm:$0xff] }
  0xc2   : > { %v593_v35 = vmul.f32 0.16666667, %v580_v27  ;;  %v779_v43 = vadd.f32 %v749_v44, %v742_v19 }
  0xc4   : > { %v684_v46 = vmul.f32 %v1250_v55, %v593_v35  ;;  %v1064_v55 = vld [vmem:[%s1341_s5 + $0x8] ss:$0 sm:$0xff] }
  0xc5   : > { %v715_v50 = vld [vmem:[#allocation2 + $0x19] sm:$0xff]  ;;  %v768_v21 = vmul.f32 %v1064_v55, %v764_v8  ;;  %v769_v57 = vmul.f32 %v1064_v55, %v765_v41 }
  0xc6   : > { %v757_v51 = vld [vmem:[#allocation2 + $0x1e] sm:$0xff]  ;;  %698 = vst.msk [vmem:[#allocation2 + $0x28] sm:$0xff] %vm692_vm2, %v684_v46  ;;  %v719_v53 = vmul.f32 %v718_v36, %v715_v50  ;;  %v766_v50 = vld [vmem:[#allocation2 + $0x16] sm:$0xf] }
  0xc7   : > { %v761_v59 = vmul.f32 %v760_v38, %v757_v51  ;;  %v770_v34 = vmul.f32 %v1064_v55, %v766_v50 }
  0xc8   : > { %v771_v0 = vadd.f32 %v719_v53, %v712_v49 }
  0xc9   : > { %v780_v3 = vadd.f32 %v761_v59, %v754_v58 }
  0xca   : > { %v783_v12 = vadd.f32 %v774_v1, %v771_v0  ;;  %v878_v1 = vld [vmem:[%s1345_s9] sm:$0xff] }
  0xcb   : > { %v786_v13 = vadd.f32 %v780_v3, %v777_v2  ;;  %898 = vmatpush.msrb.mxu2 %v878_v1 }
  0xcd   : > { %v789_v22 = vadd.f32 %v786_v13, %v783_v12  ;;  %v716_v25 = vld [vmem:[#allocation2 + $0x21] sm:$0xff]  ;;  %v717_v26 = vld [vmem:[#allocation2 + $0x29] sm:$0xf]  ;;  %v759_v32 = vld [vmem:[#allocation2 + $0x2e] sm:$0xf]  ;;  %v828_v13 = vpop.permute.xlu1 %827 }
  0xce   : > { %v758_v27 = vld [vmem:[#allocation2 + $0x26] sm:$0xff]  ;;  %v720_v29 = vmul.f32 %v718_v36, %v716_v25  ;;  %v721_v31 = vmul.f32 %v718_v36, %v717_v26  ;;  %v763_v37 = vmul.f32 %v760_v38, %v759_v32 }
  0xcf   : > { %v762_v33 = vmul.f32 %v760_v38, %v758_v27  ;;  %v792_v35 = vadd.f32 %v789_v22, %v768_v21  ;;  %v853_v27 = vld [vmem:[%s1344_s8] sm:$0x1] }
  0xd0   : > { %v772_v46 = vadd.f32 %v720_v29, %v713_v18  ;;  %v773_v47 = vadd.f32 %v721_v31, %v714_v24  ;;  %v782_v49 = vadd.f32 %v763_v37, %v756_v42  ;;  %v1046_v32 = vld [vmem:[%s1347_s11] sm:$0xff] }
  0xd1   : > { %v781_v30 = vadd.f32 %v762_v33, %v755_v14  ;;  %v799_v48 = vadd.f32 %v1065_v23, %v792_v35  ;;  %953 = vmatpush.bf16.msra.mxu3 %v1046_v32  ;;  %v879_v33 = vld [vmem:[%s1346_s10] sm:$0x1] }
  0xd2   : > { %v784_v51 = vadd.f32 %v775_v28, %v772_v46  ;;  %v785_v53 = vadd.f32 %v776_v39, %v773_v47  ;;  %v788_v56 = vadd.f32 %v782_v49, %v779_v43 }
  0xd3   : > { %v787_v54 = vadd.f32 %v781_v30, %v778_v45  ;;  %v802_v36 = vadd.f32 3.0, %v799_v48 }
  0xd4   : > { %v791_v38 = vadd.f32 %v788_v56, %v785_v53 }
  0xd5   : > { %v790_v58 = vadd.f32 %v787_v54, %v784_v51  ;;  %v805_v59 = vmax.f32 %v802_v36, 0.0 }
  0xd6   : > { %v794_v62 = vadd.f32 %v791_v38, %v770_v34  ;;  %v1066_v38 = vld [vmem:[%s1348_s12] ss:$0 sm:$0xff] }
  0xd7   : > { %v793_v60 = vadd.f32 %v790_v58, %v769_v57  ;;  %v808_v61 = vmin.f32 %v805_v59, 6.0 }
  0xd8   : > { %v801_v0 = vadd.f32 %v1065_v23, %v794_v62 }
  0xd9   : > { %v800_v63 = vadd.f32 %v1065_v23, %v793_v60  ;;  %v811_v3 = vmul.f32 %v808_v61, %v799_v48 }
  0xda   : > { %v804_v4 = vadd.f32 3.0, %v801_v0 }
  0xdb   : > { %v803_v2 = vadd.f32 3.0, %v800_v63  ;;  %v814_v8 = vmul.f32 0.16666667, %v811_v3 }
  0xdc   : > { %v807_v6 = vmax.f32 %v804_v4, 0.0 }
  0xdd   : > { %v806_v5 = vmax.f32 %v803_v2, 0.0  ;;  %v835_v12 = vmul.f32 %v1271_v52, %v814_v8 }
  0xde   : > { %v810_v9 = vmin.f32 %v807_v6, 6.0 }
  0xdf   : > { %v809_v7 = vmin.f32 %v806_v5, 6.0  ;;  %v838_v18 = vsel %vm692_vm2, %v835_v12, 0.0 }
  0xe0   : > { %v813_v10 = vmul.f32 %v810_v9, %v801_v0 }
  0xe1   : > { %v812_v55 = vmul.f32 %v809_v7, %v800_v63 }
  0xe2   : > { %v816_v40 = vmul.f32 0.16666667, %v813_v10 }
  0xe3   : > { %v815_v11 = vmul.f32 0.16666667, %v812_v55 }
  0xe4   : > { %v837_v17 = vmul.f32 %v833_v15, %v816_v40 }
  0xe5   : > { %v836_v16 = vmul.f32 %v828_v13, %v815_v11 }
  0xe6   : > { %v842_v21 = vsel %vm841_vm3, %v837_v17, 0.0 }
  0xe7   : > { %v839_v19 = vsel %vm692_vm2, %v836_v16, 0.0 }
  0xe8   : > { %v840_v20 = vadd.f32 %v839_v19, %v838_v18 }
  0xea   : > { %v843_v22 = vadd.f32 %v842_v21, %v840_v20 }
  0xec   : > { %v844_v23 = vrot.slane %v843_v22, 4 }
  0xee   : > { %v845_v24 = vadd.f32 %v844_v23, %v843_v22 }
  0xf0   : > { %v846_v25 = vrot.slane %v845_v24, 2 }
  0xf2   : > { %v847_v26 = vadd.f32 %v846_v25, %v845_v24 }
  0xf4   : > { %v848_v44 = vrot.slane %v847_v26, 1 }
  0xf6   : > { %v849_v52 = vadd.f32 %v848_v44, %v847_v26 }
  0xf8   : > { %v850_v14 = vmul.f32 0.0625, %v849_v52 }
  0xfa   : > { %1036 = vmatmul.msk.f32.vlgmr.msrb.gmra.mxu1 %vm692_vm2, %v850_v14 }
 0x177   : > { %v874_v28 = vpop.f32.mrf.mxu1 }
 0x178   : > { %v875_v29 = vadd.f32 %v874_v28, %v853_v27 }
 0x17a   : > { %v877_v31 = vmax.f32 %v875_v29, 0.0 }
 0x17c   : > { %1037 = vmatmul.msk.f32.vlgmr.msrb.gmra.mxu2 %vm467_vm1, %v877_v31 }
 0x1ff   : > { %v900_v35 = vpop.f32.mrf.mxu2 }
 0x200   : > { %v901_v42 = vadd.f32 %v900_v35, %v879_v33 }
 0x202   : > { %v903_v37 = vsub.f32 0.0, %v901_v42 }
 0x204   : > { %v904_v39 = vmul.f32 1.442695, %v903_v37 }
 0x206   : > { %1067 = vpow2.f32 %v904_v39 }
 0x20c   : > { %v1068_v45 = vpop.eup %1067 }
 0x20d   : > { %v906_v46 = vadd.f32 1.0, %v1068_v45 }
 0x20f   : > { %1069 = vrcp.f32 %v906_v46  ;;  %v918_v41 = vand.u32 2147483648, %v906_v46  ;;  %v916_v49 = vand.u32 2147483647, %v906_v46  ;;  %vm912_vm5 = vweird.f32 %v906_v46 }
 0x211   : > { %v919_v51 = vor.u32 1.1754944e-38, %v918_v41  ;;  %vm917_vm7 = vcmp.eq.f32.partialorder %v916_v49, 8.507059e+37 }
 0x215   : > { %v1070_v47 = vpop.eup %1069 }
 0x216   : > { %v908_v30 = vmul.f32 %v1070_v47, %v906_v46  ;;  %vm913_vm4 = vweird.f32 %v1070_v47 }
 0x217   : > { %vm914_vm6 = vmor %vm912_vm5, %vm913_vm4 }
 0x218   : > { %v909_v48 = vsub.f32 1.0, %v908_v30 }
 0x21a   : > { %v910_v43 = vmul.f32 %v1070_v47, %v909_v48 }
 0x21c   : > { %v911_v50 = vadd.f32 %v1070_v47, %v910_v43 }
 0x21e   : > { %v915_v53 = vsel %vm914_vm6, %v1070_v47, %v911_v50 }
 0x21f   : > { %v920_v54 = vsel %vm917_vm7, %v919_v51, %v915_v53 }
 0x220   : > { %v922_v36 = vperm.slane %v920_v54, 0 }
 0x222   : > { %v923_v56 = vmul.f32 %v922_v36, %v814_v8  ;;  %v924_v57 = vmul.f32 %v922_v36, %v815_v11  ;;  %v925_v59 = vmul.f32 %v922_v36, %v816_v40 }
 0x224   : > { %v926_v58 = vpack.c.bf16 %v924_v57, %v923_v56  ;;  %v927_v34 = vpack.c.bf16 %v925_v59, %v925_v59 }
 0x226   : > { %1042 = vmatmul.msk.bf16.vlgmr.msra.gmra.mxu3 %vm692_vm2, %v926_v58 }
 0x236   : > { %1043 = vmatmul.msk.bf16.gmra.mxu3 %vm692_vm2, %v927_v34 }
 0x2a9   : > { %v955_v60 = vpop.f32.mrf.mxu3 }
 0x2aa   : > { %v956_v61 = vadd.f32 %v1066_v38, %v955_v60 }
 0x2ac   : > { %964 = vst.msk [vmem:[%s440_s14] sm:$0xff] %vm692_vm2, %v956_v61 }
 0x2b1   : > { %v957_v62 = vpop.f32.mrf.mxu3 }
 0x2b2   : > { %v958_v63 = vadd.f32 %v1066_v38, %v957_v62 }
 0x2b4   : > { %965 = vst.msk [vmem:[%s440_s14 + $0x8] sm:$0xff] %vm692_vm2, %v958_v63 }
 0x2b9   : > { %v960_v0 = vpop.f32.mrf.mxu3 }
 0x2ba   : > { %v961_v1 = vadd.f32 %v1066_v38, %v960_v0 }
 0x2bc   : > { %966 = vst.msk [vmem:[%s440_s14 + $0x10] sm:$0xf] %vm841_vm3, %v961_v1 }
 0x2c1   : > { %v962_v2 = vpop.f32.mrf.mxu3 }
 0x2c2 PF: > { %s23_s25 = sadd.s32 1, %s1077_s25  }
 0x2c3   : > { %p20_p4 = scmp.ge.s32.totalorder %s23_s25, 4  }
 0x2c5   :  { %22 = sbr.rel (!%p20_p4) target bundleno = 1 (0x1), region = 102 }

// kernel: _lambda_.7
= control target key start
LH: loop header
LB: loop body
LE: loop exit
PB: predicated region body
PF: predicated region fallthrough
CT: control target
= control target key end

     0   :  { %s1089_s29 = smov 0   ;;  %s1204_s0 = inlined_call_operand.vmem [shape: f32[2,40,16], index: 0, kind: input, shape index: {}]   ;;  %s1205_s1 = inlined_call_operand.vmem [shape: f32[40,1], index: 1, kind: input, shape index: {}]   ;;  %s1206_s2 = inlined_call_operand.vmem [shape: f32[24,1], index: 2, kind: input, shape index: {}]   ;;  %s1207_s3 = inlined_call_operand.vmem [shape: bf16[16,32], index: 3, kind: input, shape index: {}]   ;;  %s1208_s4 = inlined_call_operand.vmem [shape: f32[1,32], index: 4, kind: input, shape index: {}]   ;;  %s1209_s5 = inlined_call_operand.vmem [shape: f32[9,32], index: 5, kind: input, shape index: {}]   ;;  %s1210_s6 = inlined_call_operand.vmem [shape: f32[1,32], index: 6, kind: input, shape index: {}]   ;;  %s1211_s7 = inlined_call_operand.vmem [shape: f32[32,8], index: 7, kind: input, shape index: {}]   ;;  %s1212_s8 = inlined_call_operand.vmem [shape: f32[1,8], index: 8, kind: input, shape index: {}]   ;;  %s1213_s9 = inlined_call_operand.vmem [shape: f32[8,32], index: 9, kind: input, shape index: {}]   ;;  %s1214_s10 = inlined_call_operand.vmem [shape: f32[1,32], index: 10, kind: input, shape index: {}]   ;;  %s1215_s11 = inlined_call_operand.vmem [shape: bf16[32,16], index: 11, kind: input, shape index: {}]   ;;  %s1216_s12 = inlined_call_operand.vmem [shape: f32[1,16], index: 12, kind: input, shape index: {}]   ;;  %s1217_s13 = inlined_call_operand.vmem [shape: f32[2,24,16], index: 13, kind: input, shape index: {}]   ;;  %s1218_s14 = inlined_call_operand.vmem [shape: f32[2,24,16], index: 14, kind: output, shape index: {}]  }
   0x1 LB: > { %s948_s30 = sadd.s32 4294967295, %s1011_s29   ;;  %p952_p0 = scmp.ge.s32.totalorder %s1011_s29, 1  ;;  %s1011_s29 = sphi %s1089_s29, %s24_s29  }
   0x2   : > { %p422_p1 = scmp.lt.s32.totalorder %s1011_s29, 3 }
   0x4   : > { %p423_p2 = pnand %p952_p0, %p422_p1 }
   0x5   : > { %p473_p3 = scmp.lt.s32.totalorder (!%p423_p2), %s948_s30, 1 }
   0x6   : > { %426 = sbr.rel (%p423_p2) target bundleno = 677 (0x2a5), region = 76 }
   0xb   : > { %v977_v0 = vld [vmem:[%s1207_s3] sm:$0xff]  ;;  %v569_v1 = vld [vmem:[%s1205_s1 + $0x10] sm:$0xff]  ;;  %v1013_v3 = vmov 0   ;;  %s1220_s30 = smov (!%p473_p3, %s948_s30), 1  ;;  %vm509_vm0 = vcmask 130048   ;;  %v570_v10 = vld [vmem:[%s1205_s1 + $0x18] sm:$0xff] }
   0xc   : > { %v567_v2 = vld [vmem:[%s1205_s1] sm:$0xff]  ;;  %995 = vset.pattern.permute.xlu1 %v1013_v3  ;;  %994 = vset.pattern.permute.xlu0 %v1013_v3  ;;  %s983_s23 = smul.u32 40, %s1220_s30  ;;  %v568_v11 = vld [vmem:[%s1205_s1 + $0x8] sm:$0xff]  ;;  %v717_v13 = vld [vmem:[%s1206_s2 + $0x10] sm:$0xff]  ;;  %vm602_vm1 = vcmask 261120   ;;  %vm779_vm2 = vcmask 64512  }
   0xd   : > { %526 = vmatpush.bf16.msra.mxu0 %v977_v0  ;;  %980 = vmatpush.bf16.msra.mxu2 %v977_v0  ;;  %v571_v4 = vld [vmem:[%s1205_s1 + $0x20] sm:$0xff]  ;;  %v716_v14 = vld [vmem:[%s1206_s2 + $0x8] sm:$0xff]  ;;  %s984_s21 = smul.u32 24, %s1220_s30 }
   0xe   : > { %584 = vperm.xlu1 %995, %v569_v1   ;;  %574 = vperm.xlu0 %994, %v567_v2   ;;  %s477_s26 = scalar_lea.vmem %s1204_s0, %s983_s23  ;;  %v715_v12 = vld [vmem:[%s1206_s2] sm:$0xff] }
   0xf   : > { %996 = vset.pattern.permute.xlu2 %v1013_v3  ;;  %v489_v5 = vld [vmem:[%s477_s26] sm:$0xff]  ;;  %v490_v6 = vld [vmem:[%s477_s26 + $0x8] sm:$0xff]  ;;  %v491_v15 = vld [vmem:[%s477_s26 + $0x10] sm:$0xff]  ;;  %s482_s24 = scalar_lea.vmem %s1217_s13, %s984_s21  ;;  %s487_s15 = scalar_lea.vmem %s1218_s14, %s984_s21 }
  0x10   : > { %594 = vperm.xlu2 %996, %v571_v4   ;;  %v493_v7 = vld [vmem:[%s477_s26 + $0x20] sm:$0xff]  ;;  %v494_v8 = vpack.c.bf16 %v490_v6, %v489_v5  ;;  %v492_v16 = vld [vmem:[%s477_s26 + $0x18] sm:$0xff] }
  0x11   : > { %v496_v9 = vpack.c.bf16 %v493_v7, %v493_v7  ;;  %v495_v17 = vpack.c.bf16 %v492_v16, %v491_v15  ;;  %v997_v18 = vld [vmem:[%s1208_s4] ss:$0 sm:$0xff] }
  0x12   : > { %960 = vmatmul.msk.bf16.vlgmr.msra.gmra.mxu0 %vm509_vm0, %v494_v8  ;;  %v608_v61 = vld [vmem:[%s1209_s5] sm:$0xff] }
  0x13   : > { %962 = vmatmul.msk.bf16.vlgmr.msra.gmra.mxu2 %vm509_vm0, %v496_v9  ;;  %v620_v63 = vperm.slane %v608_v61, 1  ;;  %v627_v0 = vperm.slane %v608_v61, 2  ;;  %v634_v1 = vperm.slane %v608_v61, 3  ;;  %v613_v6 = vperm.slane %v608_v61, 0 }
  0x14   : > { %v641_v7 = vperm.slane %v608_v61, 4  ;;  %v646_v8 = vperm.slane %v608_v61, 5 }
  0x16   : > { %589 = vperm.xlu1 %995, %v570_v10   ;;  %579 = vperm.xlu0 %994, %v568_v11   ;;  %v653_v10 = vperm.slane %v608_v61, 6  ;;  %v1143_v11 = vperm.slane %v608_v61, 7 }
  0x18   : > { %720 = vperm.xlu2 %996, %v715_v12  }
  0x1e   : > { %730 = vperm.xlu1 %995, %v717_v13   ;;  %725 = vperm.xlu0 %994, %v716_v14  }
  0x22   : > { %961 = vmatmul.msk.bf16.gmra.mxu0 %vm509_vm0, %v495_v17 }
  0x6a   : > { %v595_v45 = vpop.permute.xlu2 %594 }
  0x80   : > { %v575_v27 = vpop.permute.xlu0 %574  ;;  %v585_v55 = vpop.permute.xlu1 %584 }
  0x88   : > { %v580_v44 = vpop.permute.xlu0 %579  ;;  %v590_v9 = vpop.permute.xlu1 %589 }
  0x8f   : > { %v528_v19 = vpop.f32.mrf.mxu0 }
  0x90   : > { %v529_v20 = vadd.f32 %v997_v18, %v528_v19 }
  0x92   : > { %v542_v21 = vadd.f32 3.0, %v529_v20 }
  0x94   : > { %v547_v22 = vmax.f32 %v542_v21, 0.0 }
  0x96   : > { %v538_v23 = vpop.f32.mrf.mxu2  ;;  %v552_v24 = vmin.f32 %v547_v22, 6.0 }
  0x97   : > { %v539_v25 = vadd.f32 %v997_v18, %v538_v23  ;;  %v530_v26 = vpop.f32.mrf.mxu0 }
  0x98   : > { %v557_v28 = vmul.f32 %v552_v24, %v529_v20  ;;  %v531_v29 = vadd.f32 %v997_v18, %v530_v26 }
  0x99   : > { %v546_v30 = vadd.f32 3.0, %v539_v25 }
  0x9a   : > { %v543_v31 = vadd.f32 3.0, %v531_v29  ;;  %v562_v32 = vmul.f32 0.16666667, %v557_v28 }
  0x9b   : > { %v551_v33 = vmax.f32 %v546_v30, 0.0 }
  0x9c   : > { %v548_v34 = vmax.f32 %v543_v31, 0.0  ;;  %v597_v35 = vmul.f32 %v575_v27, %v562_v32  ;;  %v998_v31 = vld [vmem:[%s1209_s5 + $0x8] ss:$0 sm:$0xff] }
  0x9d   : > { %v556_v36 = vmin.f32 %v551_v33, 6.0 }
  0x9e   : > { %v540_v37 = vpop.f32.mrf.mxu2  ;;  %v553_v38 = vmin.f32 %v548_v34, 6.0  ;;  %603 = vst.msk [vmem:[#allocation2] sm:$0xff] %vm602_vm1, %v597_v35 }
  0x9f   : > { %v561_v39 = vmul.f32 %v556_v36, %v539_v25  ;;  %v533_v40 = vpop.f32.mrf.mxu0 }
  0xa0   : > { %v558_v41 = vmul.f32 %v553_v38, %v531_v29  ;;  %v534_v42 = vadd.f32 %v997_v18, %v533_v40 }
  0xa1   : > { %v566_v43 = vmul.f32 0.16666667, %v561_v39 }
  0xa2   : > { %v544_v46 = vadd.f32 3.0, %v534_v42  ;;  %v563_v47 = vmul.f32 0.16666667, %v558_v41 }
  0xa3   : > { %v601_v48 = vmul.f32 %v595_v45, %v566_v43  ;;  %v999_v43 = vld [vmem:[%s1210_s6] ss:$0 sm:$0xff] }
  0xa4   : > { %v549_v49 = vmax.f32 %v544_v46, 0.0  ;;  %v598_v50 = vmul.f32 %v580_v44, %v563_v47 }
  0xa5   : > { %607 = vst.msk [vmem:[#allocation2 + $0x20] sm:$0xff] %vm602_vm1, %v601_v48  ;;  %v610_v13 = vld [vmem:[#allocation2] sm:$0xff] }
  0xa6   : > { %v554_v51 = vmin.f32 %v549_v49, 6.0  ;;  %604 = vst.msk [vmem:[#allocation2 + $0x8] sm:$0xff] %vm602_vm1, %v598_v50  ;;  %v614_v20 = vmul.f32 %v613_v6, %v610_v13 }
  0xa7   : > { %v535_v52 = vpop.f32.mrf.mxu0 }
  0xa8   : > { %v559_v53 = vmul.f32 %v554_v51, %v534_v42  ;;  %v536_v54 = vadd.f32 %v997_v18, %v535_v52 }
  0xaa   : > { %v564_v56 = vmul.f32 0.16666667, %v559_v53  ;;  %v545_v57 = vadd.f32 3.0, %v536_v54 }
  0xac   : > { %v599_v58 = vmul.f32 %v585_v55, %v564_v56  ;;  %v550_v59 = vmax.f32 %v545_v57, 0.0 }
  0xad   : > { %v617_v2 = vld [vmem:[#allocation2 + $0x1] sm:$0xff] }
  0xae   : > { %605 = vst.msk [vmem:[#allocation2 + $0x10] sm:$0xff] %vm602_vm1, %v599_v58  ;;  %v555_v60 = vmin.f32 %v550_v59, 6.0  ;;  %v624_v3 = vld [vmem:[#allocation2 + $0x2] sm:$0xff]  ;;  %v621_v16 = vmul.f32 %v620_v63, %v617_v2 }
  0xaf   : > { %v631_v4 = vld [vmem:[#allocation2 + $0x6] sm:$0xff]  ;;  %v628_v17 = vmul.f32 %v627_v0, %v624_v3 }
  0xb0   : > { %v560_v62 = vmul.f32 %v555_v60, %v536_v54  ;;  %v611_v12 = vld [vmem:[#allocation2 + $0x8] sm:$0xff]  ;;  %v635_v18 = vmul.f32 %v634_v1, %v631_v4  ;;  %v669_v29 = vadd.f32 %v621_v16, %v614_v20  ;;  %v748_v20 = vld [vmem:[%s1211_s7] sm:$0xff] }
  0xb1   : > { %v638_v14 = vld [vmem:[#allocation2 + $0x7] sm:$0xff]  ;;  %v647_v22 = vmul.f32 %v646_v8, %v611_v12  ;;  %v615_v39 = vmul.f32 %v613_v6, %v611_v12 }
  0xb2   : > { %v565_v5 = vmul.f32 0.16666667, %v560_v62  ;;  %v642_v21 = vmul.f32 %v641_v7, %v638_v14  ;;  %v672_v30 = vadd.f32 %v635_v18, %v628_v17 }
  0xb4   : > { %v600_v15 = vmul.f32 %v590_v9, %v565_v5  ;;  %v675_v37 = vadd.f32 %v647_v22, %v642_v21  ;;  %v681_v41 = vadd.f32 %v672_v30, %v669_v29 }
  0xb5   : > { %v618_v19 = vld [vmem:[#allocation2 + $0x9] sm:$0xff] }
  0xb6   : > { %606 = vst.msk [vmem:[#allocation2 + $0x18] sm:$0xff] %vm602_vm1, %v600_v15  ;;  %v650_v23 = vld [vmem:[#allocation2 + $0xc] sm:$0xff]  ;;  %v622_v33 = vmul.f32 %v620_v63, %v618_v19 }
  0xb7   : > { %v625_v24 = vld [vmem:[#allocation2 + $0xa] sm:$0xff]  ;;  %v654_v26 = vmul.f32 %v653_v10, %v650_v23 }
  0xb8   : > { %v632_v25 = vld [vmem:[#allocation2 + $0xe] sm:$0xff]  ;;  %v629_v34 = vmul.f32 %v627_v0, %v625_v24  ;;  %v670_v49 = vadd.f32 %v622_v33, %v615_v39 }
  0xb9   : > { %v657_v27 = vld [vmem:[#allocation2 + $0xd] sm:$0xff]  ;;  %v636_v35 = vmul.f32 %v634_v1, %v632_v25  ;;  %v666_v50 = vmul.f32 %v998_v31, %v632_v25 }
  0xba   : > { %v661_v28 = vmul.f32 %v1143_v11, %v657_v27  ;;  %v612_v32 = vld [vmem:[#allocation2 + $0x10] sm:$0xff] }
  0xbb   : > { %v639_v36 = vld [vmem:[#allocation2 + $0xf] sm:$0xff]  ;;  %v616_v40 = vmul.f32 %v613_v6, %v612_v32  ;;  %v648_v48 = vmul.f32 %v646_v8, %v612_v32  ;;  %v673_v56 = vadd.f32 %v636_v35, %v629_v34  ;;  %v777_v32 = vld [vmem:[%s1213_s9] sm:$0xff] }
  0xbc   : > { %v678_v38 = vadd.f32 %v661_v28, %v654_v26  ;;  %v643_v47 = vmul.f32 %v641_v7, %v639_v36  ;;  %798 = vmatpush.msrb.mxu2 %v777_v32 }
  0xbd   : > { %v619_v44 = vld [vmem:[#allocation2 + $0x11] sm:$0xff]  ;;  %v652_v62 = vld [vmem:[#allocation2 + $0x1c] sm:$0xff]  ;;  %v682_v14 = vadd.f32 %v673_v56, %v670_v49 }
  0xbe   : > { %v684_v42 = vadd.f32 %v678_v38, %v675_v37  ;;  %v626_v45 = vld [vmem:[#allocation2 + $0x12] sm:$0xff]  ;;  %v623_v51 = vmul.f32 %v620_v63, %v619_v44  ;;  %v659_v2 = vld [vmem:[#allocation2 + $0x1d] sm:$0xff]  ;;  %v656_v9 = vmul.f32 %v653_v10, %v652_v62 }
  0xbf   : > { %v633_v46 = vld [vmem:[#allocation2 + $0x16] sm:$0xff]  ;;  %v630_v52 = vmul.f32 %v627_v0, %v626_v45  ;;  %v664_v19 = vld [vmem:[#allocation2 + $0x1e] sm:$0xff] }
  0xc0   : > { %v637_v53 = vmul.f32 %v634_v1, %v633_v46  ;;  %v651_v54 = vld [vmem:[#allocation2 + $0x14] sm:$0xff]  ;;  %v687_v3 = vadd.f32 %v684_v42, %v681_v41  ;;  %v671_v4 = vadd.f32 %v623_v51, %v616_v40  ;;  %v676_v1 = vadd.f32 %v648_v48, %v643_v47  ;;  %v721_v42 = vpop.permute.xlu2 %720  ;;  %v726_v47 = vpop.permute.xlu0 %725 }
  0xc1   : > { %v658_v55 = vld [vmem:[#allocation2 + $0x15] sm:$0xff]  ;;  %v655_v58 = vmul.f32 %v653_v10, %v651_v54  ;;  %v667_v21 = vmul.f32 %v998_v31, %v633_v46  ;;  %v668_v25 = vmul.f32 %v998_v31, %v664_v19 }
  0xc2   : > { %v640_v57 = vld [vmem:[#allocation2 + $0x17] sm:$0xff]  ;;  %v662_v59 = vmul.f32 %v1143_v11, %v658_v55  ;;  %v674_v5 = vadd.f32 %v637_v53, %v630_v52  ;;  %v690_v13 = vadd.f32 %v687_v3, %v666_v50  ;;  %v731_v50 = vpop.permute.xlu1 %730 }
  0xc3   : > { %v644_v60 = vmul.f32 %v641_v7, %v640_v57  ;;  %v645_v61 = vld [vmem:[#allocation2 + $0x18] sm:$0xff]  ;;  %v750_v0 = vld [vmem:[%s1211_s7 + $0x10] sm:$0xff]  ;;  %v663_v7 = vmul.f32 %v1143_v11, %v659_v2  ;;  %v752_v2 = vld [vmem:[%s1212_s8] sm:$0x1] }
  0xc4   : > { %v649_v6 = vmul.f32 %v646_v8, %v645_v61  ;;  %v751_v63 = vld [vmem:[%s1211_s7 + $0x18] sm:$0xff]  ;;  %v679_v12 = vadd.f32 %v662_v59, %v655_v58  ;;  %v749_v8 = vld [vmem:[%s1211_s7 + $0x8] sm:$0xff]  ;;  %v683_v10 = vadd.f32 %v674_v5, %v671_v4  ;;  %v697_v18 = vadd.f32 %v999_v43, %v690_v13 }
  0xc5   : > { %768 = vmatpush.msra.mxu1 %v751_v63  ;;  %v680_v17 = vadd.f32 %v663_v7, %v656_v9  ;;  %v778_v9 = vld [vmem:[%s1214_s10] sm:$0x1] }
  0xc6   : > { %v677_v15 = vadd.f32 %v649_v6, %v644_v60  ;;  %v685_v16 = vadd.f32 %v679_v12, %v676_v1  ;;  %v700_v23 = vadd.f32 3.0, %v697_v18  ;;  %v979_v6 = vld [vmem:[%s1215_s11 + $0x8] sm:$0xff]  ;;  %v978_v63 = vld [vmem:[%s1215_s11] sm:$0xff] }
  0xc7   : > { %769 = vmatpush.msra.mxu1 %v750_v0  ;;  %981 = vmatpush.bf16.msra.mxu3 %v979_v6 }
  0xc8   : > { %v688_v11 = vadd.f32 %v685_v16, %v682_v14  ;;  %v686_v22 = vadd.f32 %v680_v17, %v677_v15  ;;  %v703_v27 = vmax.f32 %v700_v23, 0.0 }
  0xc9   : > { %770 = vmatpush.msra.mxu1 %v749_v8 }
  0xca   : > { %v691_v24 = vadd.f32 %v688_v11, %v667_v21  ;;  %v689_v26 = vadd.f32 %v686_v22, %v683_v10  ;;  %v706_v30 = vmin.f32 %v703_v27, 6.0 }
  0xcb   : > { %771 = vmatpush.msra.mxu1 %v748_v20  ;;  %982 = vmatpush.bf16.msra.mxu3 %v978_v63 }
  0xcc   : > { %v698_v28 = vadd.f32 %v999_v43, %v691_v24  ;;  %v692_v29 = vadd.f32 %v689_v26, %v668_v25  ;;  %v709_v35 = vmul.f32 %v706_v30, %v697_v18  ;;  %v872_v30 = vld [vmem:[%s482_s24] sm:$0xff] }
  0xcd   : > { %860 = vmatpush.bf16.msrb.mxu1 %v979_v6 }
  0xce   : > { %v701_v33 = vadd.f32 3.0, %v698_v28  ;;  %v699_v34 = vadd.f32 %v999_v43, %v692_v29  ;;  %v712_v40 = vmul.f32 0.16666667, %v709_v35  ;;  %v874_v35 = vld [vmem:[%s482_s24 + $0x10] sm:$0xff] }
  0xd0   : > { %v704_v36 = vmax.f32 %v701_v33, 0.0  ;;  %v702_v37 = vadd.f32 3.0, %v699_v34  ;;  %v733_v46 = vmul.f32 %v721_v42, %v712_v40 }
  0xd1   : > { %861 = vmatpush.bf16.msrb.mxu1 %v978_v63 }
  0xd2   : > { %v707_v38 = vmin.f32 %v704_v36, 6.0  ;;  %v705_v39 = vmax.f32 %v702_v37, 0.0  ;;  %v736_v52 = vsel %vm602_vm1, %v733_v46, 0.0 }
  0xd4   : > { %v710_v31 = vmul.f32 %v707_v38, %v698_v28  ;;  %v708_v41 = vmin.f32 %v705_v39, 6.0  ;;  %v1000_v28 = vld [vmem:[%s1216_s12] ss:$0 sm:$0xff]  ;;  %v873_v38 = vld [vmem:[%s482_s24 + $0x8] sm:$0xff] }
  0xd6   : > { %v713_v44 = vmul.f32 0.16666667, %v710_v31  ;;  %v711_v45 = vmul.f32 %v708_v41, %v699_v34 }
  0xd8   : > { %v734_v48 = vmul.f32 %v726_v47, %v713_v44  ;;  %v714_v49 = vmul.f32 0.16666667, %v711_v45 }
  0xda   : > { %v737_v51 = vsel %vm602_vm1, %v734_v48, 0.0  ;;  %v735_v43 = vmul.f32 %v731_v50, %v714_v49 }
  0xdb   : > { %v738_v53 = vadd.f32 %v737_v51, %v736_v52 }
  0xdc   : > { %v739_v54 = vsel %vm602_vm1, %v735_v43, 0.0 }
  0xdd   : > { %v740_v55 = vadd.f32 %v739_v54, %v738_v53 }
  0xdf   : > { %v741_v56 = vrot.slane %v740_v55, 4 }
  0xe1   : > { %v742_v57 = vadd.f32 %v741_v56, %v740_v55 }
  0xe3   : > { %v743_v58 = vrot.slane %v742_v57, 2 }
  0xe5   : > { %v744_v59 = vadd.f32 %v743_v58, %v742_v57 }
  0xe7   : > { %v745_v60 = vrot.slane %v744_v59, 1 }
  0xe9   : > { %v746_v61 = vadd.f32 %v745_v60, %v744_v59 }
  0xeb   : > { %v747_v62 = vmul.f32 0.0625, %v746_v61 }
  0xed   : > { %963 = vmatmul.msk.f32.vlgmr.msra.gmra.mxu1 %vm602_vm1, %v747_v62 }
 0x16a   : > { %v773_v3 = vpop.f32.mrf.mxu1 }
 0x16b   : > { %v774_v4 = vadd.f32 %v773_v3, %v752_v2 }
 0x16d   : > { %v776_v5 = vmax.f32 %v774_v4, 0.0 }
 0x16f   : > { %964 = vmatmul.msk.f32.vlgmr.msrb.gmra.mxu2 %vm779_vm2, %v776_v5 }
 0x1f2   : > { %v800_v0 = vpop.f32.mrf.mxu2 }
 0x1f3   : > { %v801_v1 = vadd.f32 %v800_v0, %v778_v9 }
 0x1f5   : > { %v803_v12 = vsub.f32 0.0, %v801_v1 }
 0x1f7   : > { %v804_v7 = vmul.f32 1.442695, %v803_v12 }
 0x1f9   : > { %1001 = vpow2.f32 %v804_v7 }
 0x1ff   : > { %v1002_v13 = vpop.eup %1001 }
 0x200   : > { %v806_v14 = vadd.f32 1.0, %v1002_v13 }
 0x202   : > { %1003 = vrcp.f32 %v806_v14  ;;  %v818_v16 = vand.u32 2147483648, %v806_v14  ;;  %v816_v18 = vand.u32 2147483647, %v806_v14  ;;  %vm812_vm4 = vweird.f32 %v806_v14 }
 0x204   : > { %v819_v20 = vor.u32 1.1754944e-38, %v818_v16  ;;  %vm817_vm6 = vcmp.eq.f32.partialorder %v816_v18, 8.507059e+37 }
 0x208   : > { %v1004_v15 = vpop.eup %1003 }
 0x209   : > { %v808_v8 = vmul.f32 %v1004_v15, %v806_v14  ;;  %vm813_vm3 = vweird.f32 %v1004_v15 }
 0x20a   : > { %vm814_vm5 = vmor %vm812_vm4, %vm813_vm3 }
 0x20b   : > { %v809_v10 = vsub.f32 1.0, %v808_v8 }
 0x20d   : > { %v810_v17 = vmul.f32 %v1004_v15, %v809_v10 }
 0x20f   : > { %v811_v19 = vadd.f32 %v1004_v15, %v810_v17 }
 0x211   : > { %v815_v21 = vsel %vm814_vm5, %v1004_v15, %v811_v19 }
 0x212   : > { %v820_v11 = vsel %vm817_vm6, %v819_v20, %v815_v21 }
 0x213   : > { %v822_v22 = vperm.slane %v820_v11, 0 }
 0x215   : > { %v823_v23 = vmul.f32 %v822_v22, %v712_v40  ;;  %v824_v24 = vmul.f32 %v822_v22, %v713_v44  ;;  %v825_v25 = vmul.f32 %v822_v22, %v714_v49 }
 0x217   : > { %v826_v26 = vpack.c.bf16 %v824_v24, %v823_v23  ;;  %v827_v27 = vpack.c.bf16 %v825_v25, %v825_v25 }
 0x219   : > { %973 = vmatmul.msk.bf16.vlgmr.msrb.gmra.mxu1 %vm602_vm1, %v826_v26  ;;  %974 = vmatmul.msk.bf16.vlgmr.msra.gmra.mxu3 %vm602_vm1, %v827_v27 }
 0x296   : > { %v863_v29 = vpop.f32.mrf.mxu1 }
 0x297   : > { %v864_v32 = vadd.f32 %v1000_v28, %v863_v29 }
 0x299   : > { %v875_v33 = vadd.f32 %v872_v30, %v864_v32 }
 0x29b   : > { %878 = vst.msk [vmem:[%s487_s15] sm:$0xff] %vm509_vm0, %v875_v33 }
 0x29c   : > { %v868_v34 = vpop.f32.mrf.mxu3 }
 0x29d   : > { %v869_v36 = vadd.f32 %v1000_v28, %v868_v34 }
 0x29e   : > { %v865_v37 = vpop.f32.mrf.mxu1 }
 0x29f   : > { %v877_v39 = vadd.f32 %v874_v35, %v869_v36  ;;  %v866_v40 = vadd.f32 %v1000_v28, %v865_v37 }
 0x2a1   : > { %880 = vst.msk [vmem:[%s487_s15 + $0x10] sm:$0xff] %vm509_vm0, %v877_v39  ;;  %v876_v31 = vadd.f32 %v873_v38, %v866_v40 }
 0x2a3   : > { %879 = vst.msk [vmem:[%s487_s15 + $0x8] sm:$0xff] %vm509_vm0, %v876_v31 }
 0x2a4   : > { %v870_v41 = vpop.f32.mrf.mxu3 }
 0x2a5 PF: > { %s24_s29 = sadd.s32 1, %s1011_s29  }
 0x2a6   : > { %p21_p4 = scmp.ge.s32.totalorder %s24_s29, 4  }
 0x2a8   :  { %23 = sbr.rel (!%p21_p4) target bundleno = 1 (0x1), region = 109 }

</bundles_post_ra>
